<compile_context>
chip_gen: v6e
topology: v6e:2x2x1
jax: 0.10.0
libtpu: 0.0.40
codegen_flags: <defaults>
</compile_context>

<pallas_src>
import jax
import jax.numpy as jnp
import numpy as np
from jax.experimental import pallas as pl
from jax.experimental.pallas import tpu as pltpu


# ---------------- synthetic "params" (dataset == 'Sanyo' path: no id embedding) ----
class Params:
    d_model = 8            # feature dim of src/trg sequences
    n_channel = (16, 16)   # TCN channels per level
    d_kernel = 3           # TCN kernel size
    predict_start = 8      # conditioning window length T
    predict_steps = 4      # number of forecast steps
    dropout = 0.0          # inference: dropout == identity


# ---------------- deterministic synthetic weights ----------------------------------
# weight_norm is a reparametrization; we generate the effective conv weights directly.
# Conv taps are stored as (K, Cout, Cin) so each tap is an MXU-ready LHS; biases as (Cout, 1).
def init_weights(key, p):
    chans = [p.d_model] + list(p.n_channel)
    K = p.d_kernel
    keys = iter(jax.random.split(key, 64))

    def nrm(shape, scale):
        return jax.random.normal(next(keys), shape, jnp.float32) * scale

    ws = []
    for lvl in range(len(p.n_channel)):
        cin, cout = chans[lvl], chans[lvl + 1]
        ws.append(nrm((K, cout, cin), 0.3))    # conv1 taps
        ws.append(nrm((cout, 1), 0.1))         # conv1 bias
        ws.append(nrm((K, cout, cout), 0.3))   # conv2 taps
        ws.append(nrm((cout, 1), 0.1))         # conv2 bias
        if cin != cout:
            ws.append(nrm((cout, cin), 0.3))   # downsample 1x1 conv
            ws.append(nrm((cout, 1), 0.1))     # downsample bias
    C = p.n_channel[-1]
    ws.append(nrm((2, C), 0.3))  # output weights acting on context c (row0: y, row1: sigma)
    ws.append(nrm((2, C), 0.3))  # output weights acting on last hidden a
    ws.append(nrm((2, 1), 0.1))  # output biases
    return ws


# ---------------- Pallas kernel -----------------------------------------------------
def build_kernel(p, tile_n):
    K = p.d_kernel
    T = p.predict_start
    W = T + 1
    chans = [p.d_model] + list(p.n_channel)
    n_levels = len(p.n_channel)
    C = chans[-1]
    NITER = 30  # bisection steps for the entmax-1.5 threshold (interval width 2^-30)

    def kernel(*refs):
        it = iter(refs)
        x_ref = next(it)
        levels = []
        for lvl in range(n_levels):
            cin, cout = chans[lvl], chans[lvl + 1]
            w1 = next(it); b1 = next(it); w2 = next(it); b2 = next(it)
            wd = bd = None
            if cin != cout:
                wd = next(it); bd = next(it)
            levels.append((w1, b1, w2, b2, wd, bd))
        woc = next(it); woa = next(it); bo = next(it)
        y_ref = next(it); s_ref = next(it)

        # activations are (channels, W*tile_n); column index = w*tile_n + n_local
        h = x_ref[0]  # (D, W*tile_n) f32

        def tshift(v, s):
            # causal time shift by s steps: shifted[:, w*tile_n + n] = v[:, (w-s)*tile_n + n]
            # (zero for w < s).  Aligned lane slice + concat -> cheap, no matmuls, no masks.
            if s == 0:
                return v
            pad = jnp.zeros((v.shape[0], s * tile_n), jnp.float32)
            return jnp.concatenate([pad, v[:, : (W - s) * tile_n]], axis=1)

        def dilated_causal_conv(v, w_taps, bias, dil):
            acc = None
            for k in range(K):
                s = (K - 1 - k) * dil
                term = jnp.dot(w_taps[k], tshift(v, s),
                               preferred_element_type=jnp.float32)
                acc = term if acc is None else acc + term
            return acc + bias[...]  # (Cout, W*tile_n) + (Cout, 1)

        # ---- TemporalConvNet (dilated causal conv blocks, dropout = identity) ----
        for lvl, (w1, b1, w2, b2, wd, bd) in enumerate(levels):
            dil = 2 ** lvl
            y1 = jnp.maximum(dilated_causal_conv(h, w1, b1, dil), 0.0)
            y2 = jnp.maximum(dilated_causal_conv(y1, w2, b2, dil), 0.0)
            if wd is not None:
                res = jnp.dot(wd[...], h, preferred_element_type=jnp.float32) + bd[...]
            else:
                res = h
            h = jnp.maximum(y2 + res, 0.0)

        # ---- attention: query = last step, keys/values = first T steps (batched) ----
        a = h[:, (W - 1) * tile_n:]                                # (C, tile_n)
        sub_t = jax.lax.broadcasted_iota(jnp.int32, (T, 1), 0)     # hoisted constant
        S = jnp.zeros((T, tile_n), jnp.float32)
        for t in range(T):
            ht = h[:, t * tile_n:(t + 1) * tile_n]                 # (C, tile_n)
            st = jnp.sum(a * ht, axis=0, keepdims=True)            # (1, tile_n)
            S = S + st * (sub_t == t).astype(jnp.float32)          # scatter into row t

        # ---- exact entmax-1.5 over the T scores, batched across the tile ----
        # tau* solves sum(relu(X - tau)^2) == 1 and lies in [max(X)-1, max(X)]; after the
        # max-shift the interval is exactly [-1, 0] -> fixed-interval bisection.
        Xh = (S - jnp.max(S, axis=0, keepdims=True)) * 0.5         # (T, tile_n), max per col = 0
        lo = jnp.full((1, tile_n), -1.0, jnp.float32)
        hi = jnp.zeros((1, tile_n), jnp.float32)
        for _ in range(NITER):
            mid = 0.5 * (lo + hi)
            f = jnp.sum(jnp.square(jnp.maximum(Xh - mid, 0.0)), axis=0, keepdims=True)
            pred = f >= 1.0
            lo = jnp.where(pred, mid, lo)
            hi = jnp.where(pred, hi, mid)
        tau = 0.5 * (lo + hi)
        pw = jnp.maximum(Xh - tau, 0.0)
        score_p = pw * pw                                          # (T, tile_n) entmax15 weights

        # ---- context, output linears, softplus ----
        c_ctx = jnp.zeros((C, tile_n), jnp.float32)
        for t in range(T):
            ht = h[:, t * tile_n:(t + 1) * tile_n]
            c_ctx = c_ctx + score_p[t:t + 1, :] * ht               # (C, tile_n)

        out2 = (jnp.dot(woc[...], c_ctx, preferred_element_type=jnp.float32)
                + jnp.dot(woa[...], a, preferred_element_type=jnp.float32)
                + bo[...])                                         # (2, tile_n)
        y_ref[...] = out2[0:1, :]                                  # lane-dense store
        sv = out2[1:2, :]
        s_ref[...] = jnp.log(1.0 + jnp.exp(-jnp.abs(sv))) + jnp.maximum(sv, 0.0)  # softplus

    return kernel


# ---------------- wrapper ------------------------------------------------------------
def transformer_forward(src_seq, trg_seq, weights, p, tile_n=128):
    B = src_seq.shape[0]
    D, T, steps, K = p.d_model, p.predict_start, p.predict_steps, p.d_kernel
    W = T + 1
    N = steps * B
    num_tiles = pl.cdiv(N, tile_n)
    N_pad = num_tiles * tile_n

    # build the sliding windows and lay them out channel-major, sample tiles contiguous:
    #   x_in[nt, d, w*tile_n + nl]  with global sample index n = nt*tile_n + nl = t*B + b
    srctrg = jnp.concatenate([src_seq, trg_seq], axis=1).astype(jnp.float32)   # (B, T+steps, D)
    windows = jnp.stack([srctrg[:, t:t + W, :] for t in range(steps)], 0)      # (steps, B, W, D)
    xw = jnp.transpose(windows, (3, 2, 0, 1)).reshape(D, W, N)                 # (D, W, N)
    xw = jnp.pad(xw, ((0, 0), (0, 0), (0, N_pad - N)))
    x_in = jnp.transpose(xw.reshape(D, W, num_tiles, tile_n),
                         (2, 0, 1, 3)).reshape(num_tiles, D, W * tile_n)

    kernel = build_kernel(p, tile_n)

    in_specs = [pl.BlockSpec((1, D, W * tile_n), lambda n: (n, 0, 0))]
    for w in weights:  # weights stay resident in VMEM (constant block index)
        in_specs.append(pl.BlockSpec(w.shape, (lambda n, _nd=w.ndim: (0,) * _nd)))
    out_specs = [pl.BlockSpec((1, tile_n), lambda n: (0, n)),
                 pl.BlockSpec((1, tile_n), lambda n: (0, n))]
    out_shape = (jax.ShapeDtypeStruct((1, N_pad), jnp.float32),
                 jax.ShapeDtypeStruct((1, N_pad), jnp.float32))

    # advisory cost estimate so XLA schedules the custom call sensibly (helps most on v5e)
    chans = [D] + list(p.n_channel)
    flops_per_sample = 0
    for lvl in range(len(p.n_channel)):
        cin, cout = chans[lvl], chans[lvl + 1]
        flops_per_sample += 2 * W * (K * cin * cout + K * cout * cout)
        if cin != cout:
            flops_per_sample += 2 * W * cin * cout
    flops_per_sample += 4 * T * chans[-1] + 8 * chans[-1]
    cost = pl.CostEstimate(
        flops=int(flops_per_sample * N_pad),
        transcendentals=int(2 * N_pad),
        bytes_accessed=int(x_in.size * 4 + 2 * N_pad * 4 + sum(int(w.size) * 4 for w in weights)),
    )

    y_raw, s_raw = pl.pallas_call(
        kernel,
        grid=(num_tiles,),
        in_specs=in_specs,
        out_specs=out_specs,
        out_shape=out_shape,
        compiler_params=pltpu.CompilerParams(dimension_semantics=("parallel",)),
        cost_estimate=cost,
    )(x_in, *weights)

    # y_hat[b, t] = out[t*B + b]   (matches .t().reshape(steps, B).t() in PyTorch)
    y_hat = y_raw[0, :N].reshape(steps, B).T
    sigma = s_raw[0, :N].reshape(steps, B).T
    return y_hat, sigma


# ---------------- pure-JAX reference (sort-based exact entmax) -----------------------
def reference_forward(src_seq, trg_seq, weights, p):
    chans = [p.d_model] + list(p.n_channel)
    K, T, steps = p.d_kernel, p.predict_start, p.predict_steps
    W = T + 1
    B = src_seq.shape[0]
    srctrg = jnp.concatenate([src_seq, trg_seq], axis=1)
    windows = jnp.stack([srctrg[:, t:t + W, :] for t in range(steps)], 0)
    h = windows.reshape(steps * B, W, p.d_model).astype(jnp.float32)   # (N, W, D)

    it = iter(weights)
    for lvl in range(len(p.n_channel)):
        cin, cout = chans[lvl], chans[lvl + 1]
        w1 = next(it); b1 = next(it); w2 = next(it); b2 = next(it)
        wd = bd = None
        if cin != cout:
            wd = next(it); bd = next(it)
        dil = 2 ** lvl

        def conv(v, wk, bias):
            acc = jnp.zeros(v.shape[:-1] + (wk.shape[1],), jnp.float32) + bias[:, 0][None, None, :]
            for k in range(K):
                s = (K - 1 - k) * dil
                vs = jnp.pad(v, ((0, 0), (s, 0), (0, 0)))[:, :W, :]
                acc = acc + jnp.einsum('nwc,oc->nwo', vs, wk[k])
            return acc

        y1 = jax.nn.relu(conv(h, w1, b1))
        y2 = jax.nn.relu(conv(y1, w2, b2))
        res = h if wd is None else jnp.einsum('nwc,oc->nwo', h, wd) + bd[:, 0][None, None, :]
        h = jax.nn.relu(y2 + res)

    woc = next(it); woa = next(it); bo = next(it)

    a = h[:, -1, :]
    bm = h[:, :-1, :]
    scores = jnp.einsum('nc,ntc->nt', a, bm)
    X = (scores - scores.max(-1, keepdims=True)) * 0.5
    Xsrt = -jnp.sort(-X, axis=-1)
    rho = jnp.arange(1, T + 1, dtype=jnp.float32)
    mean = jnp.cumsum(Xsrt, -1) / rho
    mean_sq = jnp.cumsum(Xsrt ** 2, -1) / rho
    ss = rho * (mean_sq - mean ** 2)
    delta = jnp.clip((1 - ss) / rho, 0, None)
    tau = mean - jnp.sqrt(delta)
    support = jnp.sum(tau <= Xsrt, axis=-1, keepdims=True)
    tau_star = jnp.take_along_axis(tau, support - 1, axis=-1)
    pw = jnp.clip(X - tau_star, 0, None) ** 2
    c = jnp.einsum('nt,ntc->nc', pw, bm)
    lin = c @ woc.T + a @ woa.T + bo[:, 0][None, :]
    yv = lin[:, 0]
    sv = jax.nn.softplus(lin[:, 1])
    return yv.reshape(steps, B).T, sv.reshape(steps, B).T


if __name__ == "__main__":
    p = Params()
    key = jax.random.PRNGKey(0)
    k1, k2, k3 = jax.random.split(key, 3)
    B = 2
    src_seq = jax.random.normal(k1, (B, p.predict_start, p.d_model), jnp.float32)
    trg_seq = jax.random.normal(k2, (B, p.predict_steps, p.d_model), jnp.float32)
    weights = init_weights(k3, p)

    y_hat, sigma = transformer_forward(src_seq, trg_seq, weights, p)
    jax.block_until_ready((y_hat, sigma))

    y_ref, s_ref = reference_forward(src_seq, trg_seq, weights, p)
    assert y_hat.shape == (B, p.predict_steps) and sigma.shape == (B, p.predict_steps)
    np.testing.assert_allclose(np.asarray(y_hat), np.asarray(y_ref), rtol=1e-3, atol=1e-3)
    np.testing.assert_allclose(np.asarray(sigma), np.asarray(s_ref), rtol=1e-3, atol=1e-3)
    print("KERNEL_OK")
</pallas_src>

<mosaic_0001>
module attributes {stable_mosaic.version = 11 : i64} {
  func.func @kernel(%arg0: i32, %arg1: memref<1x8x1152xf32, #tpu.memory_space<vmem>>, %arg2: memref<3x16x8xf32, #tpu.memory_space<vmem>>, %arg3: memref<16x1xf32, #tpu.memory_space<vmem>>, %arg4: memref<3x16x16xf32, #tpu.memory_space<vmem>>, %arg5: memref<16x1xf32, #tpu.memory_space<vmem>>, %arg6: memref<16x8xf32, #tpu.memory_space<vmem>>, %arg7: memref<16x1xf32, #tpu.memory_space<vmem>>, %arg8: memref<3x16x16xf32, #tpu.memory_space<vmem>>, %arg9: memref<16x1xf32, #tpu.memory_space<vmem>>, %arg10: memref<3x16x16xf32, #tpu.memory_space<vmem>>, %arg11: memref<16x1xf32, #tpu.memory_space<vmem>>, %arg12: memref<2x16xf32, #tpu.memory_space<vmem>>, %arg13: memref<2x16xf32, #tpu.memory_space<vmem>>, %arg14: memref<2x1xf32, #tpu.memory_space<vmem>>, %arg15: memref<1x128xf32, #tpu.memory_space<vmem>>, %arg16: memref<1x128xf32, #tpu.memory_space<vmem>>) attributes {dimension_semantics = [#tpu.dimension_semantics<parallel>], iteration_bounds = array<i64: 1>, scalar_prefetch = 0 : i64, scratch_operands = 0 : i64, tpu.core_type = #tpu.core_type<tc>, window_params = [{transform_indices = @transform_0, window_bounds = array<i64: 1, 8, 1152>}, {pipeline_mode = #tpu.pipeline_mode<synchronous>, transform_indices = @transform_1, window_bounds = array<i64: 3, 16, 8>}, {pipeline_mode = #tpu.pipeline_mode<synchronous>, transform_indices = @transform_2, window_bounds = array<i64: 16, 1>}, {pipeline_mode = #tpu.pipeline_mode<synchronous>, transform_indices = @transform_3, window_bounds = array<i64: 3, 16, 16>}, {pipeline_mode = #tpu.pipeline_mode<synchronous>, transform_indices = @transform_4, window_bounds = array<i64: 16, 1>}, {pipeline_mode = #tpu.pipeline_mode<synchronous>, transform_indices = @transform_5, window_bounds = array<i64: 16, 8>}, {pipeline_mode = #tpu.pipeline_mode<synchronous>, transform_indices = @transform_6, window_bounds = array<i64: 16, 1>}, {pipeline_mode = #tpu.pipeline_mode<synchronous>, transform_indices = @transform_7, window_bounds = array<i64: 3, 16, 16>}, {pipeline_mode = #tpu.pipeline_mode<synchronous>, transform_indices = @transform_8, window_bounds = array<i64: 16, 1>}, {pipeline_mode = #tpu.pipeline_mode<synchronous>, transform_indices = @transform_9, window_bounds = array<i64: 3, 16, 16>}, {pipeline_mode = #tpu.pipeline_mode<synchronous>, transform_indices = @transform_10, window_bounds = array<i64: 16, 1>}, {pipeline_mode = #tpu.pipeline_mode<synchronous>, transform_indices = @transform_11, window_bounds = array<i64: 2, 16>}, {pipeline_mode = #tpu.pipeline_mode<synchronous>, transform_indices = @transform_12, window_bounds = array<i64: 2, 16>}, {pipeline_mode = #tpu.pipeline_mode<synchronous>, transform_indices = @transform_13, window_bounds = array<i64: 2, 1>}, {transform_indices = @transform_14, window_bounds = array<i64: 1, 128>}, {transform_indices = @transform_15, window_bounds = array<i64: 1, 128>}]} {
    %c0 = arith.constant 0 : index
    %c0_0 = arith.constant 0 : index
    %c0_1 = arith.constant 0 : index
    %0 = vector.load %arg1[%c0, %c0_0, %c0_1] : memref<1x8x1152xf32, #tpu.memory_space<vmem>>, vector<1x8x1152xf32>
    %1 = vector.shape_cast %0 : vector<1x8x1152xf32> to vector<8x1152xf32>
    %c0_2 = arith.constant 0 : index
    %c0_3 = arith.constant 0 : index
    %c0_4 = arith.constant 0 : index
    %2 = vector.load %arg2[%c0_2, %c0_3, %c0_4] : memref<3x16x8xf32, #tpu.memory_space<vmem>>, vector<1x16x8xf32>
    %3 = vector.shape_cast %2 : vector<1x16x8xf32> to vector<16x8xf32>
    %cst = arith.constant 0.000000e+00 : f32
    %4 = vector.broadcast %cst : f32 to vector<8x256xf32>
    %5 = vector.extract_strided_slice %1 {offsets = [0, 0], sizes = [8, 896], strides = [1, 1]} : vector<8x1152xf32> to vector<8x896xf32>
    %6 = tpu.concatenate %4, %5 in 1 : vector<8x256xf32>, vector<8x896xf32> -> vector<8x1152xf32>
    %cst_5 = arith.constant dense<0.000000e+00> : vector<16x1152xf32>
    %7 = tpu.matmul %3, %6, %cst_5 {dimension_numbers = #tpu.dot_dimension_numbers<[1], [0], [0], [1], [0, 0, 1, 1], [], []>} : vector<16x8xf32>, vector<8x1152xf32>, vector<16x1152xf32> -> vector<16x1152xf32>
    %c1 = arith.constant 1 : index
    %c0_6 = arith.constant 0 : index
    %c0_7 = arith.constant 0 : index
    %8 = vector.load %arg2[%c1, %c0_6, %c0_7] : memref<3x16x8xf32, #tpu.memory_space<vmem>>, vector<1x16x8xf32>
    %9 = vector.shape_cast %8 : vector<1x16x8xf32> to vector<16x8xf32>
    %cst_8 = arith.constant 0.000000e+00 : f32
    %10 = vector.broadcast %cst_8 : f32 to vector<8x128xf32>
    %11 = vector.extract_strided_slice %1 {offsets = [0, 0], sizes = [8, 1024], strides = [1, 1]} : vector<8x1152xf32> to vector<8x1024xf32>
    %12 = tpu.concatenate %10, %11 in 1 : vector<8x128xf32>, vector<8x1024xf32> -> vector<8x1152xf32>
    %cst_9 = arith.constant dense<0.000000e+00> : vector<16x1152xf32>
    %13 = tpu.matmul %9, %12, %cst_9 {dimension_numbers = #tpu.dot_dimension_numbers<[1], [0], [0], [1], [0, 0, 1, 1], [], []>} : vector<16x8xf32>, vector<8x1152xf32>, vector<16x1152xf32> -> vector<16x1152xf32>
    %14 = arith.addf %7, %13 : vector<16x1152xf32>
    %c2 = arith.constant 2 : index
    %c0_10 = arith.constant 0 : index
    %c0_11 = arith.constant 0 : index
    %15 = vector.load %arg2[%c2, %c0_10, %c0_11] : memref<3x16x8xf32, #tpu.memory_space<vmem>>, vector<1x16x8xf32>
    %16 = vector.shape_cast %15 : vector<1x16x8xf32> to vector<16x8xf32>
    %cst_12 = arith.constant dense<0.000000e+00> : vector<16x1152xf32>
    %17 = tpu.matmul %16, %1, %cst_12 {dimension_numbers = #tpu.dot_dimension_numbers<[1], [0], [0], [1], [0, 0, 1, 1], [], []>} : vector<16x8xf32>, vector<8x1152xf32>, vector<16x1152xf32> -> vector<16x1152xf32>
    %18 = arith.addf %14, %17 : vector<16x1152xf32>
    %c0_13 = arith.constant 0 : index
    %c0_14 = arith.constant 0 : index
    %19 = vector.load %arg3[%c0_13, %c0_14] : memref<16x1xf32, #tpu.memory_space<vmem>>, vector<16x1xf32>
    %20 = vector.broadcast %19 : vector<16x1xf32> to vector<16x1152xf32>
    %21 = arith.addf %18, %20 : vector<16x1152xf32>
    %cst_15 = arith.constant 0.000000e+00 : f32
    %22 = vector.broadcast %cst_15 : f32 to vector<16x1152xf32>
    %23 = arith.maximumf %21, %22 : vector<16x1152xf32>
    %c0_16 = arith.constant 0 : index
    %c0_17 = arith.constant 0 : index
    %c0_18 = arith.constant 0 : index
    %24 = vector.load %arg4[%c0_16, %c0_17, %c0_18] : memref<3x16x16xf32, #tpu.memory_space<vmem>>, vector<1x16x16xf32>
    %25 = vector.shape_cast %24 : vector<1x16x16xf32> to vector<16x16xf32>
    %cst_19 = arith.constant 0.000000e+00 : f32
    %26 = vector.broadcast %cst_19 : f32 to vector<16x256xf32>
    %27 = vector.extract_strided_slice %23 {offsets = [0, 0], sizes = [16, 896], strides = [1, 1]} : vector<16x1152xf32> to vector<16x896xf32>
    %28 = tpu.concatenate %26, %27 in 1 : vector<16x256xf32>, vector<16x896xf32> -> vector<16x1152xf32>
    %cst_20 = arith.constant dense<0.000000e+00> : vector<16x1152xf32>
    %29 = tpu.matmul %25, %28, %cst_20 {dimension_numbers = #tpu.dot_dimension_numbers<[1], [0], [0], [1], [0, 0, 1, 1], [], []>} : vector<16x16xf32>, vector<16x1152xf32>, vector<16x1152xf32> -> vector<16x1152xf32>
    %c1_21 = arith.constant 1 : index
    %c0_22 = arith.constant 0 : index
    %c0_23 = arith.constant 0 : index
    %30 = vector.load %arg4[%c1_21, %c0_22, %c0_23] : memref<3x16x16xf32, #tpu.memory_space<vmem>>, vector<1x16x16xf32>
    %31 = vector.shape_cast %30 : vector<1x16x16xf32> to vector<16x16xf32>
    %cst_24 = arith.constant 0.000000e+00 : f32
    %32 = vector.broadcast %cst_24 : f32 to vector<16x128xf32>
    %33 = vector.extract_strided_slice %23 {offsets = [0, 0], sizes = [16, 1024], strides = [1, 1]} : vector<16x1152xf32> to vector<16x1024xf32>
    %34 = tpu.concatenate %32, %33 in 1 : vector<16x128xf32>, vector<16x1024xf32> -> vector<16x1152xf32>
    %cst_25 = arith.constant dense<0.000000e+00> : vector<16x1152xf32>
    %35 = tpu.matmul %31, %34, %cst_25 {dimension_numbers = #tpu.dot_dimension_numbers<[1], [0], [0], [1], [0, 0, 1, 1], [], []>} : vector<16x16xf32>, vector<16x1152xf32>, vector<16x1152xf32> -> vector<16x1152xf32>
    %36 = arith.addf %29, %35 : vector<16x1152xf32>
    %c2_26 = arith.constant 2 : index
    %c0_27 = arith.constant 0 : index
    %c0_28 = arith.constant 0 : index
    %37 = vector.load %arg4[%c2_26, %c0_27, %c0_28] : memref<3x16x16xf32, #tpu.memory_space<vmem>>, vector<1x16x16xf32>
    %38 = vector.shape_cast %37 : vector<1x16x16xf32> to vector<16x16xf32>
    %cst_29 = arith.constant dense<0.000000e+00> : vector<16x1152xf32>
    %39 = tpu.matmul %38, %23, %cst_29 {dimension_numbers = #tpu.dot_dimension_numbers<[1], [0], [0], [1], [0, 0, 1, 1], [], []>} : vector<16x16xf32>, vector<16x1152xf32>, vector<16x1152xf32> -> vector<16x1152xf32>
    %40 = arith.addf %36, %39 : vector<16x1152xf32>
    %c0_30 = arith.constant 0 : index
    %c0_31 = arith.constant 0 : index
    %41 = vector.load %arg5[%c0_30, %c0_31] : memref<16x1xf32, #tpu.memory_space<vmem>>, vector<16x1xf32>
    %42 = vector.broadcast %41 : vector<16x1xf32> to vector<16x1152xf32>
    %43 = arith.addf %40, %42 : vector<16x1152xf32>
    %cst_32 = arith.constant 0.000000e+00 : f32
    %44 = vector.broadcast %cst_32 : f32 to vector<16x1152xf32>
    %45 = arith.maximumf %43, %44 : vector<16x1152xf32>
    %c0_33 = arith.constant 0 : index
    %c0_34 = arith.constant 0 : index
    %46 = vector.load %arg6[%c0_33, %c0_34] : memref<16x8xf32, #tpu.memory_space<vmem>>, vector<16x8xf32>
    %cst_35 = arith.constant dense<0.000000e+00> : vector<16x1152xf32>
    %47 = tpu.matmul %46, %1, %cst_35 {dimension_numbers = #tpu.dot_dimension_numbers<[1], [0], [0], [1], [0, 0, 1, 1], [], []>} : vector<16x8xf32>, vector<8x1152xf32>, vector<16x1152xf32> -> vector<16x1152xf32>
    %c0_36 = arith.constant 0 : index
    %c0_37 = arith.constant 0 : index
    %48 = vector.load %arg7[%c0_36, %c0_37] : memref<16x1xf32, #tpu.memory_space<vmem>>, vector<16x1xf32>
    %49 = vector.broadcast %48 : vector<16x1xf32> to vector<16x1152xf32>
    %50 = arith.addf %47, %49 : vector<16x1152xf32>
    %51 = arith.addf %45, %50 : vector<16x1152xf32>
    %cst_38 = arith.constant 0.000000e+00 : f32
    %52 = vector.broadcast %cst_38 : f32 to vector<16x1152xf32>
    %53 = arith.maximumf %51, %52 : vector<16x1152xf32>
    %c0_39 = arith.constant 0 : index
    %c0_40 = arith.constant 0 : index
    %c0_41 = arith.constant 0 : index
    %54 = vector.load %arg8[%c0_39, %c0_40, %c0_41] : memref<3x16x16xf32, #tpu.memory_space<vmem>>, vector<1x16x16xf32>
    %55 = vector.shape_cast %54 : vector<1x16x16xf32> to vector<16x16xf32>
    %cst_42 = arith.constant 0.000000e+00 : f32
    %56 = vector.broadcast %cst_42 : f32 to vector<16x512xf32>
    %57 = vector.extract_strided_slice %53 {offsets = [0, 0], sizes = [16, 640], strides = [1, 1]} : vector<16x1152xf32> to vector<16x640xf32>
    %58 = tpu.concatenate %56, %57 in 1 : vector<16x512xf32>, vector<16x640xf32> -> vector<16x1152xf32>
    %cst_43 = arith.constant dense<0.000000e+00> : vector<16x1152xf32>
    %59 = tpu.matmul %55, %58, %cst_43 {dimension_numbers = #tpu.dot_dimension_numbers<[1], [0], [0], [1], [0, 0, 1, 1], [], []>} : vector<16x16xf32>, vector<16x1152xf32>, vector<16x1152xf32> -> vector<16x1152xf32>
    %c1_44 = arith.constant 1 : index
    %c0_45 = arith.constant 0 : index
    %c0_46 = arith.constant 0 : index
    %60 = vector.load %arg8[%c1_44, %c0_45, %c0_46] : memref<3x16x16xf32, #tpu.memory_space<vmem>>, vector<1x16x16xf32>
    %61 = vector.shape_cast %60 : vector<1x16x16xf32> to vector<16x16xf32>
    %cst_47 = arith.constant 0.000000e+00 : f32
    %62 = vector.broadcast %cst_47 : f32 to vector<16x256xf32>
    %63 = vector.extract_strided_slice %53 {offsets = [0, 0], sizes = [16, 896], strides = [1, 1]} : vector<16x1152xf32> to vector<16x896xf32>
    %64 = tpu.concatenate %62, %63 in 1 : vector<16x256xf32>, vector<16x896xf32> -> vector<16x1152xf32>
    %cst_48 = arith.constant dense<0.000000e+00> : vector<16x1152xf32>
    %65 = tpu.matmul %61, %64, %cst_48 {dimension_numbers = #tpu.dot_dimension_numbers<[1], [0], [0], [1], [0, 0, 1, 1], [], []>} : vector<16x16xf32>, vector<16x1152xf32>, vector<16x1152xf32> -> vector<16x1152xf32>
    %66 = arith.addf %59, %65 : vector<16x1152xf32>
    %c2_49 = arith.constant 2 : index
    %c0_50 = arith.constant 0 : index
    %c0_51 = arith.constant 0 : index
    %67 = vector.load %arg8[%c2_49, %c0_50, %c0_51] : memref<3x16x16xf32, #tpu.memory_space<vmem>>, vector<1x16x16xf32>
    %68 = vector.shape_cast %67 : vector<1x16x16xf32> to vector<16x16xf32>
    %cst_52 = arith.constant dense<0.000000e+00> : vector<16x1152xf32>
    %69 = tpu.matmul %68, %53, %cst_52 {dimension_numbers = #tpu.dot_dimension_numbers<[1], [0], [0], [1], [0, 0, 1, 1], [], []>} : vector<16x16xf32>, vector<16x1152xf32>, vector<16x1152xf32> -> vector<16x1152xf32>
    %70 = arith.addf %66, %69 : vector<16x1152xf32>
    %c0_53 = arith.constant 0 : index
    %c0_54 = arith.constant 0 : index
    %71 = vector.load %arg9[%c0_53, %c0_54] : memref<16x1xf32, #tpu.memory_space<vmem>>, vector<16x1xf32>
    %72 = vector.broadcast %71 : vector<16x1xf32> to vector<16x1152xf32>
    %73 = arith.addf %70, %72 : vector<16x1152xf32>
    %cst_55 = arith.constant 0.000000e+00 : f32
    %74 = vector.broadcast %cst_55 : f32 to vector<16x1152xf32>
    %75 = arith.maximumf %73, %74 : vector<16x1152xf32>
    %c0_56 = arith.constant 0 : index
    %c0_57 = arith.constant 0 : index
    %c0_58 = arith.constant 0 : index
    %76 = vector.load %arg10[%c0_56, %c0_57, %c0_58] : memref<3x16x16xf32, #tpu.memory_space<vmem>>, vector<1x16x16xf32>
    %77 = vector.shape_cast %76 : vector<1x16x16xf32> to vector<16x16xf32>
    %cst_59 = arith.constant 0.000000e+00 : f32
    %78 = vector.broadcast %cst_59 : f32 to vector<16x512xf32>
    %79 = vector.extract_strided_slice %75 {offsets = [0, 0], sizes = [16, 640], strides = [1, 1]} : vector<16x1152xf32> to vector<16x640xf32>
    %80 = tpu.concatenate %78, %79 in 1 : vector<16x512xf32>, vector<16x640xf32> -> vector<16x1152xf32>
    %cst_60 = arith.constant dense<0.000000e+00> : vector<16x1152xf32>
    %81 = tpu.matmul %77, %80, %cst_60 {dimension_numbers = #tpu.dot_dimension_numbers<[1], [0], [0], [1], [0, 0, 1, 1], [], []>} : vector<16x16xf32>, vector<16x1152xf32>, vector<16x1152xf32> -> vector<16x1152xf32>
    %c1_61 = arith.constant 1 : index
    %c0_62 = arith.constant 0 : index
    %c0_63 = arith.constant 0 : index
    %82 = vector.load %arg10[%c1_61, %c0_62, %c0_63] : memref<3x16x16xf32, #tpu.memory_space<vmem>>, vector<1x16x16xf32>
    %83 = vector.shape_cast %82 : vector<1x16x16xf32> to vector<16x16xf32>
    %cst_64 = arith.constant 0.000000e+00 : f32
    %84 = vector.broadcast %cst_64 : f32 to vector<16x256xf32>
    %85 = vector.extract_strided_slice %75 {offsets = [0, 0], sizes = [16, 896], strides = [1, 1]} : vector<16x1152xf32> to vector<16x896xf32>
    %86 = tpu.concatenate %84, %85 in 1 : vector<16x256xf32>, vector<16x896xf32> -> vector<16x1152xf32>
    %cst_65 = arith.constant dense<0.000000e+00> : vector<16x1152xf32>
    %87 = tpu.matmul %83, %86, %cst_65 {dimension_numbers = #tpu.dot_dimension_numbers<[1], [0], [0], [1], [0, 0, 1, 1], [], []>} : vector<16x16xf32>, vector<16x1152xf32>, vector<16x1152xf32> -> vector<16x1152xf32>
    %88 = arith.addf %81, %87 : vector<16x1152xf32>
    %c2_66 = arith.constant 2 : index
    %c0_67 = arith.constant 0 : index
    %c0_68 = arith.constant 0 : index
    %89 = vector.load %arg10[%c2_66, %c0_67, %c0_68] : memref<3x16x16xf32, #tpu.memory_space<vmem>>, vector<1x16x16xf32>
    %90 = vector.shape_cast %89 : vector<1x16x16xf32> to vector<16x16xf32>
    %cst_69 = arith.constant dense<0.000000e+00> : vector<16x1152xf32>
    %91 = tpu.matmul %90, %75, %cst_69 {dimension_numbers = #tpu.dot_dimension_numbers<[1], [0], [0], [1], [0, 0, 1, 1], [], []>} : vector<16x16xf32>, vector<16x1152xf32>, vector<16x1152xf32> -> vector<16x1152xf32>
    %92 = arith.addf %88, %91 : vector<16x1152xf32>
    %c0_70 = arith.constant 0 : index
    %c0_71 = arith.constant 0 : index
    %93 = vector.load %arg11[%c0_70, %c0_71] : memref<16x1xf32, #tpu.memory_space<vmem>>, vector<16x1xf32>
    %94 = vector.broadcast %93 : vector<16x1xf32> to vector<16x1152xf32>
    %95 = arith.addf %92, %94 : vector<16x1152xf32>
    %cst_72 = arith.constant 0.000000e+00 : f32
    %96 = vector.broadcast %cst_72 : f32 to vector<16x1152xf32>
    %97 = arith.maximumf %95, %96 : vector<16x1152xf32>
    %98 = arith.addf %97, %53 : vector<16x1152xf32>
    %cst_73 = arith.constant 0.000000e+00 : f32
    %99 = vector.broadcast %cst_73 : f32 to vector<16x1152xf32>
    %100 = arith.maximumf %98, %99 : vector<16x1152xf32>
    %101 = vector.extract_strided_slice %100 {offsets = [0, 1024], sizes = [16, 128], strides = [1, 1]} : vector<16x1152xf32> to vector<16x128xf32>
    %102 = tpu.iota {dimensions = array<i32: 0>} : vector<8x1xi32>
    %cst_74 = arith.constant 0.000000e+00 : f32
    %103 = vector.broadcast %cst_74 : f32 to vector<8x128xf32>
    %104 = vector.extract_strided_slice %100 {offsets = [0, 0], sizes = [16, 128], strides = [1, 1]} : vector<16x1152xf32> to vector<16x128xf32>
    %105 = arith.mulf %101, %104 : vector<16x128xf32>
    %cst_75 = arith.constant dense<0.000000e+00> : vector<128xf32>
    %106 = vector.multi_reduction <add>, %105, %cst_75 [0] : vector<16x128xf32> to vector<128xf32>
    %107 = vector.shape_cast %106 : vector<128xf32> to vector<1x128xf32>
    %c0_i32 = arith.constant 0 : i32
    %108 = vector.broadcast %c0_i32 : i32 to vector<8x1xi32>
    %109 = arith.cmpi eq, %102, %108 : vector<8x1xi32>
    %110 = arith.extui %109 : vector<8x1xi1> to vector<8x1xi32>
    %111 = arith.sitofp %110 : vector<8x1xi32> to vector<8x1xf32>
    %112 = vector.broadcast %107 : vector<1x128xf32> to vector<8x128xf32>
    %113 = vector.broadcast %111 : vector<8x1xf32> to vector<8x128xf32>
    %114 = arith.mulf %112, %113 : vector<8x128xf32>
    %115 = arith.addf %103, %114 : vector<8x128xf32>
    %116 = vector.extract_strided_slice %100 {offsets = [0, 128], sizes = [16, 128], strides = [1, 1]} : vector<16x1152xf32> to vector<16x128xf32>
    %117 = arith.mulf %101, %116 : vector<16x128xf32>
    %cst_76 = arith.constant dense<0.000000e+00> : vector<128xf32>
    %118 = vector.multi_reduction <add>, %117, %cst_76 [0] : vector<16x128xf32> to vector<128xf32>
    %119 = vector.shape_cast %118 : vector<128xf32> to vector<1x128xf32>
    %c1_i32 = arith.constant 1 : i32
    %120 = vector.broadcast %c1_i32 : i32 to vector<8x1xi32>
    %121 = arith.cmpi eq, %102, %120 : vector<8x1xi32>
    %122 = arith.extui %121 : vector<8x1xi1> to vector<8x1xi32>
    %123 = arith.sitofp %122 : vector<8x1xi32> to vector<8x1xf32>
    %124 = vector.broadcast %119 : vector<1x128xf32> to vector<8x128xf32>
    %125 = vector.broadcast %123 : vector<8x1xf32> to vector<8x128xf32>
    %126 = arith.mulf %124, %125 : vector<8x128xf32>
    %127 = arith.addf %115, %126 : vector<8x128xf32>
    %128 = vector.extract_strided_slice %100 {offsets = [0, 256], sizes = [16, 128], strides = [1, 1]} : vector<16x1152xf32> to vector<16x128xf32>
    %129 = arith.mulf %101, %128 : vector<16x128xf32>
    %cst_77 = arith.constant dense<0.000000e+00> : vector<128xf32>
    %130 = vector.multi_reduction <add>, %129, %cst_77 [0] : vector<16x128xf32> to vector<128xf32>
    %131 = vector.shape_cast %130 : vector<128xf32> to vector<1x128xf32>
    %c2_i32 = arith.constant 2 : i32
    %132 = vector.broadcast %c2_i32 : i32 to vector<8x1xi32>
    %133 = arith.cmpi eq, %102, %132 : vector<8x1xi32>
    %134 = arith.extui %133 : vector<8x1xi1> to vector<8x1xi32>
    %135 = arith.sitofp %134 : vector<8x1xi32> to vector<8x1xf32>
    %136 = vector.broadcast %131 : vector<1x128xf32> to vector<8x128xf32>
    %137 = vector.broadcast %135 : vector<8x1xf32> to vector<8x128xf32>
    %138 = arith.mulf %136, %137 : vector<8x128xf32>
    %139 = arith.addf %127, %138 : vector<8x128xf32>
    %140 = vector.extract_strided_slice %100 {offsets = [0, 384], sizes = [16, 128], strides = [1, 1]} : vector<16x1152xf32> to vector<16x128xf32>
    %141 = arith.mulf %101, %140 : vector<16x128xf32>
    %cst_78 = arith.constant dense<0.000000e+00> : vector<128xf32>
    %142 = vector.multi_reduction <add>, %141, %cst_78 [0] : vector<16x128xf32> to vector<128xf32>
    %143 = vector.shape_cast %142 : vector<128xf32> to vector<1x128xf32>
    %c3_i32 = arith.constant 3 : i32
    %144 = vector.broadcast %c3_i32 : i32 to vector<8x1xi32>
    %145 = arith.cmpi eq, %102, %144 : vector<8x1xi32>
    %146 = arith.extui %145 : vector<8x1xi1> to vector<8x1xi32>
    %147 = arith.sitofp %146 : vector<8x1xi32> to vector<8x1xf32>
    %148 = vector.broadcast %143 : vector<1x128xf32> to vector<8x128xf32>
    %149 = vector.broadcast %147 : vector<8x1xf32> to vector<8x128xf32>
    %150 = arith.mulf %148, %149 : vector<8x128xf32>
    %151 = arith.addf %139, %150 : vector<8x128xf32>
    %152 = vector.extract_strided_slice %100 {offsets = [0, 512], sizes = [16, 128], strides = [1, 1]} : vector<16x1152xf32> to vector<16x128xf32>
    %153 = arith.mulf %101, %152 : vector<16x128xf32>
    %cst_79 = arith.constant dense<0.000000e+00> : vector<128xf32>
    %154 = vector.multi_reduction <add>, %153, %cst_79 [0] : vector<16x128xf32> to vector<128xf32>
    %155 = vector.shape_cast %154 : vector<128xf32> to vector<1x128xf32>
    %c4_i32 = arith.constant 4 : i32
    %156 = vector.broadcast %c4_i32 : i32 to vector<8x1xi32>
    %157 = arith.cmpi eq, %102, %156 : vector<8x1xi32>
    %158 = arith.extui %157 : vector<8x1xi1> to vector<8x1xi32>
    %159 = arith.sitofp %158 : vector<8x1xi32> to vector<8x1xf32>
    %160 = vector.broadcast %155 : vector<1x128xf32> to vector<8x128xf32>
    %161 = vector.broadcast %159 : vector<8x1xf32> to vector<8x128xf32>
    %162 = arith.mulf %160, %161 : vector<8x128xf32>
    %163 = arith.addf %151, %162 : vector<8x128xf32>
    %164 = vector.extract_strided_slice %100 {offsets = [0, 640], sizes = [16, 128], strides = [1, 1]} : vector<16x1152xf32> to vector<16x128xf32>
    %165 = arith.mulf %101, %164 : vector<16x128xf32>
    %cst_80 = arith.constant dense<0.000000e+00> : vector<128xf32>
    %166 = vector.multi_reduction <add>, %165, %cst_80 [0] : vector<16x128xf32> to vector<128xf32>
    %167 = vector.shape_cast %166 : vector<128xf32> to vector<1x128xf32>
    %c5_i32 = arith.constant 5 : i32
    %168 = vector.broadcast %c5_i32 : i32 to vector<8x1xi32>
    %169 = arith.cmpi eq, %102, %168 : vector<8x1xi32>
    %170 = arith.extui %169 : vector<8x1xi1> to vector<8x1xi32>
    %171 = arith.sitofp %170 : vector<8x1xi32> to vector<8x1xf32>
    %172 = vector.broadcast %167 : vector<1x128xf32> to vector<8x128xf32>
    %173 = vector.broadcast %171 : vector<8x1xf32> to vector<8x128xf32>
    %174 = arith.mulf %172, %173 : vector<8x128xf32>
    %175 = arith.addf %163, %174 : vector<8x128xf32>
    %176 = vector.extract_strided_slice %100 {offsets = [0, 768], sizes = [16, 128], strides = [1, 1]} : vector<16x1152xf32> to vector<16x128xf32>
    %177 = arith.mulf %101, %176 : vector<16x128xf32>
    %cst_81 = arith.constant dense<0.000000e+00> : vector<128xf32>
    %178 = vector.multi_reduction <add>, %177, %cst_81 [0] : vector<16x128xf32> to vector<128xf32>
    %179 = vector.shape_cast %178 : vector<128xf32> to vector<1x128xf32>
    %c6_i32 = arith.constant 6 : i32
    %180 = vector.broadcast %c6_i32 : i32 to vector<8x1xi32>
    %181 = arith.cmpi eq, %102, %180 : vector<8x1xi32>
    %182 = arith.extui %181 : vector<8x1xi1> to vector<8x1xi32>
    %183 = arith.sitofp %182 : vector<8x1xi32> to vector<8x1xf32>
    %184 = vector.broadcast %179 : vector<1x128xf32> to vector<8x128xf32>
    %185 = vector.broadcast %183 : vector<8x1xf32> to vector<8x128xf32>
    %186 = arith.mulf %184, %185 : vector<8x128xf32>
    %187 = arith.addf %175, %186 : vector<8x128xf32>
    %188 = vector.extract_strided_slice %100 {offsets = [0, 896], sizes = [16, 128], strides = [1, 1]} : vector<16x1152xf32> to vector<16x128xf32>
    %189 = arith.mulf %101, %188 : vector<16x128xf32>
    %cst_82 = arith.constant dense<0.000000e+00> : vector<128xf32>
    %190 = vector.multi_reduction <add>, %189, %cst_82 [0] : vector<16x128xf32> to vector<128xf32>
    %191 = vector.shape_cast %190 : vector<128xf32> to vector<1x128xf32>
    %c7_i32 = arith.constant 7 : i32
    %192 = vector.broadcast %c7_i32 : i32 to vector<8x1xi32>
    %193 = arith.cmpi eq, %102, %192 : vector<8x1xi32>
    %194 = arith.extui %193 : vector<8x1xi1> to vector<8x1xi32>
    %195 = arith.sitofp %194 : vector<8x1xi32> to vector<8x1xf32>
    %196 = vector.broadcast %191 : vector<1x128xf32> to vector<8x128xf32>
    %197 = vector.broadcast %195 : vector<8x1xf32> to vector<8x128xf32>
    %198 = arith.mulf %196, %197 : vector<8x128xf32>
    %199 = arith.addf %187, %198 : vector<8x128xf32>
    %cst_83 = arith.constant dense<0xFF800000> : vector<128xf32>
    %200 = vector.multi_reduction <maximumf>, %199, %cst_83 [0] : vector<8x128xf32> to vector<128xf32>
    %201 = vector.shape_cast %200 : vector<128xf32> to vector<1x128xf32>
    %202 = vector.broadcast %201 : vector<1x128xf32> to vector<8x128xf32>
    %203 = arith.subf %199, %202 : vector<8x128xf32>
    %cst_84 = arith.constant 5.000000e-01 : f32
    %204 = vector.broadcast %cst_84 : f32 to vector<8x128xf32>
    %205 = arith.mulf %203, %204 : vector<8x128xf32>
    %cst_85 = arith.constant -1.000000e+00 : f32
    %206 = vector.broadcast %cst_85 : f32 to vector<1x128xf32>
    %cst_86 = arith.constant 0.000000e+00 : f32
    %207 = vector.broadcast %cst_86 : f32 to vector<1x128xf32>
    %208 = arith.addf %206, %207 : vector<1x128xf32>
    %cst_87 = arith.constant 5.000000e-01 : f32
    %209 = vector.broadcast %cst_87 : f32 to vector<1x128xf32>
    %210 = arith.mulf %209, %208 : vector<1x128xf32>
    %211 = vector.broadcast %210 : vector<1x128xf32> to vector<8x128xf32>
    %212 = arith.subf %205, %211 : vector<8x128xf32>
    %cst_88 = arith.constant 0.000000e+00 : f32
    %213 = vector.broadcast %cst_88 : f32 to vector<8x128xf32>
    %214 = arith.maximumf %212, %213 : vector<8x128xf32>
    %215 = arith.mulf %214, %214 : vector<8x128xf32>
    %cst_89 = arith.constant dense<0.000000e+00> : vector<128xf32>
    %216 = vector.multi_reduction <add>, %215, %cst_89 [0] : vector<8x128xf32> to vector<128xf32>
    %217 = vector.shape_cast %216 : vector<128xf32> to vector<1x128xf32>
    %cst_90 = arith.constant 1.000000e+00 : f32
    %218 = vector.broadcast %cst_90 : f32 to vector<1x128xf32>
    %219 = arith.cmpf oge, %217, %218 : vector<1x128xf32>
    %220 = arith.select %219, %210, %206 : vector<1x128xi1>, vector<1x128xf32>
    %221 = arith.select %219, %207, %210 : vector<1x128xi1>, vector<1x128xf32>
    %222 = arith.addf %220, %221 : vector<1x128xf32>
    %cst_91 = arith.constant 5.000000e-01 : f32
    %223 = vector.broadcast %cst_91 : f32 to vector<1x128xf32>
    %224 = arith.mulf %223, %222 : vector<1x128xf32>
    %225 = vector.broadcast %224 : vector<1x128xf32> to vector<8x128xf32>
    %226 = arith.subf %205, %225 : vector<8x128xf32>
    %cst_92 = arith.constant 0.000000e+00 : f32
    %227 = vector.broadcast %cst_92 : f32 to vector<8x128xf32>
    %228 = arith.maximumf %226, %227 : vector<8x128xf32>
    %229 = arith.mulf %228, %228 : vector<8x128xf32>
    %cst_93 = arith.constant dense<0.000000e+00> : vector<128xf32>
    %230 = vector.multi_reduction <add>, %229, %cst_93 [0] : vector<8x128xf32> to vector<128xf32>
    %231 = vector.shape_cast %230 : vector<128xf32> to vector<1x128xf32>
    %cst_94 = arith.constant 1.000000e+00 : f32
    %232 = vector.broadcast %cst_94 : f32 to vector<1x128xf32>
    %233 = arith.cmpf oge, %231, %232 : vector<1x128xf32>
    %234 = arith.select %233, %224, %220 : vector<1x128xi1>, vector<1x128xf32>
    %235 = arith.select %233, %221, %224 : vector<1x128xi1>, vector<1x128xf32>
    %236 = arith.addf %234, %235 : vector<1x128xf32>
    %cst_95 = arith.constant 5.000000e-01 : f32
    %237 = vector.broadcast %cst_95 : f32 to vector<1x128xf32>
    %238 = arith.mulf %237, %236 : vector<1x128xf32>
    %239 = vector.broadcast %238 : vector<1x128xf32> to vector<8x128xf32>
    %240 = arith.subf %205, %239 : vector<8x128xf32>
    %cst_96 = arith.constant 0.000000e+00 : f32
    %241 = vector.broadcast %cst_96 : f32 to vector<8x128xf32>
    %242 = arith.maximumf %240, %241 : vector<8x128xf32>
    %243 = arith.mulf %242, %242 : vector<8x128xf32>
    %cst_97 = arith.constant dense<0.000000e+00> : vector<128xf32>
    %244 = vector.multi_reduction <add>, %243, %cst_97 [0] : vector<8x128xf32> to vector<128xf32>
    %245 = vector.shape_cast %244 : vector<128xf32> to vector<1x128xf32>
    %cst_98 = arith.constant 1.000000e+00 : f32
    %246 = vector.broadcast %cst_98 : f32 to vector<1x128xf32>
    %247 = arith.cmpf oge, %245, %246 : vector<1x128xf32>
    %248 = arith.select %247, %238, %234 : vector<1x128xi1>, vector<1x128xf32>
    %249 = arith.select %247, %235, %238 : vector<1x128xi1>, vector<1x128xf32>
    %250 = arith.addf %248, %249 : vector<1x128xf32>
    %cst_99 = arith.constant 5.000000e-01 : f32
    %251 = vector.broadcast %cst_99 : f32 to vector<1x128xf32>
    %252 = arith.mulf %251, %250 : vector<1x128xf32>
    %253 = vector.broadcast %252 : vector<1x128xf32> to vector<8x128xf32>
    %254 = arith.subf %205, %253 : vector<8x128xf32>
    %cst_100 = arith.constant 0.000000e+00 : f32
    %255 = vector.broadcast %cst_100 : f32 to vector<8x128xf32>
    %256 = arith.maximumf %254, %255 : vector<8x128xf32>
    %257 = arith.mulf %256, %256 : vector<8x128xf32>
    %cst_101 = arith.constant dense<0.000000e+00> : vector<128xf32>
    %258 = vector.multi_reduction <add>, %257, %cst_101 [0] : vector<8x128xf32> to vector<128xf32>
    %259 = vector.shape_cast %258 : vector<128xf32> to vector<1x128xf32>
    %cst_102 = arith.constant 1.000000e+00 : f32
    %260 = vector.broadcast %cst_102 : f32 to vector<1x128xf32>
    %261 = arith.cmpf oge, %259, %260 : vector<1x128xf32>
    %262 = arith.select %261, %252, %248 : vector<1x128xi1>, vector<1x128xf32>
    %263 = arith.select %261, %249, %252 : vector<1x128xi1>, vector<1x128xf32>
    %264 = arith.addf %262, %263 : vector<1x128xf32>
    %cst_103 = arith.constant 5.000000e-01 : f32
    %265 = vector.broadcast %cst_103 : f32 to vector<1x128xf32>
    %266 = arith.mulf %265, %264 : vector<1x128xf32>
    %267 = vector.broadcast %266 : vector<1x128xf32> to vector<8x128xf32>
    %268 = arith.subf %205, %267 : vector<8x128xf32>
    %cst_104 = arith.constant 0.000000e+00 : f32
    %269 = vector.broadcast %cst_104 : f32 to vector<8x128xf32>
    %270 = arith.maximumf %268, %269 : vector<8x128xf32>
    %271 = arith.mulf %270, %270 : vector<8x128xf32>
    %cst_105 = arith.constant dense<0.000000e+00> : vector<128xf32>
    %272 = vector.multi_reduction <add>, %271, %cst_105 [0] : vector<8x128xf32> to vector<128xf32>
    %273 = vector.shape_cast %272 : vector<128xf32> to vector<1x128xf32>
    %cst_106 = arith.constant 1.000000e+00 : f32
    %274 = vector.broadcast %cst_106 : f32 to vector<1x128xf32>
    %275 = arith.cmpf oge, %273, %274 : vector<1x128xf32>
    %276 = arith.select %275, %266, %262 : vector<1x128xi1>, vector<1x128xf32>
    %277 = arith.select %275, %263, %266 : vector<1x128xi1>, vector<1x128xf32>
    %278 = arith.addf %276, %277 : vector<1x128xf32>
    %cst_107 = arith.constant 5.000000e-01 : f32
    %279 = vector.broadcast %cst_107 : f32 to vector<1x128xf32>
    %280 = arith.mulf %279, %278 : vector<1x128xf32>
    %281 = vector.broadcast %280 : vector<1x128xf32> to vector<8x128xf32>
    %282 = arith.subf %205, %281 : vector<8x128xf32>
    %cst_108 = arith.constant 0.000000e+00 : f32
    %283 = vector.broadcast %cst_108 : f32 to vector<8x128xf32>
    %284 = arith.maximumf %282, %283 : vector<8x128xf32>
    %285 = arith.mulf %284, %284 : vector<8x128xf32>
    %cst_109 = arith.constant dense<0.000000e+00> : vector<128xf32>
    %286 = vector.multi_reduction <add>, %285, %cst_109 [0] : vector<8x128xf32> to vector<128xf32>
    %287 = vector.shape_cast %286 : vector<128xf32> to vector<1x128xf32>
    %cst_110 = arith.constant 1.000000e+00 : f32
    %288 = vector.broadcast %cst_110 : f32 to vector<1x128xf32>
    %289 = arith.cmpf oge, %287, %288 : vector<1x128xf32>
    %290 = arith.select %289, %280, %276 : vector<1x128xi1>, vector<1x128xf32>
    %291 = arith.select %289, %277, %280 : vector<1x128xi1>, vector<1x128xf32>
    %292 = arith.addf %290, %291 : vector<1x128xf32>
    %cst_111 = arith.constant 5.000000e-01 : f32
    %293 = vector.broadcast %cst_111 : f32 to vector<1x128xf32>
    %294 = arith.mulf %293, %292 : vector<1x128xf32>
    %295 = vector.broadcast %294 : vector<1x128xf32> to vector<8x128xf32>
    %296 = arith.subf %205, %295 : vector<8x128xf32>
    %cst_112 = arith.constant 0.000000e+00 : f32
    %297 = vector.broadcast %cst_112 : f32 to vector<8x128xf32>
    %298 = arith.maximumf %296, %297 : vector<8x128xf32>
    %299 = arith.mulf %298, %298 : vector<8x128xf32>
    %cst_113 = arith.constant dense<0.000000e+00> : vector<128xf32>
    %300 = vector.multi_reduction <add>, %299, %cst_113 [0] : vector<8x128xf32> to vector<128xf32>
    %301 = vector.shape_cast %300 : vector<128xf32> to vector<1x128xf32>
    %cst_114 = arith.constant 1.000000e+00 : f32
    %302 = vector.broadcast %cst_114 : f32 to vector<1x128xf32>
    %303 = arith.cmpf oge, %301, %302 : vector<1x128xf32>
    %304 = arith.select %303, %294, %290 : vector<1x128xi1>, vector<1x128xf32>
    %305 = arith.select %303, %291, %294 : vector<1x128xi1>, vector<1x128xf32>
    %306 = arith.addf %304, %305 : vector<1x128xf32>
    %cst_115 = arith.constant 5.000000e-01 : f32
    %307 = vector.broadcast %cst_115 : f32 to vector<1x128xf32>
    %308 = arith.mulf %307, %306 : vector<1x128xf32>
    %309 = vector.broadcast %308 : vector<1x128xf32> to vector<8x128xf32>
    %310 = arith.subf %205, %309 : vector<8x128xf32>
    %cst_116 = arith.constant 0.000000e+00 : f32
    %311 = vector.broadcast %cst_116 : f32 to vector<8x128xf32>
    %312 = arith.maximumf %310, %311 : vector<8x128xf32>
    %313 = arith.mulf %312, %312 : vector<8x128xf32>
    %cst_117 = arith.constant dense<0.000000e+00> : vector<128xf32>
    %314 = vector.multi_reduction <add>, %313, %cst_117 [0] : vector<8x128xf32> to vector<128xf32>
    %315 = vector.shape_cast %314 : vector<128xf32> to vector<1x128xf32>
    %cst_118 = arith.constant 1.000000e+00 : f32
    %316 = vector.broadcast %cst_118 : f32 to vector<1x128xf32>
    %317 = arith.cmpf oge, %315, %316 : vector<1x128xf32>
    %318 = arith.select %317, %308, %304 : vector<1x128xi1>, vector<1x128xf32>
    %319 = arith.select %317, %305, %308 : vector<1x128xi1>, vector<1x128xf32>
    %320 = arith.addf %318, %319 : vector<1x128xf32>
    %cst_119 = arith.constant 5.000000e-01 : f32
    %321 = vector.broadcast %cst_119 : f32 to vector<1x128xf32>
    %322 = arith.mulf %321, %320 : vector<1x128xf32>
    %323 = vector.broadcast %322 : vector<1x128xf32> to vector<8x128xf32>
    %324 = arith.subf %205, %323 : vector<8x128xf32>
    %cst_120 = arith.constant 0.000000e+00 : f32
    %325 = vector.broadcast %cst_120 : f32 to vector<8x128xf32>
    %326 = arith.maximumf %324, %325 : vector<8x128xf32>
    %327 = arith.mulf %326, %326 : vector<8x128xf32>
    %cst_121 = arith.constant dense<0.000000e+00> : vector<128xf32>
    %328 = vector.multi_reduction <add>, %327, %cst_121 [0] : vector<8x128xf32> to vector<128xf32>
    %329 = vector.shape_cast %328 : vector<128xf32> to vector<1x128xf32>
    %cst_122 = arith.constant 1.000000e+00 : f32
    %330 = vector.broadcast %cst_122 : f32 to vector<1x128xf32>
    %331 = arith.cmpf oge, %329, %330 : vector<1x128xf32>
    %332 = arith.select %331, %322, %318 : vector<1x128xi1>, vector<1x128xf32>
    %333 = arith.select %331, %319, %322 : vector<1x128xi1>, vector<1x128xf32>
    %334 = arith.addf %332, %333 : vector<1x128xf32>
    %cst_123 = arith.constant 5.000000e-01 : f32
    %335 = vector.broadcast %cst_123 : f32 to vector<1x128xf32>
    %336 = arith.mulf %335, %334 : vector<1x128xf32>
    %337 = vector.broadcast %336 : vector<1x128xf32> to vector<8x128xf32>
    %338 = arith.subf %205, %337 : vector<8x128xf32>
    %cst_124 = arith.constant 0.000000e+00 : f32
    %339 = vector.broadcast %cst_124 : f32 to vector<8x128xf32>
    %340 = arith.maximumf %338, %339 : vector<8x128xf32>
    %341 = arith.mulf %340, %340 : vector<8x128xf32>
    %cst_125 = arith.constant dense<0.000000e+00> : vector<128xf32>
    %342 = vector.multi_reduction <add>, %341, %cst_125 [0] : vector<8x128xf32> to vector<128xf32>
    %343 = vector.shape_cast %342 : vector<128xf32> to vector<1x128xf32>
    %cst_126 = arith.constant 1.000000e+00 : f32
    %344 = vector.broadcast %cst_126 : f32 to vector<1x128xf32>
    %345 = arith.cmpf oge, %343, %344 : vector<1x128xf32>
    %346 = arith.select %345, %336, %332 : vector<1x128xi1>, vector<1x128xf32>
    %347 = arith.select %345, %333, %336 : vector<1x128xi1>, vector<1x128xf32>
    %348 = arith.addf %346, %347 : vector<1x128xf32>
    %cst_127 = arith.constant 5.000000e-01 : f32
    %349 = vector.broadcast %cst_127 : f32 to vector<1x128xf32>
    %350 = arith.mulf %349, %348 : vector<1x128xf32>
    %351 = vector.broadcast %350 : vector<1x128xf32> to vector<8x128xf32>
    %352 = arith.subf %205, %351 : vector<8x128xf32>
    %cst_128 = arith.constant 0.000000e+00 : f32
    %353 = vector.broadcast %cst_128 : f32 to vector<8x128xf32>
    %354 = arith.maximumf %352, %353 : vector<8x128xf32>
    %355 = arith.mulf %354, %354 : vector<8x128xf32>
    %cst_129 = arith.constant dense<0.000000e+00> : vector<128xf32>
    %356 = vector.multi_reduction <add>, %355, %cst_129 [0] : vector<8x128xf32> to vector<128xf32>
    %357 = vector.shape_cast %356 : vector<128xf32> to vector<1x128xf32>
    %cst_130 = arith.constant 1.000000e+00 : f32
    %358 = vector.broadcast %cst_130 : f32 to vector<1x128xf32>
    %359 = arith.cmpf oge, %357, %358 : vector<1x128xf32>
    %360 = arith.select %359, %350, %346 : vector<1x128xi1>, vector<1x128xf32>
    %361 = arith.select %359, %347, %350 : vector<1x128xi1>, vector<1x128xf32>
    %362 = arith.addf %360, %361 : vector<1x128xf32>
    %cst_131 = arith.constant 5.000000e-01 : f32
    %363 = vector.broadcast %cst_131 : f32 to vector<1x128xf32>
    %364 = arith.mulf %363, %362 : vector<1x128xf32>
    %365 = vector.broadcast %364 : vector<1x128xf32> to vector<8x128xf32>
    %366 = arith.subf %205, %365 : vector<8x128xf32>
    %cst_132 = arith.constant 0.000000e+00 : f32
    %367 = vector.broadcast %cst_132 : f32 to vector<8x128xf32>
    %368 = arith.maximumf %366, %367 : vector<8x128xf32>
    %369 = arith.mulf %368, %368 : vector<8x128xf32>
    %cst_133 = arith.constant dense<0.000000e+00> : vector<128xf32>
    %370 = vector.multi_reduction <add>, %369, %cst_133 [0] : vector<8x128xf32> to vector<128xf32>
    %371 = vector.shape_cast %370 : vector<128xf32> to vector<1x128xf32>
    %cst_134 = arith.constant 1.000000e+00 : f32
    %372 = vector.broadcast %cst_134 : f32 to vector<1x128xf32>
    %373 = arith.cmpf oge, %371, %372 : vector<1x128xf32>
    %374 = arith.select %373, %364, %360 : vector<1x128xi1>, vector<1x128xf32>
    %375 = arith.select %373, %361, %364 : vector<1x128xi1>, vector<1x128xf32>
    %376 = arith.addf %374, %375 : vector<1x128xf32>
    %cst_135 = arith.constant 5.000000e-01 : f32
    %377 = vector.broadcast %cst_135 : f32 to vector<1x128xf32>
    %378 = arith.mulf %377, %376 : vector<1x128xf32>
    %379 = vector.broadcast %378 : vector<1x128xf32> to vector<8x128xf32>
    %380 = arith.subf %205, %379 : vector<8x128xf32>
    %cst_136 = arith.constant 0.000000e+00 : f32
    %381 = vector.broadcast %cst_136 : f32 to vector<8x128xf32>
    %382 = arith.maximumf %380, %381 : vector<8x128xf32>
    %383 = arith.mulf %382, %382 : vector<8x128xf32>
    %cst_137 = arith.constant dense<0.000000e+00> : vector<128xf32>
    %384 = vector.multi_reduction <add>, %383, %cst_137 [0] : vector<8x128xf32> to vector<128xf32>
    %385 = vector.shape_cast %384 : vector<128xf32> to vector<1x128xf32>
    %cst_138 = arith.constant 1.000000e+00 : f32
    %386 = vector.broadcast %cst_138 : f32 to vector<1x128xf32>
    %387 = arith.cmpf oge, %385, %386 : vector<1x128xf32>
    %388 = arith.select %387, %378, %374 : vector<1x128xi1>, vector<1x128xf32>
    %389 = arith.select %387, %375, %378 : vector<1x128xi1>, vector<1x128xf32>
    %390 = arith.addf %388, %389 : vector<1x128xf32>
    %cst_139 = arith.constant 5.000000e-01 : f32
    %391 = vector.broadcast %cst_139 : f32 to vector<1x128xf32>
    %392 = arith.mulf %391, %390 : vector<1x128xf32>
    %393 = vector.broadcast %392 : vector<1x128xf32> to vector<8x128xf32>
    %394 = arith.subf %205, %393 : vector<8x128xf32>
    %cst_140 = arith.constant 0.000000e+00 : f32
    %395 = vector.broadcast %cst_140 : f32 to vector<8x128xf32>
    %396 = arith.maximumf %394, %395 : vector<8x128xf32>
    %397 = arith.mulf %396, %396 : vector<8x128xf32>
    %cst_141 = arith.constant dense<0.000000e+00> : vector<128xf32>
    %398 = vector.multi_reduction <add>, %397, %cst_141 [0] : vector<8x128xf32> to vector<128xf32>
    %399 = vector.shape_cast %398 : vector<128xf32> to vector<1x128xf32>
    %cst_142 = arith.constant 1.000000e+00 : f32
    %400 = vector.broadcast %cst_142 : f32 to vector<1x128xf32>
    %401 = arith.cmpf oge, %399, %400 : vector<1x128xf32>
    %402 = arith.select %401, %392, %388 : vector<1x128xi1>, vector<1x128xf32>
    %403 = arith.select %401, %389, %392 : vector<1x128xi1>, vector<1x128xf32>
    %404 = arith.addf %402, %403 : vector<1x128xf32>
    %cst_143 = arith.constant 5.000000e-01 : f32
    %405 = vector.broadcast %cst_143 : f32 to vector<1x128xf32>
    %406 = arith.mulf %405, %404 : vector<1x128xf32>
    %407 = vector.broadcast %406 : vector<1x128xf32> to vector<8x128xf32>
    %408 = arith.subf %205, %407 : vector<8x128xf32>
    %cst_144 = arith.constant 0.000000e+00 : f32
    %409 = vector.broadcast %cst_144 : f32 to vector<8x128xf32>
    %410 = arith.maximumf %408, %409 : vector<8x128xf32>
    %411 = arith.mulf %410, %410 : vector<8x128xf32>
    %cst_145 = arith.constant dense<0.000000e+00> : vector<128xf32>
    %412 = vector.multi_reduction <add>, %411, %cst_145 [0] : vector<8x128xf32> to vector<128xf32>
    %413 = vector.shape_cast %412 : vector<128xf32> to vector<1x128xf32>
    %cst_146 = arith.constant 1.000000e+00 : f32
    %414 = vector.broadcast %cst_146 : f32 to vector<1x128xf32>
    %415 = arith.cmpf oge, %413, %414 : vector<1x128xf32>
    %416 = arith.select %415, %406, %402 : vector<1x128xi1>, vector<1x128xf32>
    %417 = arith.select %415, %403, %406 : vector<1x128xi1>, vector<1x128xf32>
    %418 = arith.addf %416, %417 : vector<1x128xf32>
    %cst_147 = arith.constant 5.000000e-01 : f32
    %419 = vector.broadcast %cst_147 : f32 to vector<1x128xf32>
    %420 = arith.mulf %419, %418 : vector<1x128xf32>
    %421 = vector.broadcast %420 : vector<1x128xf32> to vector<8x128xf32>
    %422 = arith.subf %205, %421 : vector<8x128xf32>
    %cst_148 = arith.constant 0.000000e+00 : f32
    %423 = vector.broadcast %cst_148 : f32 to vector<8x128xf32>
    %424 = arith.maximumf %422, %423 : vector<8x128xf32>
    %425 = arith.mulf %424, %424 : vector<8x128xf32>
    %cst_149 = arith.constant dense<0.000000e+00> : vector<128xf32>
    %426 = vector.multi_reduction <add>, %425, %cst_149 [0] : vector<8x128xf32> to vector<128xf32>
    %427 = vector.shape_cast %426 : vector<128xf32> to vector<1x128xf32>
    %cst_150 = arith.constant 1.000000e+00 : f32
    %428 = vector.broadcast %cst_150 : f32 to vector<1x128xf32>
    %429 = arith.cmpf oge, %427, %428 : vector<1x128xf32>
    %430 = arith.select %429, %420, %416 : vector<1x128xi1>, vector<1x128xf32>
    %431 = arith.select %429, %417, %420 : vector<1x128xi1>, vector<1x128xf32>
    %432 = arith.addf %430, %431 : vector<1x128xf32>
    %cst_151 = arith.constant 5.000000e-01 : f32
    %433 = vector.broadcast %cst_151 : f32 to vector<1x128xf32>
    %434 = arith.mulf %433, %432 : vector<1x128xf32>
    %435 = vector.broadcast %434 : vector<1x128xf32> to vector<8x128xf32>
    %436 = arith.subf %205, %435 : vector<8x128xf32>
    %cst_152 = arith.constant 0.000000e+00 : f32
    %437 = vector.broadcast %cst_152 : f32 to vector<8x128xf32>
    %438 = arith.maximumf %436, %437 : vector<8x128xf32>
    %439 = arith.mulf %438, %438 : vector<8x128xf32>
    %cst_153 = arith.constant dense<0.000000e+00> : vector<128xf32>
    %440 = vector.multi_reduction <add>, %439, %cst_153 [0] : vector<8x128xf32> to vector<128xf32>
    %441 = vector.shape_cast %440 : vector<128xf32> to vector<1x128xf32>
    %cst_154 = arith.constant 1.000000e+00 : f32
    %442 = vector.broadcast %cst_154 : f32 to vector<1x128xf32>
    %443 = arith.cmpf oge, %441, %442 : vector<1x128xf32>
    %444 = arith.select %443, %434, %430 : vector<1x128xi1>, vector<1x128xf32>
    %445 = arith.select %443, %431, %434 : vector<1x128xi1>, vector<1x128xf32>
    %446 = arith.addf %444, %445 : vector<1x128xf32>
    %cst_155 = arith.constant 5.000000e-01 : f32
    %447 = vector.broadcast %cst_155 : f32 to vector<1x128xf32>
    %448 = arith.mulf %447, %446 : vector<1x128xf32>
    %449 = vector.broadcast %448 : vector<1x128xf32> to vector<8x128xf32>
    %450 = arith.subf %205, %449 : vector<8x128xf32>
    %cst_156 = arith.constant 0.000000e+00 : f32
    %451 = vector.broadcast %cst_156 : f32 to vector<8x128xf32>
    %452 = arith.maximumf %450, %451 : vector<8x128xf32>
    %453 = arith.mulf %452, %452 : vector<8x128xf32>
    %cst_157 = arith.constant dense<0.000000e+00> : vector<128xf32>
    %454 = vector.multi_reduction <add>, %453, %cst_157 [0] : vector<8x128xf32> to vector<128xf32>
    %455 = vector.shape_cast %454 : vector<128xf32> to vector<1x128xf32>
    %cst_158 = arith.constant 1.000000e+00 : f32
    %456 = vector.broadcast %cst_158 : f32 to vector<1x128xf32>
    %457 = arith.cmpf oge, %455, %456 : vector<1x128xf32>
    %458 = arith.select %457, %448, %444 : vector<1x128xi1>, vector<1x128xf32>
    %459 = arith.select %457, %445, %448 : vector<1x128xi1>, vector<1x128xf32>
    %460 = arith.addf %458, %459 : vector<1x128xf32>
    %cst_159 = arith.constant 5.000000e-01 : f32
    %461 = vector.broadcast %cst_159 : f32 to vector<1x128xf32>
    %462 = arith.mulf %461, %460 : vector<1x128xf32>
    %463 = vector.broadcast %462 : vector<1x128xf32> to vector<8x128xf32>
    %464 = arith.subf %205, %463 : vector<8x128xf32>
    %cst_160 = arith.constant 0.000000e+00 : f32
    %465 = vector.broadcast %cst_160 : f32 to vector<8x128xf32>
    %466 = arith.maximumf %464, %465 : vector<8x128xf32>
    %467 = arith.mulf %466, %466 : vector<8x128xf32>
    %cst_161 = arith.constant dense<0.000000e+00> : vector<128xf32>
    %468 = vector.multi_reduction <add>, %467, %cst_161 [0] : vector<8x128xf32> to vector<128xf32>
    %469 = vector.shape_cast %468 : vector<128xf32> to vector<1x128xf32>
    %cst_162 = arith.constant 1.000000e+00 : f32
    %470 = vector.broadcast %cst_162 : f32 to vector<1x128xf32>
    %471 = arith.cmpf oge, %469, %470 : vector<1x128xf32>
    %472 = arith.select %471, %462, %458 : vector<1x128xi1>, vector<1x128xf32>
    %473 = arith.select %471, %459, %462 : vector<1x128xi1>, vector<1x128xf32>
    %474 = arith.addf %472, %473 : vector<1x128xf32>
    %cst_163 = arith.constant 5.000000e-01 : f32
    %475 = vector.broadcast %cst_163 : f32 to vector<1x128xf32>
    %476 = arith.mulf %475, %474 : vector<1x128xf32>
    %477 = vector.broadcast %476 : vector<1x128xf32> to vector<8x128xf32>
    %478 = arith.subf %205, %477 : vector<8x128xf32>
    %cst_164 = arith.constant 0.000000e+00 : f32
    %479 = vector.broadcast %cst_164 : f32 to vector<8x128xf32>
    %480 = arith.maximumf %478, %479 : vector<8x128xf32>
    %481 = arith.mulf %480, %480 : vector<8x128xf32>
    %cst_165 = arith.constant dense<0.000000e+00> : vector<128xf32>
    %482 = vector.multi_reduction <add>, %481, %cst_165 [0] : vector<8x128xf32> to vector<128xf32>
    %483 = vector.shape_cast %482 : vector<128xf32> to vector<1x128xf32>
    %cst_166 = arith.constant 1.000000e+00 : f32
    %484 = vector.broadcast %cst_166 : f32 to vector<1x128xf32>
    %485 = arith.cmpf oge, %483, %484 : vector<1x128xf32>
    %486 = arith.select %485, %476, %472 : vector<1x128xi1>, vector<1x128xf32>
    %487 = arith.select %485, %473, %476 : vector<1x128xi1>, vector<1x128xf32>
    %488 = arith.addf %486, %487 : vector<1x128xf32>
    %cst_167 = arith.constant 5.000000e-01 : f32
    %489 = vector.broadcast %cst_167 : f32 to vector<1x128xf32>
    %490 = arith.mulf %489, %488 : vector<1x128xf32>
    %491 = vector.broadcast %490 : vector<1x128xf32> to vector<8x128xf32>
    %492 = arith.subf %205, %491 : vector<8x128xf32>
    %cst_168 = arith.constant 0.000000e+00 : f32
    %493 = vector.broadcast %cst_168 : f32 to vector<8x128xf32>
    %494 = arith.maximumf %492, %493 : vector<8x128xf32>
    %495 = arith.mulf %494, %494 : vector<8x128xf32>
    %cst_169 = arith.constant dense<0.000000e+00> : vector<128xf32>
    %496 = vector.multi_reduction <add>, %495, %cst_169 [0] : vector<8x128xf32> to vector<128xf32>
    %497 = vector.shape_cast %496 : vector<128xf32> to vector<1x128xf32>
    %cst_170 = arith.constant 1.000000e+00 : f32
    %498 = vector.broadcast %cst_170 : f32 to vector<1x128xf32>
    %499 = arith.cmpf oge, %497, %498 : vector<1x128xf32>
    %500 = arith.select %499, %490, %486 : vector<1x128xi1>, vector<1x128xf32>
    %501 = arith.select %499, %487, %490 : vector<1x128xi1>, vector<1x128xf32>
    %502 = arith.addf %500, %501 : vector<1x128xf32>
    %cst_171 = arith.constant 5.000000e-01 : f32
    %503 = vector.broadcast %cst_171 : f32 to vector<1x128xf32>
    %504 = arith.mulf %503, %502 : vector<1x128xf32>
    %505 = vector.broadcast %504 : vector<1x128xf32> to vector<8x128xf32>
    %506 = arith.subf %205, %505 : vector<8x128xf32>
    %cst_172 = arith.constant 0.000000e+00 : f32
    %507 = vector.broadcast %cst_172 : f32 to vector<8x128xf32>
    %508 = arith.maximumf %506, %507 : vector<8x128xf32>
    %509 = arith.mulf %508, %508 : vector<8x128xf32>
    %cst_173 = arith.constant dense<0.000000e+00> : vector<128xf32>
    %510 = vector.multi_reduction <add>, %509, %cst_173 [0] : vector<8x128xf32> to vector<128xf32>
    %511 = vector.shape_cast %510 : vector<128xf32> to vector<1x128xf32>
    %cst_174 = arith.constant 1.000000e+00 : f32
    %512 = vector.broadcast %cst_174 : f32 to vector<1x128xf32>
    %513 = arith.cmpf oge, %511, %512 : vector<1x128xf32>
    %514 = arith.select %513, %504, %500 : vector<1x128xi1>, vector<1x128xf32>
    %515 = arith.select %513, %501, %504 : vector<1x128xi1>, vector<1x128xf32>
    %516 = arith.addf %514, %515 : vector<1x128xf32>
    %cst_175 = arith.constant 5.000000e-01 : f32
    %517 = vector.broadcast %cst_175 : f32 to vector<1x128xf32>
    %518 = arith.mulf %517, %516 : vector<1x128xf32>
    %519 = vector.broadcast %518 : vector<1x128xf32> to vector<8x128xf32>
    %520 = arith.subf %205, %519 : vector<8x128xf32>
    %cst_176 = arith.constant 0.000000e+00 : f32
    %521 = vector.broadcast %cst_176 : f32 to vector<8x128xf32>
    %522 = arith.maximumf %520, %521 : vector<8x128xf32>
    %523 = arith.mulf %522, %522 : vector<8x128xf32>
    %cst_177 = arith.constant dense<0.000000e+00> : vector<128xf32>
    %524 = vector.multi_reduction <add>, %523, %cst_177 [0] : vector<8x128xf32> to vector<128xf32>
    %525 = vector.shape_cast %524 : vector<128xf32> to vector<1x128xf32>
    %cst_178 = arith.constant 1.000000e+00 : f32
    %526 = vector.broadcast %cst_178 : f32 to vector<1x128xf32>
    %527 = arith.cmpf oge, %525, %526 : vector<1x128xf32>
    %528 = arith.select %527, %518, %514 : vector<1x128xi1>, vector<1x128xf32>
    %529 = arith.select %527, %515, %518 : vector<1x128xi1>, vector<1x128xf32>
    %530 = arith.addf %528, %529 : vector<1x128xf32>
    %cst_179 = arith.constant 5.000000e-01 : f32
    %531 = vector.broadcast %cst_179 : f32 to vector<1x128xf32>
    %532 = arith.mulf %531, %530 : vector<1x128xf32>
    %533 = vector.broadcast %532 : vector<1x128xf32> to vector<8x128xf32>
    %534 = arith.subf %205, %533 : vector<8x128xf32>
    %cst_180 = arith.constant 0.000000e+00 : f32
    %535 = vector.broadcast %cst_180 : f32 to vector<8x128xf32>
    %536 = arith.maximumf %534, %535 : vector<8x128xf32>
    %537 = arith.mulf %536, %536 : vector<8x128xf32>
    %cst_181 = arith.constant dense<0.000000e+00> : vector<128xf32>
    %538 = vector.multi_reduction <add>, %537, %cst_181 [0] : vector<8x128xf32> to vector<128xf32>
    %539 = vector.shape_cast %538 : vector<128xf32> to vector<1x128xf32>
    %cst_182 = arith.constant 1.000000e+00 : f32
    %540 = vector.broadcast %cst_182 : f32 to vector<1x128xf32>
    %541 = arith.cmpf oge, %539, %540 : vector<1x128xf32>
    %542 = arith.select %541, %532, %528 : vector<1x128xi1>, vector<1x128xf32>
    %543 = arith.select %541, %529, %532 : vector<1x128xi1>, vector<1x128xf32>
    %544 = arith.addf %542, %543 : vector<1x128xf32>
    %cst_183 = arith.constant 5.000000e-01 : f32
    %545 = vector.broadcast %cst_183 : f32 to vector<1x128xf32>
    %546 = arith.mulf %545, %544 : vector<1x128xf32>
    %547 = vector.broadcast %546 : vector<1x128xf32> to vector<8x128xf32>
    %548 = arith.subf %205, %547 : vector<8x128xf32>
    %cst_184 = arith.constant 0.000000e+00 : f32
    %549 = vector.broadcast %cst_184 : f32 to vector<8x128xf32>
    %550 = arith.maximumf %548, %549 : vector<8x128xf32>
    %551 = arith.mulf %550, %550 : vector<8x128xf32>
    %cst_185 = arith.constant dense<0.000000e+00> : vector<128xf32>
    %552 = vector.multi_reduction <add>, %551, %cst_185 [0] : vector<8x128xf32> to vector<128xf32>
    %553 = vector.shape_cast %552 : vector<128xf32> to vector<1x128xf32>
    %cst_186 = arith.constant 1.000000e+00 : f32
    %554 = vector.broadcast %cst_186 : f32 to vector<1x128xf32>
    %555 = arith.cmpf oge, %553, %554 : vector<1x128xf32>
    %556 = arith.select %555, %546, %542 : vector<1x128xi1>, vector<1x128xf32>
    %557 = arith.select %555, %543, %546 : vector<1x128xi1>, vector<1x128xf32>
    %558 = arith.addf %556, %557 : vector<1x128xf32>
    %cst_187 = arith.constant 5.000000e-01 : f32
    %559 = vector.broadcast %cst_187 : f32 to vector<1x128xf32>
    %560 = arith.mulf %559, %558 : vector<1x128xf32>
    %561 = vector.broadcast %560 : vector<1x128xf32> to vector<8x128xf32>
    %562 = arith.subf %205, %561 : vector<8x128xf32>
    %cst_188 = arith.constant 0.000000e+00 : f32
    %563 = vector.broadcast %cst_188 : f32 to vector<8x128xf32>
    %564 = arith.maximumf %562, %563 : vector<8x128xf32>
    %565 = arith.mulf %564, %564 : vector<8x128xf32>
    %cst_189 = arith.constant dense<0.000000e+00> : vector<128xf32>
    %566 = vector.multi_reduction <add>, %565, %cst_189 [0] : vector<8x128xf32> to vector<128xf32>
    %567 = vector.shape_cast %566 : vector<128xf32> to vector<1x128xf32>
    %cst_190 = arith.constant 1.000000e+00 : f32
    %568 = vector.broadcast %cst_190 : f32 to vector<1x128xf32>
    %569 = arith.cmpf oge, %567, %568 : vector<1x128xf32>
    %570 = arith.select %569, %560, %556 : vector<1x128xi1>, vector<1x128xf32>
    %571 = arith.select %569, %557, %560 : vector<1x128xi1>, vector<1x128xf32>
    %572 = arith.addf %570, %571 : vector<1x128xf32>
    %cst_191 = arith.constant 5.000000e-01 : f32
    %573 = vector.broadcast %cst_191 : f32 to vector<1x128xf32>
    %574 = arith.mulf %573, %572 : vector<1x128xf32>
    %575 = vector.broadcast %574 : vector<1x128xf32> to vector<8x128xf32>
    %576 = arith.subf %205, %575 : vector<8x128xf32>
    %cst_192 = arith.constant 0.000000e+00 : f32
    %577 = vector.broadcast %cst_192 : f32 to vector<8x128xf32>
    %578 = arith.maximumf %576, %577 : vector<8x128xf32>
    %579 = arith.mulf %578, %578 : vector<8x128xf32>
    %cst_193 = arith.constant dense<0.000000e+00> : vector<128xf32>
    %580 = vector.multi_reduction <add>, %579, %cst_193 [0] : vector<8x128xf32> to vector<128xf32>
    %581 = vector.shape_cast %580 : vector<128xf32> to vector<1x128xf32>
    %cst_194 = arith.constant 1.000000e+00 : f32
    %582 = vector.broadcast %cst_194 : f32 to vector<1x128xf32>
    %583 = arith.cmpf oge, %581, %582 : vector<1x128xf32>
    %584 = arith.select %583, %574, %570 : vector<1x128xi1>, vector<1x128xf32>
    %585 = arith.select %583, %571, %574 : vector<1x128xi1>, vector<1x128xf32>
    %586 = arith.addf %584, %585 : vector<1x128xf32>
    %cst_195 = arith.constant 5.000000e-01 : f32
    %587 = vector.broadcast %cst_195 : f32 to vector<1x128xf32>
    %588 = arith.mulf %587, %586 : vector<1x128xf32>
    %589 = vector.broadcast %588 : vector<1x128xf32> to vector<8x128xf32>
    %590 = arith.subf %205, %589 : vector<8x128xf32>
    %cst_196 = arith.constant 0.000000e+00 : f32
    %591 = vector.broadcast %cst_196 : f32 to vector<8x128xf32>
    %592 = arith.maximumf %590, %591 : vector<8x128xf32>
    %593 = arith.mulf %592, %592 : vector<8x128xf32>
    %cst_197 = arith.constant dense<0.000000e+00> : vector<128xf32>
    %594 = vector.multi_reduction <add>, %593, %cst_197 [0] : vector<8x128xf32> to vector<128xf32>
    %595 = vector.shape_cast %594 : vector<128xf32> to vector<1x128xf32>
    %cst_198 = arith.constant 1.000000e+00 : f32
    %596 = vector.broadcast %cst_198 : f32 to vector<1x128xf32>
    %597 = arith.cmpf oge, %595, %596 : vector<1x128xf32>
    %598 = arith.select %597, %588, %584 : vector<1x128xi1>, vector<1x128xf32>
    %599 = arith.select %597, %585, %588 : vector<1x128xi1>, vector<1x128xf32>
    %600 = arith.addf %598, %599 : vector<1x128xf32>
    %cst_199 = arith.constant 5.000000e-01 : f32
    %601 = vector.broadcast %cst_199 : f32 to vector<1x128xf32>
    %602 = arith.mulf %601, %600 : vector<1x128xf32>
    %603 = vector.broadcast %602 : vector<1x128xf32> to vector<8x128xf32>
    %604 = arith.subf %205, %603 : vector<8x128xf32>
    %cst_200 = arith.constant 0.000000e+00 : f32
    %605 = vector.broadcast %cst_200 : f32 to vector<8x128xf32>
    %606 = arith.maximumf %604, %605 : vector<8x128xf32>
    %607 = arith.mulf %606, %606 : vector<8x128xf32>
    %cst_201 = arith.constant dense<0.000000e+00> : vector<128xf32>
    %608 = vector.multi_reduction <add>, %607, %cst_201 [0] : vector<8x128xf32> to vector<128xf32>
    %609 = vector.shape_cast %608 : vector<128xf32> to vector<1x128xf32>
    %cst_202 = arith.constant 1.000000e+00 : f32
    %610 = vector.broadcast %cst_202 : f32 to vector<1x128xf32>
    %611 = arith.cmpf oge, %609, %610 : vector<1x128xf32>
    %612 = arith.select %611, %602, %598 : vector<1x128xi1>, vector<1x128xf32>
    %613 = arith.select %611, %599, %602 : vector<1x128xi1>, vector<1x128xf32>
    %614 = arith.addf %612, %613 : vector<1x128xf32>
    %cst_203 = arith.constant 5.000000e-01 : f32
    %615 = vector.broadcast %cst_203 : f32 to vector<1x128xf32>
    %616 = arith.mulf %615, %614 : vector<1x128xf32>
    %617 = vector.broadcast %616 : vector<1x128xf32> to vector<8x128xf32>
    %618 = arith.subf %205, %617 : vector<8x128xf32>
    %cst_204 = arith.constant 0.000000e+00 : f32
    %619 = vector.broadcast %cst_204 : f32 to vector<8x128xf32>
    %620 = arith.maximumf %618, %619 : vector<8x128xf32>
    %621 = arith.mulf %620, %620 : vector<8x128xf32>
    %cst_205 = arith.constant dense<0.000000e+00> : vector<128xf32>
    %622 = vector.multi_reduction <add>, %621, %cst_205 [0] : vector<8x128xf32> to vector<128xf32>
    %623 = vector.shape_cast %622 : vector<128xf32> to vector<1x128xf32>
    %cst_206 = arith.constant 1.000000e+00 : f32
    %624 = vector.broadcast %cst_206 : f32 to vector<1x128xf32>
    %625 = arith.cmpf oge, %623, %624 : vector<1x128xf32>
    %626 = arith.select %625, %616, %612 : vector<1x128xi1>, vector<1x128xf32>
    %627 = arith.select %625, %613, %616 : vector<1x128xi1>, vector<1x128xf32>
    %628 = arith.addf %626, %627 : vector<1x128xf32>
    %cst_207 = arith.constant 5.000000e-01 : f32
    %629 = vector.broadcast %cst_207 : f32 to vector<1x128xf32>
    %630 = arith.mulf %629, %628 : vector<1x128xf32>
    %631 = vector.broadcast %630 : vector<1x128xf32> to vector<8x128xf32>
    %632 = arith.subf %205, %631 : vector<8x128xf32>
    %cst_208 = arith.constant 0.000000e+00 : f32
    %633 = vector.broadcast %cst_208 : f32 to vector<8x128xf32>
    %634 = arith.maximumf %632, %633 : vector<8x128xf32>
    %635 = arith.mulf %634, %634 : vector<8x128xf32>
    %cst_209 = arith.constant 0.000000e+00 : f32
    %636 = vector.broadcast %cst_209 : f32 to vector<16x128xf32>
    %637 = vector.extract_strided_slice %100 {offsets = [0, 0], sizes = [16, 128], strides = [1, 1]} : vector<16x1152xf32> to vector<16x128xf32>
    %638 = vector.extract_strided_slice %635 {offsets = [0, 0], sizes = [1, 128], strides = [1, 1]} : vector<8x128xf32> to vector<1x128xf32>
    %639 = vector.broadcast %638 : vector<1x128xf32> to vector<16x128xf32>
    %640 = arith.mulf %639, %637 : vector<16x128xf32>
    %641 = arith.addf %636, %640 : vector<16x128xf32>
    %642 = vector.extract_strided_slice %100 {offsets = [0, 128], sizes = [16, 128], strides = [1, 1]} : vector<16x1152xf32> to vector<16x128xf32>
    %643 = vector.extract_strided_slice %635 {offsets = [1, 0], sizes = [1, 128], strides = [1, 1]} : vector<8x128xf32> to vector<1x128xf32>
    %644 = vector.broadcast %643 : vector<1x128xf32> to vector<16x128xf32>
    %645 = arith.mulf %644, %642 : vector<16x128xf32>
    %646 = arith.addf %641, %645 : vector<16x128xf32>
    %647 = vector.extract_strided_slice %100 {offsets = [0, 256], sizes = [16, 128], strides = [1, 1]} : vector<16x1152xf32> to vector<16x128xf32>
    %648 = vector.extract_strided_slice %635 {offsets = [2, 0], sizes = [1, 128], strides = [1, 1]} : vector<8x128xf32> to vector<1x128xf32>
    %649 = vector.broadcast %648 : vector<1x128xf32> to vector<16x128xf32>
    %650 = arith.mulf %649, %647 : vector<16x128xf32>
    %651 = arith.addf %646, %650 : vector<16x128xf32>
    %652 = vector.extract_strided_slice %100 {offsets = [0, 384], sizes = [16, 128], strides = [1, 1]} : vector<16x1152xf32> to vector<16x128xf32>
    %653 = vector.extract_strided_slice %635 {offsets = [3, 0], sizes = [1, 128], strides = [1, 1]} : vector<8x128xf32> to vector<1x128xf32>
    %654 = vector.broadcast %653 : vector<1x128xf32> to vector<16x128xf32>
    %655 = arith.mulf %654, %652 : vector<16x128xf32>
    %656 = arith.addf %651, %655 : vector<16x128xf32>
    %657 = vector.extract_strided_slice %100 {offsets = [0, 512], sizes = [16, 128], strides = [1, 1]} : vector<16x1152xf32> to vector<16x128xf32>
    %658 = vector.extract_strided_slice %635 {offsets = [4, 0], sizes = [1, 128], strides = [1, 1]} : vector<8x128xf32> to vector<1x128xf32>
    %659 = vector.broadcast %658 : vector<1x128xf32> to vector<16x128xf32>
    %660 = arith.mulf %659, %657 : vector<16x128xf32>
    %661 = arith.addf %656, %660 : vector<16x128xf32>
    %662 = vector.extract_strided_slice %100 {offsets = [0, 640], sizes = [16, 128], strides = [1, 1]} : vector<16x1152xf32> to vector<16x128xf32>
    %663 = vector.extract_strided_slice %635 {offsets = [5, 0], sizes = [1, 128], strides = [1, 1]} : vector<8x128xf32> to vector<1x128xf32>
    %664 = vector.broadcast %663 : vector<1x128xf32> to vector<16x128xf32>
    %665 = arith.mulf %664, %662 : vector<16x128xf32>
    %666 = arith.addf %661, %665 : vector<16x128xf32>
    %667 = vector.extract_strided_slice %100 {offsets = [0, 768], sizes = [16, 128], strides = [1, 1]} : vector<16x1152xf32> to vector<16x128xf32>
    %668 = vector.extract_strided_slice %635 {offsets = [6, 0], sizes = [1, 128], strides = [1, 1]} : vector<8x128xf32> to vector<1x128xf32>
    %669 = vector.broadcast %668 : vector<1x128xf32> to vector<16x128xf32>
    %670 = arith.mulf %669, %667 : vector<16x128xf32>
    %671 = arith.addf %666, %670 : vector<16x128xf32>
    %672 = vector.extract_strided_slice %100 {offsets = [0, 896], sizes = [16, 128], strides = [1, 1]} : vector<16x1152xf32> to vector<16x128xf32>
    %673 = vector.extract_strided_slice %635 {offsets = [7, 0], sizes = [1, 128], strides = [1, 1]} : vector<8x128xf32> to vector<1x128xf32>
    %674 = vector.broadcast %673 : vector<1x128xf32> to vector<16x128xf32>
    %675 = arith.mulf %674, %672 : vector<16x128xf32>
    %676 = arith.addf %671, %675 : vector<16x128xf32>
    %c0_210 = arith.constant 0 : index
    %c0_211 = arith.constant 0 : index
    %677 = vector.load %arg12[%c0_210, %c0_211] : memref<2x16xf32, #tpu.memory_space<vmem>>, vector<2x16xf32>
    %cst_212 = arith.constant dense<0.000000e+00> : vector<2x128xf32>
    %678 = tpu.matmul %677, %676, %cst_212 {dimension_numbers = #tpu.dot_dimension_numbers<[1], [0], [0], [1], [0, 0, 1, 1], [], []>} : vector<2x16xf32>, vector<16x128xf32>, vector<2x128xf32> -> vector<2x128xf32>
    %c0_213 = arith.constant 0 : index
    %c0_214 = arith.constant 0 : index
    %679 = vector.load %arg13[%c0_213, %c0_214] : memref<2x16xf32, #tpu.memory_space<vmem>>, vector<2x16xf32>
    %cst_215 = arith.constant dense<0.000000e+00> : vector<2x128xf32>
    %680 = tpu.matmul %679, %101, %cst_215 {dimension_numbers = #tpu.dot_dimension_numbers<[1], [0], [0], [1], [0, 0, 1, 1], [], []>} : vector<2x16xf32>, vector<16x128xf32>, vector<2x128xf32> -> vector<2x128xf32>
    %681 = arith.addf %678, %680 : vector<2x128xf32>
    %c0_216 = arith.constant 0 : index
    %c0_217 = arith.constant 0 : index
    %682 = vector.load %arg14[%c0_216, %c0_217] : memref<2x1xf32, #tpu.memory_space<vmem>>, vector<2x1xf32>
    %683 = vector.broadcast %682 : vector<2x1xf32> to vector<2x128xf32>
    %684 = arith.addf %681, %683 : vector<2x128xf32>
    %685 = vector.extract_strided_slice %684 {offsets = [0, 0], sizes = [1, 128], strides = [1, 1]} : vector<2x128xf32> to vector<1x128xf32>
    %c0_218 = arith.constant 0 : index
    %c0_219 = arith.constant 0 : index
    %686 = vector.load %arg15[%c0_218, %c0_219] : memref<1x128xf32, #tpu.memory_space<vmem>>, vector<1x128xf32>
    tpu.vector_store %arg15[%c0_218, %c0_219], %685 {strides = array<i32>} : memref<1x128xf32, #tpu.memory_space<vmem>>, vector<1x128xf32>,
    %687 = vector.extract_strided_slice %684 {offsets = [1, 0], sizes = [1, 128], strides = [1, 1]} : vector<2x128xf32> to vector<1x128xf32>
    %688 = math.absf %687 : vector<1x128xf32>
    %cst_220 = arith.constant 0.000000e+00 : f32
    %689 = vector.broadcast %cst_220 : f32 to vector<1x128xf32>
    %690 = arith.subf %689, %688 : vector<1x128xf32>
    %691 = math.exp %690 : vector<1x128xf32>
    %cst_221 = arith.constant 1.000000e+00 : f32
    %692 = vector.broadcast %cst_221 : f32 to vector<1x128xf32>
    %693 = arith.addf %692, %691 : vector<1x128xf32>
    %694 = math.log %693 : vector<1x128xf32>
    %cst_222 = arith.constant 0.000000e+00 : f32
    %695 = vector.broadcast %cst_222 : f32 to vector<1x128xf32>
    %696 = arith.maximumf %687, %695 : vector<1x128xf32>
    %697 = arith.addf %694, %696 : vector<1x128xf32>
    %c0_223 = arith.constant 0 : index
    %c0_224 = arith.constant 0 : index
    %698 = vector.load %arg16[%c0_223, %c0_224] : memref<1x128xf32, #tpu.memory_space<vmem>>, vector<1x128xf32>
    tpu.vector_store %arg16[%c0_223, %c0_224], %697 {strides = array<i32>} : memref<1x128xf32, #tpu.memory_space<vmem>>, vector<1x128xf32>,
    return
  }
  func.func @transform_0(%arg0: i32) -> (i32, i32, i32) {
    %c0_i32 = arith.constant 0 : i32
    %c0_i32_0 = arith.constant 0 : i32
    %c0_i32_1 = arith.constant 0 : i32
    return %arg0, %c0_i32, %c0_i32_0 : i32, i32, i32
  }
  func.func @transform_1(%arg0: i32) -> (i32, i32, i32) {
    %c0_i32 = arith.constant 0 : i32
    %c0_i32_0 = arith.constant 0 : i32
    %c0_i32_1 = arith.constant 0 : i32
    %c0_i32_2 = arith.constant 0 : i32
    return %c0_i32, %c0_i32_0, %c0_i32_1 : i32, i32, i32
  }
  func.func @transform_2(%arg0: i32) -> (i32, i32) {
    %c0_i32 = arith.constant 0 : i32
    %c0_i32_0 = arith.constant 0 : i32
    %c0_i32_1 = arith.constant 0 : i32
    return %c0_i32, %c0_i32_0 : i32, i32
  }
  func.func @transform_3(%arg0: i32) -> (i32, i32, i32) {
    %c0_i32 = arith.constant 0 : i32
    %c0_i32_0 = arith.constant 0 : i32
    %c0_i32_1 = arith.constant 0 : i32
    %c0_i32_2 = arith.constant 0 : i32
    return %c0_i32, %c0_i32_0, %c0_i32_1 : i32, i32, i32
  }
  func.func @transform_4(%arg0: i32) -> (i32, i32) {
    %c0_i32 = arith.constant 0 : i32
    %c0_i32_0 = arith.constant 0 : i32
    %c0_i32_1 = arith.constant 0 : i32
    return %c0_i32, %c0_i32_0 : i32, i32
  }
  func.func @transform_5(%arg0: i32) -> (i32, i32) {
    %c0_i32 = arith.constant 0 : i32
    %c0_i32_0 = arith.constant 0 : i32
    %c0_i32_1 = arith.constant 0 : i32
    return %c0_i32, %c0_i32_0 : i32, i32
  }
  func.func @transform_6(%arg0: i32) -> (i32, i32) {
    %c0_i32 = arith.constant 0 : i32
    %c0_i32_0 = arith.constant 0 : i32
    %c0_i32_1 = arith.constant 0 : i32
    return %c0_i32, %c0_i32_0 : i32, i32
  }
  func.func @transform_7(%arg0: i32) -> (i32, i32, i32) {
    %c0_i32 = arith.constant 0 : i32
    %c0_i32_0 = arith.constant 0 : i32
    %c0_i32_1 = arith.constant 0 : i32
    %c0_i32_2 = arith.constant 0 : i32
    return %c0_i32, %c0_i32_0, %c0_i32_1 : i32, i32, i32
  }
  func.func @transform_8(%arg0: i32) -> (i32, i32) {
    %c0_i32 = arith.constant 0 : i32
    %c0_i32_0 = arith.constant 0 : i32
    %c0_i32_1 = arith.constant 0 : i32
    return %c0_i32, %c0_i32_0 : i32, i32
  }
  func.func @transform_9(%arg0: i32) -> (i32, i32, i32) {
    %c0_i32 = arith.constant 0 : i32
    %c0_i32_0 = arith.constant 0 : i32
    %c0_i32_1 = arith.constant 0 : i32
    %c0_i32_2 = arith.constant 0 : i32
    return %c0_i32, %c0_i32_0, %c0_i32_1 : i32, i32, i32
  }
  func.func @transform_10(%arg0: i32) -> (i32, i32) {
    %c0_i32 = arith.constant 0 : i32
    %c0_i32_0 = arith.constant 0 : i32
    %c0_i32_1 = arith.constant 0 : i32
    return %c0_i32, %c0_i32_0 : i32, i32
  }
  func.func @transform_11(%arg0: i32) -> (i32, i32) {
    %c0_i32 = arith.constant 0 : i32
    %c0_i32_0 = arith.constant 0 : i32
    %c0_i32_1 = arith.constant 0 : i32
    return %c0_i32, %c0_i32_0 : i32, i32
  }
  func.func @transform_12(%arg0: i32) -> (i32, i32) {
    %c0_i32 = arith.constant 0 : i32
    %c0_i32_0 = arith.constant 0 : i32
    %c0_i32_1 = arith.constant 0 : i32
    return %c0_i32, %c0_i32_0 : i32, i32
  }
  func.func @transform_13(%arg0: i32) -> (i32, i32) {
    %c0_i32 = arith.constant 0 : i32
    %c0_i32_0 = arith.constant 0 : i32
    %c0_i32_1 = arith.constant 0 : i32
    return %c0_i32, %c0_i32_0 : i32, i32
  }
  func.func @transform_14(%arg0: i32) -> (i32, i32) {
    %c0_i32 = arith.constant 0 : i32
    %c0_i32_0 = arith.constant 0 : i32
    return %c0_i32, %arg0 : i32, i32
  }
  func.func @transform_15(%arg0: i32) -> (i32, i32) {
    %c0_i32 = arith.constant 0 : i32
    %c0_i32_0 = arith.constant 0 : i32
    return %c0_i32, %arg0 : i32, i32
  }
}

</mosaic_0001>

<bundles_post_ra>
// kernel: tpu_custom_call.1
= control target key start
LH: loop header
LB: loop body
LE: loop exit
PB: predicated region body
PF: predicated region fallthrough
CT: control target
= control target key end

     0   :  { %21 = vsyncpa [#allocation3], 0  ;;  %s8008_s0 = inlined_call_operand.vmem [shape: f32[1,8,1152], index: 0, kind: input, shape index: {}]   ;;  %s8009_s1 = inlined_call_operand.vmem [shape: f32[3,16,8], index: 1, kind: input, shape index: {}]   ;;  %s8010_s2 = inlined_call_operand.vmem [shape: f32[16,1], index: 2, kind: input, shape index: {}]   ;;  %s8011_s3 = inlined_call_operand.vmem [shape: f32[3,16,16], index: 3, kind: input, shape index: {}]   ;;  %s8012_s4 = inlined_call_operand.vmem [shape: f32[16,1], index: 4, kind: input, shape index: {}]   ;;  %s8013_s5 = inlined_call_operand.vmem [shape: f32[16,8], index: 5, kind: input, shape index: {}]   ;;  %s8014_s6 = inlined_call_operand.vmem [shape: f32[16,1], index: 6, kind: input, shape index: {}]   ;;  %s8015_s7 = inlined_call_operand.vmem [shape: f32[3,16,16], index: 7, kind: input, shape index: {}]   ;;  %s8016_s8 = inlined_call_operand.vmem [shape: f32[16,1], index: 8, kind: input, shape index: {}]   ;;  %s8017_s9 = inlined_call_operand.hbm [shape: f32[3,16,16], index: 9, kind: input, shape index: {}]   ;;  %s8018_s10 = inlined_call_operand.vmem [shape: f32[16,1], index: 10, kind: input, shape index: {}]   ;;  %s8019_s11 = inlined_call_operand.vmem [shape: f32[2,16], index: 11, kind: input, shape index: {}]   ;;  %s8020_s12 = inlined_call_operand.vmem [shape: f32[2,16], index: 12, kind: input, shape index: {}]   ;;  %s8021_s13 = inlined_call_operand.vmem [shape: f32[2,1], index: 13, kind: input, shape index: {}]   ;;  %s8022_s14 = inlined_call_operand.hbm [shape: f32[1,128], index: 14, kind: output, shape index: {0}]   ;;  %s8023_s15 = inlined_call_operand.hbm [shape: f32[1,128], index: 15, kind: output, shape index: {1}]  }
   0x1   :  { %22 = vsyncpa [#allocation4], 0 }
   0x2   :  { %23 = vsyncpa [#allocation7], 0  ;;  %s6769_s18 = smov [#allocation2]  }
   0x3   :  { %s47_s19 = sshll.u32 %s6769_s18, 4  ;;  %s48_s19 = int_to_ptr.vmem [resolvable:$true] %s47_s19 }
   0x4   :  { %s6711_s20 = scalar_lea.vmem %s48_s19, 768  ;;  %p6716_p1 = scmp.lt.s32.totalorder %s48_s19, %s48_s19 }
   0x5   :  { %p6712_p0 = scmp.ne.s32.totalorder %s48_s19, %s6711_s20  ;;  %p6717_p2 = scmp.lt.s32.totalorder %s6711_s20, %s6711_s20 }
   0x7   :  { %p6718_p3 = por %p6717_p2, %p6716_p1 }
   0x9   :  { %p6719_p4 = pnand %p6718_p3, %p6712_p0 }
   0xb   :  { %6722 = shalt.err (!%p6719_p4)
}
   0xc   :  { %s6770_s21 = smov 128   ;;  %s6771_s22 = smov 8  }
   0xd   :  { %53 = dma.hbm_to_vmem [thread:$0]  %s8017_s9, 768, %s48_s19, [#allocation3], %s6770_s21, %s6770_s21, %s6771_s22  }
   0xe   :  { %6763 = dma.done.wait [#allocation3], 768  }
   0xf   :  { %6764 = vsyncadd [#allocation3], 4294966528  ;;  %v8026_v0 = vmov 0.0   ;;  %v6773_v1 = vmov 0   ;;  %v6867_v2 = vld [vmem:[%s8008_s0] sm:$0xff]  ;;  %v6872_v3 = vld [vmem:[%s8008_s0 + $0x10] sm:$0xff] }
  0x10   :  { %150 = vmatprep.mubr.f32.mxu0 %v8026_v0  ;;  %227 = vmatprep.mubr.f32.mxu1 %v8026_v0  ;;  %v6877_v4 = vld [vmem:[%s8008_s0 + $0x8] sm:$0xff]  ;;  %vm79_vm0 = vcmask 64512   ;;  %v6319_v5 = vld [vmem:[%s8009_s1 + $0x10] sm:$0xff]  ;;  %v6894_v7 = vld [vmem:[%s8008_s0 + $0x20] sm:$0xff]  ;;  %vm1321_vm1 = vcmask 130048   ;;  %s6777_s24 = smov [#allocation5]  }
  0x11   :  { %6697 = vset.pattern.permute.xlu0 %v6773_v1  ;;  %6698 = vset.pattern.permute.xlu1 %v6773_v1  ;;  %v6889_v6 = vld [vmem:[%s8008_s0 + $0x30] sm:$0xff]  ;;  %v6901_v8 = vld [vmem:[%s8008_s0 + $0x28] sm:$0xff]  ;;  %v6906_v9 = vld [vmem:[%s8008_s0 + $0x18] sm:$0xff]  ;;  %s6296_s25 = sshll.u32 %s6777_s24, 4  ;;  %s6297_s25 = int_to_ptr.vmem [resolvable:$true] %s6296_s25 }
  0x12   :  { %116 = vmatprep.subr.mxu0 %v6867_v2  ;;  %193 = vmatprep.subr.mxu1 %v6872_v3  ;;  %v6320_v10 = vld [vmem:[%s8009_s1 + $0x18] sm:$0xff]  ;;  %v1269_v12 = vld [vmem:[%s8010_s2 + $0x8] sm:$0xff]  ;;  %v74_v13 = vld [vmem:[%s8009_s1] sm:$0xff]  ;;  %s6723_s26 = scalar_lea.vmem %s6297_s25, 16  ;;  %p6728_p6 = scmp.lt.s32.totalorder %s6297_s25, %s6297_s25 }
  0x13   :  { %117 = vmatpush1.msra.mxu0 %v8026_v0  ;;  %194 = vmatpush1.msra.mxu1 %v6877_v4  ;;  %v6920_v11 = vld [vmem:[%s8008_s0 + $0x38] sm:$0xff]  ;;  %v1268_v14 = vld [vmem:[%s8010_s2] sm:$0xff]  ;;  %v75_v15 = vld [vmem:[%s8009_s1 + $0x8] sm:$0xff]  ;;  %p6724_p5 = scmp.ne.s32.totalorder %s6297_s25, %s6723_s26 }
  0x14   :  { %6321 = vmatmul.mubr.msk.f32.vlgmr.msra.gmra.mxu0 %vm79_vm0, %v6319_v5  ;;  %6323 = vmatmul.mubr.msk.f32.vlgmr.msra.gmra.mxu1 %vm79_vm0, %v6319_v5  ;;  %v2561_v16 = vld [vmem:[%s8014_s6 + $0x8] sm:$0xff]  ;;  %v6341_v17 = vld [vmem:[%s8009_s1 + $0x20] sm:$0xff] }
  0x15   :  { %156 = vmatprep.mubr.f32.mxu0 %v8026_v0  ;;  %233 = vmatprep.mubr.f32.mxu1 %v8026_v0  ;;  %v4191_v18 = vld [vmem:[%s8016_s8 + $0x8] sm:$0xff]  ;;  %v6994_v19 = vld [vmem:[%s8008_s0 + $0x40] sm:$0xff] }
  0x16   :  { %347 = vmatprep.subr.mxu1 %v6889_v6  ;;  %270 = vmatprep.subr.mxu0 %v6894_v7  ;;  %v6342_v20 = vld [vmem:[%s8009_s1 + $0x28] sm:$0xff]  ;;  %v5431_v21 = vld [vmem:[%s8018_s10] sm:$0xff] }
  0x17   :  { %348 = vmatpush1.msra.mxu1 %v6901_v8  ;;  %271 = vmatpush1.msra.mxu0 %v6906_v9  ;;  %v6272_v22 = vld [vmem:[%s8021_s13] sm:$0x3]  ;;  %v2511_v23 = vld [vmem:[%s8012_s4 + $0x8] sm:$0xff] }
  0x18   :  { %6322 = vmatmul.mubr.msk.f32.gmra.mxu0 %vm79_vm0, %v6320_v10  ;;  %6324 = vmatmul.mubr.msk.f32.gmra.mxu1 %vm79_vm0, %v6320_v10  ;;  %v2510_v24 = vld [vmem:[%s8012_s4] sm:$0xff]  ;;  %v5432_v37 = vld [vmem:[%s8018_s10 + $0x8] sm:$0xff] }
  0x19   :  { %304 = vmatprep.mubr.f32.mxu0 %v8026_v0  ;;  %381 = vmatprep.mubr.f32.mxu1 %v8026_v0  ;;  %v2560_v27 = vld [vmem:[%s8014_s6] sm:$0xff] }
  0x1a   :  { %6555 = vmatprep.subr.mxu1 %v8026_v0  ;;  %6550 = vmatprep.subr.mxu0 %v6920_v11  ;;  %v4190_v32 = vld [vmem:[%s8016_s8] sm:$0xff] }
  0x1b   :  { %1277 = vperm.xlu0 %6697, %v1269_v12   ;;  %2519 = vperm.xlu1 %6698, %v2511_v23  }
  0x1c   :  { %6325 = vmatmul.mubr.msk.f32.vlgmr.msra.gmra.mxu0 %vm79_vm0, %v6319_v5  ;;  %6327 = vmatmul.mubr.msk.f32.vlgmr.msra.gmra.mxu1 %vm79_vm0, %v6319_v5 }
  0x1d   :  { %310 = vmatprep.mubr.f32.mxu0 %v8026_v0  ;;  %387 = vmatprep.mubr.f32.mxu1 %v8026_v0 }
  0x1e   :  { %6556 = vmatpush3.msra.mxu1 %v8026_v0  ;;  %6551 = vmatpush3.msra.mxu0 %v6920_v11 }
  0x1f   :  { %582 = vmatprep.subr.mxu0 %v6877_v4  ;;  %659 = vmatprep.subr.mxu1 %v6906_v9 }
  0x20   :  { %6326 = vmatmul.mubr.msk.f32.gmra.mxu0 %vm79_vm0, %v6320_v10  ;;  %6328 = vmatmul.mubr.msk.f32.gmra.mxu1 %vm79_vm0, %v6320_v10 }
  0x21   :  { %6552 = vmatprep.mubr.msk.f32.mxu0 %vm79_vm0, %v6319_v5  ;;  %6557 = vmatprep.mubr.msk.f32.mxu1 %vm79_vm0, %v74_v13 }
  0x22   :  { %1272 = vperm.xlu0 %6697, %v1268_v14   ;;  %2514 = vperm.xlu1 %6698, %v2510_v24  }
  0x24   :  { %6553 = vmatmul.mubr.msk.f32.vlgmr.msra.gmra.mxu0 %vm79_vm0, %v6320_v10  ;;  %6558 = vmatmul.mubr.msk.f32.vlgmr.msra.gmra.mxu1 %vm79_vm0, %v75_v15 }
  0x25   :  { %583 = vmatpush1.msra.mxu0 %v6867_v2  ;;  %616 = vmatprep.mubr.f32.mxu0 %v8026_v0 }
  0x26   :  { %660 = vmatpush1.msra.mxu1 %v6872_v3  ;;  %693 = vmatprep.mubr.f32.mxu1 %v8026_v0 }
  0x27   :  { %6560 = vmatprep.subr.mxu1 %v6889_v6  ;;  %736 = vmatprep.subr.mxu0 %v6901_v8 }
  0x28   :  { %6333 = vmatmul.mubr.msk.f32.vlgmr.msra.gmra.mxu0 %vm79_vm0, %v74_v13  ;;  %6335 = vmatmul.mubr.msk.f32.vlgmr.msra.gmra.mxu1 %vm79_vm0, %v74_v13 }
  0x29   :  { %622 = vmatprep.mubr.f32.mxu0 %v8026_v0  ;;  %699 = vmatprep.mubr.f32.mxu1 %v8026_v0 }
  0x2a   :  { %6561 = vmatpush3.msra.mxu1 %v6889_v6  ;;  %737 = vmatpush1.msra.mxu0 %v6894_v7 }
  0x2b   :  { %897 = vmatprep.subr.mxu1 %v6877_v4  ;;  %974 = vmatprep.subr.mxu0 %v6906_v9 }
  0x2c   :  { %6334 = vmatmul.mubr.msk.f32.gmra.mxu0 %vm79_vm0, %v75_v15  ;;  %6336 = vmatmul.mubr.msk.f32.gmra.mxu1 %vm79_vm0, %v75_v15 }
  0x2d   :  { %770 = vmatprep.mubr.f32.mxu0 %v8026_v0  ;;  %6562 = vmatprep.mubr.msk.f32.mxu1 %vm79_vm0, %v74_v13 }
  0x2e   :  { %2569 = vperm.xlu0 %6697, %v2561_v16   ;;  %2564 = vperm.xlu1 %6698, %v2560_v27  }
  0x30   :  { %6337 = vmatmul.mubr.msk.f32.vlgmr.msra.gmra.mxu0 %vm79_vm0, %v74_v13  ;;  %6563 = vmatmul.mubr.msk.f32.vlgmr.msra.gmra.mxu1 %vm79_vm0, %v75_v15 }
  0x31   :  { %776 = vmatprep.mubr.f32.mxu0 %v8026_v0  ;;  %898 = vmatpush1.msra.mxu1 %v6867_v2 }
  0x32   :  { %931 = vmatprep.mubr.f32.mxu1 %v8026_v0  ;;  %975 = vmatpush1.msra.mxu0 %v6872_v3 }
  0x33   :  { %1051 = vmatprep.subr.mxu1 %v6901_v8  ;;  %1128 = vmatprep.subr.mxu0 %v6920_v11 }
  0x34   :  { %6338 = vmatmul.mubr.msk.f32.gmra.mxu0 %vm79_vm0, %v75_v15  ;;  %6343 = vmatmul.mubr.msk.f32.vlgmr.msra.gmra.mxu1 %vm79_vm0, %v6341_v17 }
  0x35   :  { %937 = vmatprep.mubr.f32.mxu1 %v8026_v0  ;;  %1008 = vmatprep.mubr.f32.mxu0 %v8026_v0 }
  0x36   :  { %1052 = vmatpush1.msra.mxu1 %v6894_v7  ;;  %4199 = vperm.xlu0 %6697, %v4191_v18  }
  0x37   :  { %6565 = vmatprep.subr.mxu1 %v6994_v19  ;;  %4194 = vperm.xlu1 %6698, %v4190_v32  }
  0x38   :  { %6344 = vmatmul.mubr.msk.f32.gmra.mxu1 %vm79_vm0, %v6342_v20  ;;  %6345 = vmatmul.mubr.msk.f32.vlgmr.msra.gmra.mxu0 %vm79_vm0, %v6341_v17 }
  0x39   :  { %1014 = vmatprep.mubr.f32.mxu0 %v8026_v0  ;;  %1085 = vmatprep.mubr.f32.mxu1 %v8026_v0 }
  0x3a   :  { %1129 = vmatpush1.msra.mxu0 %v6889_v6  ;;  %5435 = vperm.xlu0 %6697, %v5431_v21  }
  0x3b   :  { %5440 = vperm.xlu1 %6698, %v5432_v37  }
  0x3c   :  { %6346 = vmatmul.mubr.msk.f32.gmra.mxu0 %vm79_vm0, %v6342_v20  ;;  %6347 = vmatmul.mubr.msk.f32.vlgmr.msra.gmra.mxu1 %vm79_vm0, %v6341_v17 }
  0x3d   :  { %1091 = vmatprep.mubr.f32.mxu1 %v8026_v0  ;;  %1162 = vmatprep.mubr.f32.mxu0 %v8026_v0 }
  0x3e   :  { %6566 = vmatpush3.msra.mxu1 %v6994_v19  ;;  %6275 = vperm.xlu0 %6697, %v6272_v22  }
  0x40   :  { %6348 = vmatmul.mubr.msk.f32.gmra.mxu1 %vm79_vm0, %v6342_v20  ;;  %6349 = vmatmul.mubr.msk.f32.vlgmr.msra.gmra.mxu0 %vm79_vm0, %v6341_v17 }
  0x41   :  { %1168 = vmatprep.mubr.f32.mxu0 %v8026_v0  ;;  %6567 = vmatprep.mubr.msk.f32.mxu1 %vm79_vm0, %v6341_v17 }
  0x44   :  { %6350 = vmatmul.mubr.msk.f32.gmra.mxu0 %vm79_vm0, %v6342_v20  ;;  %6568 = vmatmul.mubr.msk.f32.vlgmr.msra.gmra.mxu1 %vm79_vm0, %v6342_v20 }
  0x45   :  { %1392 = vmatprep.mubr.f32.mxu0 %v8026_v0  ;;  %1469 = vmatprep.mubr.f32.mxu1 %v8026_v0 }
  0x96   :  { %v7060_v60 = vpop.permute.xlu0 %1277 }
  0x9d   :  { %v7062_v15 = vpop.permute.xlu0 %1272 }
  0xd4   :  { %v152_v25 = vpop.f32.mrf.mxu0  ;;  %v229_v26 = vpop.f32.mrf.mxu1 }
  0xd6   :  { %v154_v28 = vpop.f32.mrf.mxu0  ;;  %v231_v29 = vpop.f32.mrf.mxu1 }
  0xd8   :  { %v158_v30 = vpop.f32.mrf.mxu0  ;;  %v235_v31 = vpop.f32.mrf.mxu1 }
  0xda   :  { %v160_v33 = vpop.f32.mrf.mxu0  ;;  %v237_v34 = vpop.f32.mrf.mxu1 }
  0xdc   :  { %v306_v35 = vpop.f32.mrf.mxu0  ;;  %v7039_v36 = vpop.f32.mrf.mxu1 }
  0xde   :  { %v308_v38 = vpop.f32.mrf.mxu0  ;;  %v7044_v39 = vpop.f32.mrf.mxu1 }
  0xe0   :  { %v312_v40 = vpop.f32.mrf.mxu0  ;;  %v7046_v41 = vpop.f32.mrf.mxu1 }
  0xe2   :  { %v7048_v42 = vpop.f32.mrf.mxu0  ;;  %v7050_v43 = vpop.f32.mrf.mxu1 }
  0xe4   :  { %v7052_v44 = vpop.f32.mrf.mxu0  ;;  %v6559_v45 = vpop.f32.mrf.mxu1 }
  0xe5   :  { %v548_v10 = vadd.f32 %v6559_v45, %v158_v30 }
  0xe6   :  { %v7054_v46 = vpop.f32.mrf.mxu0  ;;  %v541_v47 = vpop.f32.mrf.mxu1 }
  0xe7   :  { %v542_v63 = vadd.f32 %v541_v47, %v152_v25 }
  0xe8   :  { %v618_v48 = vpop.f32.mrf.mxu0  ;;  %v695_v49 = vpop.f32.mrf.mxu1 }
  0xe9   :  { %v619_v16 = vadd.f32 %v618_v48, %v229_v26 }
  0xea   :  { %v620_v50 = vpop.f32.mrf.mxu0  ;;  %v697_v51 = vpop.f32.mrf.mxu1 }
  0xec   :  { %v624_v52 = vpop.f32.mrf.mxu0  ;;  %v701_v53 = vpop.f32.mrf.mxu1 }
  0xed   :  { %v625_v18 = vadd.f32 %v624_v52, %v235_v31  ;;  %v702_v26 = vadd.f32 %v701_v53, %v312_v40  ;;  %v7079_v40 = vld [vmem:[%s8011_s3 + $0x10] sm:$0xff] }
  0xee   :  { %v626_v54 = vpop.f32.mrf.mxu0  ;;  %v703_v55 = vpop.f32.mrf.mxu1 }
  0xef   :  { %v627_v30 = vadd.f32 %v626_v54, %v237_v34  ;;  %v698_v34 = vadd.f32 %v697_v51, %v308_v38 }
  0xf0   :  { %v772_v56 = vpop.f32.mrf.mxu0  ;;  %v7056_v57 = vpop.f32.mrf.mxu1 }
  0xf1   :  { %v773_v38 = vadd.f32 %v772_v56, %v7039_v36 }
  0xf2   :  { %v774_v58 = vpop.f32.mrf.mxu0  ;;  %v7058_v59 = vpop.f32.mrf.mxu1 }
  0xf3   :  { %v775_v51 = vadd.f32 %v774_v58, %v7044_v39 }
  0xf4   :  { %v778_v61 = vpop.f32.mrf.mxu0  ;;  %v933_v62 = vpop.f32.mrf.mxu1 }
  0xf5   :  { %v1250_v12 = vadd.f32 %v933_v62, %v542_v63  ;;  %v696_v62 = vadd.f32 %v695_v49, %v306_v35  ;;  %v621_v63 = vadd.f32 %v620_v50, %v231_v29  ;;  %v704_v49 = vadd.f32 %v703_v55, %v7048_v42 }
  0xf6   :  { %v780_v1 = vpop.f32.mrf.mxu0  ;;  %v935_v5 = vpop.f32.mrf.mxu1 }
  0xf7   :  { %v1280_v22 = vadd.f32 %v7062_v15, %v1250_v12  ;;  %v1251_v25 = vadd.f32 %v935_v5, %v154_v28  ;;  %v781_v36 = vadd.f32 %v780_v1, %v7050_v43 }
  0xf8   :  { %v939_v13 = vpop.f32.mrf.mxu1  ;;  %v1010_v14 = vpop.f32.mrf.mxu0 }
  0xf9   :  { %v1259_v17 = vadd.f32 %v939_v13, %v548_v10  ;;  %v1252_v24 = vadd.f32 %v1010_v14, %v619_v16  ;;  %v7069_v10 = vmax.f32 %v1280_v22, 0.0  ;;  %v1281_v54 = vadd.f32 %v7062_v15, %v1251_v25 }
  0xfa   :  { %v941_v20 = vpop.f32.mrf.mxu1  ;;  %v1012_v21 = vpop.f32.mrf.mxu0  ;;  %v779_v14 = vadd.f32 %v778_v61, %v7046_v41  ;;  %v6354_v61 = vld [vmem:[%s8011_s3 + $0x18] sm:$0xff] }
  0xfb   :  { %v1289_v23 = vadd.f32 %v7060_v60, %v1259_v17  ;;  %v1260_v27 = vadd.f32 %v941_v20, %v160_v33  ;;  %v1282_v12 = vadd.f32 %v7062_v15, %v1252_v24  ;;  %v1253_v50 = vadd.f32 %v1012_v21, %v621_v63 }
  0xfc   :  { %v1016_v32 = vpop.f32.mrf.mxu0  ;;  %v1087_v37 = vpop.f32.mrf.mxu1  ;;  %v7099_v39 = vmax.f32 %v1281_v54, 0.0 }
  0xfd   :  { %v7066_v45 = vmax.f32 %v1289_v23, 0.0  ;;  %v1261_v47 = vadd.f32 %v1016_v32, %v625_v18  ;;  %v1290_v31 = vadd.f32 %v7060_v60, %v1260_v27  ;;  %v1254_v5 = vadd.f32 %v1087_v37, %v696_v62 }
  0xfe   :  { %v1018_v48 = vpop.f32.mrf.mxu0  ;;  %v1089_v52 = vpop.f32.mrf.mxu1  ;;  %v7091_v20 = vmax.f32 %v1282_v12, 0.0  ;;  %v1283_v22 = vadd.f32 %v7062_v15, %v1253_v50 }
  0xff   :  { %v1291_v33 = vadd.f32 %v7060_v60, %v1261_v47  ;;  %v1262_v28 = vadd.f32 %v1018_v48, %v627_v30  ;;  %1356 = vmatprep.subr.mxu0 %v7066_v45  ;;  %v7088_v16 = vmax.f32 %v1290_v31, 0.0  ;;  %v1284_v41 = vadd.f32 %v7062_v15, %v1254_v5  ;;  %v1316_v5 = vld [vmem:[%s8011_s3] sm:$0xff] }
 0x100   :  { %v1093_v35 = vpop.f32.mrf.mxu1  ;;  %v1164_v29 = vpop.f32.mrf.mxu0  ;;  %1357 = vmatpush1.msra.mxu0 %v8026_v0  ;;  %v1255_v23 = vadd.f32 %v1089_v52, %v698_v34  ;;  %v7124_v63 = vmax.f32 %v1283_v22, 0.0 }
 0x101   :  { %v7082_v53 = vmax.f32 %v1291_v33, 0.0  ;;  %v1263_v13 = vadd.f32 %v1093_v35, %v702_v26  ;;  %1358 = vmatprep.subr.mxu0 %v7069_v10  ;;  %v1292_v42 = vadd.f32 %v7060_v60, %v1262_v28  ;;  %v1256_v56 = vadd.f32 %v1164_v29, %v773_v38  ;;  %v1317_v35 = vld [vmem:[%s8011_s3 + $0x8] sm:$0xff] }
 0x102   :  { %v1095_v17 = vpop.f32.mrf.mxu1  ;;  %v1166_v18 = vpop.f32.mrf.mxu0  ;;  %1359 = vmatpush1.msra.mxu0 %v8026_v0  ;;  %v7119_v47 = vmax.f32 %v1284_v41, 0.0  ;;  %v1285_v26 = vadd.f32 %v7062_v15, %v1255_v23 }
 0x103   :  { %v1293_v55 = vadd.f32 %v7060_v60, %v1263_v13  ;;  %v1264_v21 = vadd.f32 %v1095_v17, %v704_v49  ;;  %6355 = vmatmul.mubr.msk.f32.vlgmr.msra.gmra.mxu0 %vm1321_vm1, %v7079_v40  ;;  %1433 = vmatprep.subr.mxu1 %v7082_v53  ;;  %v1257_v1 = vadd.f32 %v1166_v18, %v775_v51  ;;  %v7112_v25 = vmax.f32 %v1292_v42, 0.0 }
 0x104   :  { %v1170_v58 = vpop.f32.mrf.mxu0  ;;  %1434 = vmatpush1.msra.mxu1 %v7088_v16  ;;  %1398 = vmatprep.mubr.f32.mxu0 %v8026_v0  ;;  %v1286_v62 = vadd.f32 %v7062_v15, %v1256_v56  ;;  %v7145_v34 = vmax.f32 %v1285_v26, 0.0  ;;  %v6569_v29 = vpop.f32.mrf.mxu1 }
 0x105   :  { %v7108_v24 = vmax.f32 %v1293_v55, 0.0  ;;  %v1265_v43 = vadd.f32 %v1170_v58, %v779_v14  ;;  %1435 = vmatprep.subr.mxu1 %v7091_v20  ;;  %v1294_v32 = vadd.f32 %v7060_v60, %v1264_v21  ;;  %v1287_v12 = vadd.f32 %v7062_v15, %v1257_v1 }
 0x106   :  { %v1172_v27 = vpop.f32.mrf.mxu0  ;;  %1436 = vmatpush1.msra.mxu1 %v7099_v39  ;;  %v7140_v28 = vmax.f32 %v1286_v62, 0.0  ;;  %v1241_v50 = vpop.f32.mrf.mxu1 }
 0x107   :  { %v1295_v37 = vadd.f32 %v7060_v60, %v1265_v43  ;;  %v1266_v30 = vadd.f32 %v1172_v27, %v781_v36  ;;  %6356 = vmatmul.mubr.msk.f32.gmra.mxu0 %vm1321_vm1, %v6354_v61  ;;  %6357 = vmatmul.mubr.msk.f32.vlgmr.msra.gmra.mxu1 %vm1321_vm1, %v7079_v40  ;;  %v7133_v52 = vmax.f32 %v1294_v32, 0.0  ;;  %v7151_v54 = vmax.f32 %v1287_v12, 0.0 }
 0x108   :  { %1510 = vmatprep.subr.mxu0 %v7108_v24  ;;  %1475 = vmatprep.mubr.f32.mxu1 %v8026_v0 }
 0x109   :  { %v7127_v31 = vmax.f32 %v1295_v37, 0.0  ;;  %v1296_v48 = vadd.f32 %v7060_v60, %v1266_v30  ;;  %1511 = vmatpush1.msra.mxu0 %v7112_v25  ;;  %1546 = vmatprep.mubr.f32.mxu0 %v8026_v0 }
 0x10a   :  { %1512 = vmatprep.subr.mxu0 %v7119_v47 }
 0x10b   :  { %v7136_v33 = vmax.f32 %v1296_v48, 0.0  ;;  %1513 = vmatpush1.msra.mxu0 %v7124_v63  ;;  %6358 = vmatmul.mubr.msk.f32.gmra.mxu1 %vm1321_vm1, %v6354_v61 }
 0x10c   :  { %6359 = vmatmul.mubr.msk.f32.vlgmr.msra.gmra.mxu0 %vm1321_vm1, %v7079_v40  ;;  %1587 = vmatprep.subr.mxu1 %v7127_v31 }
 0x10d   :  { %1588 = vmatpush1.msra.mxu1 %v7133_v52  ;;  %6570 = vmatprep.subr.mxu0 %v7136_v33 }
 0x10e   :  { %1589 = vmatprep.subr.mxu1 %v7140_v28  ;;  %1552 = vmatprep.mubr.f32.mxu0 %v8026_v0 }
 0x10f   :  { %1590 = vmatpush1.msra.mxu1 %v7145_v34  ;;  %1623 = vmatprep.mubr.f32.mxu1 %v8026_v0 }
 0x110   :  { %6571 = vmatpush3.msra.mxu0 %v7136_v33  ;;  %6361 = vmatmul.mubr.msk.f32.vlgmr.msra.gmra.mxu1 %vm1321_vm1, %v7079_v40 }
 0x111   :  { %6360 = vmatmul.mubr.msk.f32.gmra.mxu0 %vm1321_vm1, %v6354_v61  ;;  %6572 = vmatprep.subr.mxu0 %v7151_v54 }
 0x112   :  { %6577 = vmatprep.subr.mxu1 %v8026_v0  ;;  %6573 = vmatpush3.msra.mxu0 %v7151_v54 }
 0x113   :  { %6578 = vmatpush3.msra.mxu1 %v8026_v0  ;;  %1822 = vmatprep.subr.mxu0 %v7088_v16 }
 0x114   :  { %1899 = vmatprep.subr.mxu1 %v7112_v25  ;;  %1629 = vmatprep.mubr.f32.mxu1 %v8026_v0 }
 0x115   :  { %6574 = vmatprep.mubr.msk.f32.mxu0 %vm1321_vm1, %v7079_v40  ;;  %6362 = vmatmul.mubr.msk.f32.gmra.mxu1 %vm1321_vm1, %v6354_v61  ;;  %v855_v40 = vadd.f32 %v7056_v57, %v7052_v44  ;;  %v6375_v44 = vld [vmem:[%s8011_s3 + $0x20] sm:$0xff] }
 0x116   :  { %6575 = vmatmul.mubr.msk.f32.vlgmr.msra.gmra.mxu0 %vm1321_vm1, %v6354_v61  ;;  %6579 = vmatprep.mubr.msk.f32.mxu1 %vm1321_vm1, %v1316_v5 }
 0x117   :  { %1823 = vmatpush1.msra.mxu0 %v7066_v45  ;;  %1858 = vmatprep.mubr.f32.mxu0 %v8026_v0  ;;  %v1267_v49 = vadd.f32 %v6569_v29, %v855_v40 }
 0x118   :  { %1824 = vmatprep.subr.mxu0 %v7099_v39 }
 0x119   :  { %1825 = vmatpush1.msra.mxu0 %v7069_v10  ;;  %6580 = vmatmul.mubr.msk.f32.vlgmr.msra.gmra.mxu1 %vm1321_vm1, %v1317_v35  ;;  %v1297_v57 = vadd.f32 %v7060_v60, %v1267_v49 }
 0x11a   :  { %1976 = vmatprep.subr.mxu0 %v7133_v52  ;;  %6367 = vmatmul.mubr.msk.f32.vlgmr.msra.gmra.mxu0 %vm1321_vm1, %v1316_v5 }
 0x11b   :  { %1900 = vmatpush1.msra.mxu1 %v7082_v53  ;;  %1977 = vmatpush1.msra.mxu0 %v7108_v24  ;;  %v1315_v60 = vmax.f32 %v1297_v57, 0.0 }
 0x11c   :  { %1901 = vmatprep.subr.mxu1 %v7124_v63  ;;  %1978 = vmatprep.subr.mxu0 %v7145_v34 }
 0x11d   :  { %1902 = vmatpush1.msra.mxu1 %v7091_v20  ;;  %1979 = vmatpush1.msra.mxu0 %v7119_v47 }
 0x11e   :  { %1864 = vmatprep.mubr.f32.mxu0 %v8026_v0  ;;  %1935 = vmatprep.mubr.f32.mxu1 %v8026_v0 }
 0x11f   :  { %6582 = vmatprep.subr.mxu1 %v7127_v31  ;;  %2214 = vmatprep.subr.mxu0 %v7112_v25 }
 0x120   :  { %6368 = vmatmul.mubr.msk.f32.gmra.mxu0 %vm1321_vm1, %v1317_v35  ;;  %6369 = vmatmul.mubr.msk.f32.vlgmr.msra.gmra.mxu1 %vm1321_vm1, %v1316_v5 }
 0x121   :  { %6583 = vmatpush3.msra.mxu1 %v7127_v31  ;;  %1941 = vmatprep.mubr.f32.mxu1 %v8026_v0 }
 0x122   :  { %6584 = vmatprep.subr.mxu1 %v7140_v28  ;;  %2012 = vmatprep.mubr.f32.mxu0 %v8026_v0 }
 0x123   :  { %6585 = vmatpush3.msra.mxu1 %v7140_v28 }
 0x124   :  { %2137 = vmatprep.subr.mxu1 %v7088_v16  ;;  %6370 = vmatmul.mubr.msk.f32.gmra.mxu1 %vm1321_vm1, %v1317_v35 }
 0x125   :  { %6371 = vmatmul.mubr.msk.f32.vlgmr.msra.gmra.mxu0 %vm1321_vm1, %v1316_v5  ;;  %6586 = vmatprep.mubr.msk.f32.mxu1 %vm1321_vm1, %v1316_v5 }
 0x126   :  { %2215 = vmatpush1.msra.mxu0 %v7082_v53  ;;  %2018 = vmatprep.mubr.f32.mxu0 %v8026_v0  ;;  %v850_v53 = vadd.f32 %v7058_v59, %v7054_v46  ;;  %v6376_v46 = vld [vmem:[%s8011_s3 + $0x28] sm:$0xff] }
 0x127   :  { %2216 = vmatprep.subr.mxu0 %v7124_v63 }
 0x128   :  { %2217 = vmatpush1.msra.mxu0 %v7091_v20  ;;  %6587 = vmatmul.mubr.msk.f32.vlgmr.msra.gmra.mxu1 %vm1321_vm1, %v1317_v35 }
 0x129   :  { %2368 = vmatprep.subr.mxu0 %v7136_v33  ;;  %6372 = vmatmul.mubr.msk.f32.gmra.mxu0 %vm1321_vm1, %v1317_v35 }
 0x12a   :  { %2138 = vmatpush1.msra.mxu1 %v7066_v45  ;;  %2173 = vmatprep.mubr.f32.mxu1 %v8026_v0  ;;  %v1258_v45 = vadd.f32 %v1241_v50, %v850_v53 }
 0x12b   :  { %2139 = vmatprep.subr.mxu1 %v7099_v39  ;;  %2250 = vmatprep.mubr.f32.mxu0 %v8026_v0 }
 0x12c   :  { %2140 = vmatpush1.msra.mxu1 %v7069_v10  ;;  %v1288_v59 = vadd.f32 %v7062_v15, %v1258_v45 }
 0x12d   :  { %2291 = vmatprep.subr.mxu1 %v7133_v52  ;;  %6377 = vmatmul.mubr.msk.f32.vlgmr.msra.gmra.mxu1 %vm1321_vm1, %v6375_v44 }
 0x12e   :  { %6379 = vmatmul.mubr.msk.f32.vlgmr.msra.gmra.mxu0 %vm1321_vm1, %v6375_v44  ;;  %2292 = vmatpush1.msra.mxu1 %v7108_v24  ;;  %v1306_v10 = vmax.f32 %v1288_v59, 0.0 }
 0x12f   :  { %2369 = vmatpush1.msra.mxu0 %v7127_v31  ;;  %2293 = vmatprep.subr.mxu1 %v7145_v34 }
 0x130   :  { %2370 = vmatprep.subr.mxu0 %v7151_v54  ;;  %2294 = vmatpush1.msra.mxu1 %v7119_v47  ;;  %v7328_v54 = vpop.permute.xlu1 %2519 }
 0x131   :  { %2371 = vmatpush1.msra.mxu0 %v7140_v28  ;;  %2179 = vmatprep.mubr.f32.mxu1 %v8026_v0 }
 0x132   :  { %2256 = vmatprep.mubr.f32.mxu0 %v8026_v0  ;;  %6589 = vmatprep.subr.mxu1 %v1315_v60 }
 0x133   :  { %6378 = vmatmul.mubr.msk.f32.gmra.mxu1 %vm1321_vm1, %v6376_v46  ;;  %6380 = vmatmul.mubr.msk.f32.gmra.mxu0 %vm1321_vm1, %v6376_v46 }
 0x134   :  { %2327 = vmatprep.mubr.f32.mxu1 %v8026_v0  ;;  %2404 = vmatprep.mubr.f32.mxu0 %v8026_v0 }
 0x135   :  { %2608 = vmatprep.subr.mxu0 %v6877_v4  ;;  %v2558_v4 = vld [vmem:[%s8013_s5] sm:$0xff] }
 0x137   :  { %6381 = vmatmul.mubr.msk.f32.vlgmr.msra.gmra.mxu1 %vm1321_vm1, %v6375_v44  ;;  %6383 = vmatmul.mubr.msk.f32.vlgmr.msra.gmra.mxu0 %vm1321_vm1, %v6375_v44 }
 0x138   :  { %6590 = vmatpush3.msra.mxu1 %v1315_v60  ;;  %2333 = vmatprep.mubr.f32.mxu1 %v8026_v0 }
 0x139   :  { %6591 = vmatprep.subr.mxu1 %v1306_v10  ;;  %2410 = vmatprep.mubr.f32.mxu0 %v8026_v0 }
 0x13a   :  { %6592 = vmatpush3.msra.mxu1 %v1306_v10  ;;  %2609 = vmatpush1.msra.mxu0 %v6867_v2  ;;  %v2559_v2 = vld [vmem:[%s8013_s5 + $0x8] sm:$0xff]  ;;  %v7332_v10 = vpop.permute.xlu1 %2514 }
 0x13b   :  { %6382 = vmatmul.mubr.msk.f32.gmra.mxu1 %vm1321_vm1, %v6376_v46  ;;  %6384 = vmatmul.mubr.msk.f32.gmra.mxu0 %vm1321_vm1, %v6376_v46 }
 0x13c   :  { %6593 = vmatprep.mubr.msk.f32.mxu1 %vm1321_vm1, %v6375_v44  ;;  %2642 = vmatprep.mubr.f32.mxu0 %v8026_v0 }
 0x13d   :  { %2685 = vmatprep.subr.mxu1 %v6906_v9  ;;  %2762 = vmatprep.subr.mxu0 %v6901_v8 }
 0x13f   :  { %6594 = vmatmul.mubr.msk.f32.vlgmr.msra.gmra.mxu1 %vm1321_vm1, %v6376_v46  ;;  %6387 = vmatmul.mubr.msk.f32.vlgmr.msra.gmra.mxu0 %vm79_vm0, %v2558_v4 }
 0x140   :  { %2648 = vmatprep.mubr.f32.mxu0 %v8026_v0  ;;  %2686 = vmatpush1.msra.mxu1 %v6872_v3  ;;  %v7292_v3 = vld [vmem:[%s8015_s7 + $0x10] sm:$0xff] }
 0x141   :  { %2719 = vmatprep.mubr.f32.mxu1 %v8026_v0  ;;  %2763 = vmatpush1.msra.mxu0 %v6894_v7 }
 0x142   :  { %2839 = vmatprep.subr.mxu1 %v6920_v11  ;;  %6596 = vmatprep.subr.mxu0 %v6994_v19 }
 0x143   :  { %6388 = vmatmul.mubr.msk.f32.gmra.mxu0 %vm79_vm0, %v2559_v2  ;;  %6389 = vmatmul.mubr.msk.f32.vlgmr.msra.gmra.mxu1 %vm79_vm0, %v2558_v4 }
 0x144   :  { %2725 = vmatprep.mubr.f32.mxu1 %v8026_v0  ;;  %2796 = vmatprep.mubr.f32.mxu0 %v8026_v0 }
 0x145   :  { %2840 = vmatpush1.msra.mxu1 %v6889_v6  ;;  %v7299_v6 = vld [vmem:[%s8015_s7 + $0x18] sm:$0xff] }
 0x146   :  { %6601 = vmatprep.subr.mxu1 %v8026_v0 }
 0x147   :  { %6390 = vmatmul.mubr.msk.f32.gmra.mxu1 %vm79_vm0, %v2559_v2  ;;  %6391 = vmatmul.mubr.msk.f32.vlgmr.msra.gmra.mxu0 %vm79_vm0, %v2558_v4 }
 0x148   :  { %2802 = vmatprep.mubr.f32.mxu0 %v8026_v0  ;;  %2873 = vmatprep.mubr.f32.mxu1 %v8026_v0 }
 0x149   :  { %6597 = vmatpush3.msra.mxu0 %v6994_v19 }
 0x14b   :  { %6392 = vmatmul.mubr.msk.f32.gmra.mxu0 %vm79_vm0, %v2559_v2  ;;  %6393 = vmatmul.mubr.msk.f32.vlgmr.msra.gmra.mxu1 %vm79_vm0, %v2558_v4 }
 0x14c   :  { %2879 = vmatprep.mubr.f32.mxu1 %v8026_v0  ;;  %6598 = vmatprep.mubr.msk.f32.mxu0 %vm79_vm0, %v2558_v4 }
 0x14d   :  { %6602 = vmatpush3.msra.mxu1 %v8026_v0 }
 0x14f   :  { %6394 = vmatmul.mubr.msk.f32.gmra.mxu1 %vm79_vm0, %v2559_v2  ;;  %6599 = vmatmul.mubr.msk.f32.vlgmr.msra.gmra.mxu0 %vm79_vm0, %v2559_v2 }
 0x150   :  { %3149 = vmatprep.mubr.f32.mxu0 %v8026_v0  ;;  %6603 = vmatprep.mubr.msk.f32.mxu1 %vm1321_vm1, %v7292_v3 }
 0x153   :  { %6604 = vmatmul.mubr.msk.f32.vlgmr.msra.gmra.mxu1 %vm1321_vm1, %v7299_v6 }
 0x154   :  { %3226 = vmatprep.mubr.f32.mxu1 %v8026_v0 }
 0x1c3   :  { %v1394_v7 = vpop.f32.mrf.mxu0 }
 0x1c5   :  { %v1396_v8 = vpop.f32.mrf.mxu0 }
 0x1c7   :  { %v1400_v9 = vpop.f32.mrf.mxu0  ;;  %v1471_v11 = vpop.f32.mrf.mxu1 }
 0x1c9   :  { %v1402_v19 = vpop.f32.mrf.mxu0  ;;  %v1473_v15 = vpop.f32.mrf.mxu1 }
 0x1cb   :  { %v1477_v13 = vpop.f32.mrf.mxu1 }
 0x1cc   :  { %v7304_v38 = vpop.f32.mrf.mxu0 }
 0x1cd   :  { %v1479_v51 = vpop.f32.mrf.mxu1 }
 0x1ce   :  { %v7306_v14 = vpop.f32.mrf.mxu0 }
 0x1d0   :  { %v7308_v16 = vpop.f32.mrf.mxu1 }
 0x1d1   :  { %v7310_v17 = vpop.f32.mrf.mxu0 }
 0x1d2   :  { %v1627_v18 = vpop.f32.mrf.mxu1 }
 0x1d3   :  { %v7312_v20 = vpop.f32.mrf.mxu0 }
 0x1d5   :  { %v7314_v42 = vpop.f32.mrf.mxu1 }
 0x1d6   :  { %v7316_v55 = vpop.f32.mrf.mxu0 }
 0x1d7   :  { %v7318_v21 = vpop.f32.mrf.mxu1 }
 0x1d8   :  { %v1702_v36 = vpop.f32.mrf.mxu0 }
 0x1d9   :  { %v6581_v39 = vpop.f32.mrf.mxu1 }
 0x1da   :  { %v1860_v41 = vpop.f32.mrf.mxu0  ;;  %v1790_v57 = vadd.f32 %v6581_v39, %v1400_v9 }
 0x1db   :  { %v1783_v56 = vpop.f32.mrf.mxu1  ;;  %v1861_v29 = vadd.f32 %v1860_v41, %v1471_v11 }
 0x1dc   :  { %v1862_v58 = vpop.f32.mrf.mxu0  ;;  %v1784_v40 = vadd.f32 %v1783_v56, %v1394_v7 }
 0x1dd   :  { %v1863_v50 = vadd.f32 %v1862_v58, %v1473_v15 }
 0x1e0   :  { %v1866_v61 = vpop.f32.mrf.mxu0  ;;  %v1937_v22 = vpop.f32.mrf.mxu1 }
 0x1e2   :  { %v1868_v23 = vpop.f32.mrf.mxu0  ;;  %v1939_v24 = vpop.f32.mrf.mxu1 }
 0x1e3   :  { %v1869_v11 = vadd.f32 %v1868_v23, %v1479_v51 }
 0x1e4   :  { %v1943_v43 = vpop.f32.mrf.mxu1 }
 0x1e5   :  { %v2014_v1 = vpop.f32.mrf.mxu0  ;;  %v1944_v51 = vadd.f32 %v1943_v43, %v7310_v17  ;;  %v7360_v43 = vpop.permute.xlu0 %2569 }
 0x1e6   :  { %v1945_v27 = vpop.f32.mrf.mxu1 }
 0x1e7   :  { %v2016_v25 = vpop.f32.mrf.mxu0 }
 0x1e8   :  { %v7320_v32 = vadd.f32 %v2016_v25, %v1627_v18  ;;  %v7322_v37 = vpop.f32.mrf.mxu1  ;;  %v1867_v18 = vadd.f32 %v1866_v61, %v1477_v13  ;;  %v1938_v61 = vadd.f32 %v1937_v22, %v7304_v38 }
 0x1e9   :  { %v2020_v30 = vpop.f32.mrf.mxu0 }
 0x1ea   :  { %v2091_v47 = vpop.f32.mrf.mxu1 }
 0x1eb   :  { %v7324_v62 = vpop.f32.mrf.mxu0  ;;  %v7326_v63 = vadd.f32 %v2091_v47, %v1702_v36 }
 0x1ed   :  { %v2175_v26 = vpop.f32.mrf.mxu1 }
 0x1ee   :  { %v2252_v31 = vpop.f32.mrf.mxu0  ;;  %v2492_v53 = vadd.f32 %v2175_v26, %v1784_v40 }
 0x1ef   :  { %v2177_v48 = vpop.f32.mrf.mxu1  ;;  %v2494_v45 = vadd.f32 %v2252_v31, %v1861_v29  ;;  %v2015_v31 = vadd.f32 %v2014_v1, %v7308_v16 }
 0x1f0   :  { %v2254_v52 = vpop.f32.mrf.mxu0  ;;  %v2493_v60 = vadd.f32 %v2177_v48, %v1396_v8  ;;  %v2522_v15 = vadd.f32 %v7332_v10, %v2492_v53  ;;  %v1946_v48 = vadd.f32 %v1945_v27, %v7312_v20 }
 0x1f1   :  { %v2495_v4 = vadd.f32 %v2254_v52, %v1863_v50  ;;  %v7341_v39 = vadd.f32 %v7332_v10, %v2494_v45  ;;  %v2021_v52 = vadd.f32 %v2020_v30, %v7314_v42 }
 0x1f2   :  { %v2523_v41 = vadd.f32 %v7332_v10, %v2493_v60 }
 0x1f3   :  { %v2181_v12 = vpop.f32.mrf.mxu1  ;;  %v2258_v33 = vpop.f32.mrf.mxu0  ;;  %v7344_v58 = vadd.f32 %v7332_v10, %v2495_v4  ;;  %v2542_v17 = vmax.f32 %v7341_v39, 0.0 }
 0x1f4   :  { %v2501_v2 = vadd.f32 %v2181_v12, %v1790_v57  ;;  %v2503_v56 = vadd.f32 %v2258_v33, %v1867_v18  ;;  %v7356_v33 = vpop.permute.xlu1 %2564 }
 0x1f5   :  { %v2183_v28 = vpop.f32.mrf.mxu1  ;;  %v2260_v34 = vpop.f32.mrf.mxu0  ;;  %v2543_v16 = vmax.f32 %v7344_v58, 0.0 }
 0x1f6   :  { %v2502_v7 = vadd.f32 %v2183_v28, %v1402_v19  ;;  %v2531_v13 = vadd.f32 %v7328_v54, %v2501_v2  ;;  %v1940_v19 = vadd.f32 %v1939_v24, %v7306_v14  ;;  %v2504_v23 = vadd.f32 %v2260_v34, %v1869_v11 }
 0x1f7   :  { %v2329_v5 = vpop.f32.mrf.mxu1  ;;  %v2406_v35 = vpop.f32.mrf.mxu0  ;;  %v2541_v28 = vmax.f32 %v2523_v41, 0.0  ;;  %v2533_v38 = vadd.f32 %v7328_v54, %v2503_v56  ;;  %v2540_v14 = vmax.f32 %v2522_v15, 0.0 }
 0x1f8   :  { %v2532_v12 = vadd.f32 %v7328_v54, %v2502_v7  ;;  %v2549_v1 = vmax.f32 %v2531_v13, 0.0  ;;  %v2534_v27 = vadd.f32 %v7328_v54, %v2504_v23  ;;  %v2496_v30 = vadd.f32 %v2329_v5, %v1938_v61 }
 0x1f9   :  { %v2331_v49 = vpop.f32.mrf.mxu1  ;;  %v7330_v44 = vpop.f32.mrf.mxu0  ;;  %v2498_v53 = vadd.f32 %v2406_v35, %v2015_v31  ;;  %v2551_v4 = vmax.f32 %v2533_v38, 0.0 }
 0x1fa   :  { %v2550_v50 = vmax.f32 %v2532_v12, 0.0  ;;  %v2497_v2 = vadd.f32 %v2331_v49, %v1940_v19  ;;  %v2526_v39 = vadd.f32 %v7332_v10, %v2496_v30 }
 0x1fb   :  { %v2335_v46 = vpop.f32.mrf.mxu1  ;;  %v2412_v59 = vpop.f32.mrf.mxu0  ;;  %v2528_v49 = vadd.f32 %v7332_v10, %v2498_v53 }
 0x1fc   :  { %v2505_v20 = vadd.f32 %v2335_v46, %v1944_v51  ;;  %v2507_v18 = vadd.f32 %v2412_v59, %v2021_v52  ;;  %v2527_v51 = vadd.f32 %v7332_v10, %v2497_v2 }
 0x1fd   :  { %v2337_v36 = vpop.f32.mrf.mxu1  ;;  %v7334_v25 = vpop.f32.mrf.mxu0 }
 0x1fe   :  { %v2506_v45 = vadd.f32 %v2337_v36, %v1946_v48  ;;  %v2535_v41 = vadd.f32 %v7328_v54, %v2505_v20  ;;  %v2537_v23 = vadd.f32 %v7328_v54, %v2507_v18 }
 0x1ff   :  { %v7337_v9 = vpop.f32.mrf.mxu1  ;;  %v2644_v8 = vpop.f32.mrf.mxu0 }
 0x200   :  { %v2645_v34 = vadd.f32 %v2644_v8, %v7356_v33  ;;  %v2552_v8 = vmax.f32 %v2534_v27, 0.0  ;;  %v2536_v59 = vadd.f32 %v7328_v54, %v2506_v45  ;;  %v2553_v12 = vmax.f32 %v2535_v41, 0.0 }
 0x201   :  { %v7350_v47 = vpop.f32.mrf.mxu1  ;;  %v2646_v26 = vpop.f32.mrf.mxu0 }
 0x202   :  { %v2647_v42 = vadd.f32 %v2646_v26, %v7356_v33  ;;  %v2961_v58 = vadd.f32 %v2645_v34, %v2540_v14  ;;  %v2554_v30 = vmax.f32 %v2536_v59, 0.0  ;;  %v2998_v59 = vld [vmem:[%s8015_s7 + $0x8] sm:$0xff] }
 0x203   :  { %v2650_v22 = vpop.f32.mrf.mxu0  ;;  %v2721_v24 = vpop.f32.mrf.mxu1 }
 0x204   :  { %v2651_v29 = vadd.f32 %v2650_v22, %v7360_v43  ;;  %v2962_v5 = vadd.f32 %v2647_v42, %v2541_v28  ;;  %v2722_v61 = vadd.f32 %v2721_v24, %v7356_v33  ;;  %v7386_v22 = vmax.f32 %v2961_v58, 0.0 }
 0x205   :  { %v2652_v40 = vpop.f32.mrf.mxu0  ;;  %v2723_v57 = vpop.f32.mrf.mxu1 }
 0x206   :  { %v2653_v60 = vadd.f32 %v2652_v40, %v7360_v43  ;;  %v2970_v46 = vadd.f32 %v2651_v29, %v2549_v1  ;;  %v2724_v35 = vadd.f32 %v2723_v57, %v7356_v33  ;;  %v7382_v28 = vmax.f32 %v2962_v5, 0.0 }
 0x207   :  { %v2727_v11 = vpop.f32.mrf.mxu1  ;;  %v2798_v7 = vpop.f32.mrf.mxu0  ;;  %v2963_v34 = vadd.f32 %v2722_v61, %v2542_v17  ;;  %v2544_v57 = vmax.f32 %v2526_v39, 0.0  ;;  %v2555_v17 = vmax.f32 %v2537_v23, 0.0 }
 0x208   :  { %v2971_v56 = vadd.f32 %v2653_v60, %v2550_v50  ;;  %v2728_v15 = vadd.f32 %v2727_v11, %v7360_v43  ;;  %v7379_v26 = vmax.f32 %v2970_v46, 0.0  ;;  %v2964_v24 = vadd.f32 %v2724_v35, %v2543_v16 }
 0x209   :  { %v2729_v36 = vpop.f32.mrf.mxu1  ;;  %v2800_v13 = vpop.f32.mrf.mxu0  ;;  %v2799_v29 = vadd.f32 %v2798_v7, %v7356_v33  ;;  %v2545_v50 = vmax.f32 %v2527_v51, 0.0  ;;  %v2546_v7 = vmax.f32 %v2528_v49, 0.0  ;;  %v7408_v41 = vmax.f32 %v2963_v34, 0.0  ;;  %v2997_v49 = vld [vmem:[%s8015_s7] sm:$0xff]  ;;  %v7564_v34 = vld [vmem:[#allocation2 + $0x10] sm:$0xff] }
 0x20a   :  { %v7375_v19 = vmax.f32 %v2971_v56, 0.0  ;;  %v2730_v31 = vadd.f32 %v2729_v36, %v7360_v43  ;;  %v2972_v38 = vadd.f32 %v2728_v15, %v2551_v4  ;;  %v2801_v20 = vadd.f32 %v2800_v13, %v7356_v33 }
 0x20b   :  { %v2804_v48 = vpop.f32.mrf.mxu0  ;;  %v2875_v52 = vpop.f32.mrf.mxu1  ;;  %v7403_v18 = vmax.f32 %v2964_v24, 0.0  ;;  %v2965_v5 = vadd.f32 %v2799_v29, %v2544_v57  ;;  %v7568_v29 = vld [vmem:[#allocation2 + $0x18] sm:$0xff] }
 0x20c   :  { %v2805_v14 = vadd.f32 %v2804_v48, %v7360_v43  ;;  %3113 = vmatprep.subr.mxu0 %v7375_v19  ;;  %v2973_v1 = vadd.f32 %v2730_v31, %v2552_v8  ;;  %v7398_v45 = vmax.f32 %v2972_v38, 0.0  ;;  %v2876_v4 = vadd.f32 %v2875_v52, %v7356_v33 }
 0x20d   :  { %v2806_v42 = vpop.f32.mrf.mxu0  ;;  %v7389_v27 = vpop.f32.mrf.mxu1  ;;  %3114 = vmatpush1.msra.mxu0 %v7379_v26  ;;  %v2966_v46 = vadd.f32 %v2801_v20, %v2545_v50  ;;  %v7426_v36 = vmax.f32 %v2965_v5, 0.0 }
 0x20e   :  { %v2807_v40 = vadd.f32 %v2806_v42, %v7360_v43  ;;  %3115 = vmatprep.subr.mxu0 %v7382_v28  ;;  %v7395_v53 = vmax.f32 %v2973_v1, 0.0  ;;  %v2974_v60 = vadd.f32 %v2805_v14, %v2553_v12  ;;  %v2967_v39 = vadd.f32 %v2876_v4, %v2546_v7 }
 0x20f   :  { %v2881_v16 = vpop.f32.mrf.mxu1  ;;  %3116 = vmatpush1.msra.mxu0 %v7386_v22  ;;  %v7419_v58 = vmax.f32 %v2966_v46, 0.0 }
 0x210   :  { %v2975_v2 = vadd.f32 %v2807_v40, %v2554_v30  ;;  %6401 = vmatmul.mubr.msk.f32.vlgmr.msra.gmra.mxu0 %vm1321_vm1, %v7292_v3  ;;  %v2882_v11 = vadd.f32 %v2881_v16, %v7360_v43  ;;  %3190 = vmatprep.subr.mxu1 %v7395_v53  ;;  %v7414_v8 = vmax.f32 %v2974_v60, 0.0  ;;  %v7432_v13 = vmax.f32 %v2967_v39, 0.0 }
 0x211   :  { %3155 = vmatprep.mubr.f32.mxu0 %v8026_v0  ;;  %3191 = vmatpush1.msra.mxu1 %v7398_v45 }
 0x212   :  { %v7410_v56 = vmax.f32 %v2975_v2, 0.0  ;;  %v2976_v15 = vadd.f32 %v2882_v11, %v2555_v17  ;;  %3192 = vmatprep.subr.mxu1 %v7403_v18  ;;  %8040 = vst [vmem:[#allocation12_spill] sm:$0xff] %v7432_v13 }
 0x213   :  { %3193 = vmatpush1.msra.mxu1 %v7408_v41 }
 0x214   :  { %8039 = vst [vmem:[#allocation11_spill] sm:$0xff] %v7410_v56  ;;  %6402 = vmatmul.mubr.msk.f32.gmra.mxu0 %vm1321_vm1, %v7299_v6  ;;  %v7421_v35 = vmax.f32 %v2976_v15, 0.0  ;;  %6403 = vmatmul.mubr.msk.f32.vlgmr.msra.gmra.mxu1 %vm1321_vm1, %v7292_v3 }
 0x215   :  { %3267 = vmatprep.subr.mxu0 %v7410_v56  ;;  %3232 = vmatprep.mubr.f32.mxu1 %v8026_v0 }
 0x216   :  { %3268 = vmatpush1.msra.mxu0 %v7414_v8  ;;  %6606 = vmatprep.subr.mxu1 %v7421_v35 }
 0x217   :  { %3269 = vmatprep.subr.mxu0 %v7419_v58  ;;  %3303 = vmatprep.mubr.f32.mxu0 %v8026_v0 }
 0x218   :  { %3270 = vmatpush1.msra.mxu0 %v7426_v36  ;;  %6607 = vmatpush3.msra.mxu1 %v7421_v35 }
 0x219   :  { %6405 = vmatmul.mubr.msk.f32.vlgmr.msra.gmra.mxu0 %vm1321_vm1, %v7292_v3  ;;  %6404 = vmatmul.mubr.msk.f32.gmra.mxu1 %vm1321_vm1, %v7299_v6 }
 0x21a   :  { %6608 = vmatprep.subr.mxu1 %v7432_v13  ;;  %6618 = vmatprep.subr.mxu0 %v8026_v0 }
 0x21b   :  { %6609 = vmatpush3.msra.mxu1 %v7432_v13  ;;  %6619 = vmatpush3.msra.mxu0 %v8026_v0 }
 0x21c   :  { %3309 = vmatprep.mubr.f32.mxu0 %v8026_v0  ;;  %3656 = vmatprep.subr.mxu0 %v7395_v53 }
 0x21d   :  { %6610 = vmatprep.mubr.msk.f32.mxu1 %vm1321_vm1, %v7292_v3  ;;  %6613 = vmatprep.subr.mxu1 %v8026_v0  ;;  %v2023_v3 = vadd.f32 %v7324_v62, %v7318_v21  ;;  %v2499_v21 = vadd.f32 %v7330_v44, %v7320_v32  ;;  %v6600_v62 = vpop.f32.mrf.mxu0  ;;  %v2500_v32 = vadd.f32 %v7350_v47, %v7326_v63  ;;  %v6419_v63 = vld [vmem:[%s8015_s7 + $0x20] sm:$0xff] }
 0x21e   :  { %6406 = vmatmul.mubr.msk.f32.gmra.mxu0 %vm1321_vm1, %v7299_v6  ;;  %6611 = vmatmul.mubr.msk.f32.vlgmr.msra.gmra.mxu1 %vm1321_vm1, %v7299_v6  ;;  %v2097_v6 = vadd.f32 %v7322_v37, %v7316_v55  ;;  %v2883_v55 = vpop.f32.mrf.mxu1  ;;  %v2958_v44 = vadd.f32 %v6600_v62, %v7360_v43  ;;  %v2878_v47 = vadd.f32 %v7389_v27, %v7356_v33 }
 0x21f   :  { %6620 = vmatprep.mubr.msk.f32.mxu0 %vm1321_vm1, %v2997_v49  ;;  %6614 = vmatpush3.msra.mxu1 %v8026_v0  ;;  %v2508_v61 = vadd.f32 %v7334_v25, %v2023_v3  ;;  %v2952_v48 = vpop.f32.mrf.mxu0  ;;  %v2530_v52 = vadd.f32 %v7332_v10, %v2500_v32 }
 0x220   :  { %6615 = vmatprep.mubr.msk.f32.mxu1 %vm1321_vm1, %v2997_v49  ;;  %3579 = vmatprep.subr.mxu1 %v7375_v19  ;;  %v2509_v51 = vadd.f32 %v7337_v9, %v2097_v6  ;;  %v2884_v9 = vadd.f32 %v2883_v55, %v7360_v43  ;;  %v2953_v14 = vadd.f32 %v2952_v48, %v7356_v33  ;;  %v6605_v40 = vpop.f32.mrf.mxu1 }
 0x221   :  { %v2538_v37 = vadd.f32 %v7328_v54, %v2508_v61  ;;  %v2548_v20 = vmax.f32 %v2530_v52, 0.0 }
 0x222   :  { %6621 = vmatmul.mubr.msk.f32.vlgmr.msra.gmra.mxu0 %vm1321_vm1, %v2998_v59  ;;  %6616 = vmatmul.mubr.msk.f32.vlgmr.msra.gmra.mxu1 %vm1321_vm1, %v2998_v59  ;;  %v2539_v25 = vadd.f32 %v7328_v54, %v2509_v51  ;;  %v2529_v54 = vadd.f32 %v7332_v10, %v2499_v21  ;;  %v6420_v10 = vld [vmem:[%s8015_s7 + $0x28] sm:$0xff]  ;;  %v3074_v50 = vpop.f32.mrf.mxu1 }
 0x223   :  { %3657 = vmatpush1.msra.mxu0 %v7398_v45  ;;  %3580 = vmatpush1.msra.mxu1 %v7379_v26  ;;  %v2556_v23 = vmax.f32 %v2538_v37, 0.0  ;;  %v2969_v33 = vadd.f32 %v2953_v14, %v2548_v20  ;;  %v7595_v20 = vpop.permute.xlu1 %4194 }
 0x224   :  { %3658 = vmatprep.subr.mxu0 %v7403_v18  ;;  %3581 = vmatprep.subr.mxu1 %v7382_v28  ;;  %v2557_v31 = vmax.f32 %v2539_v25, 0.0  ;;  %v2547_v38 = vmax.f32 %v2529_v54, 0.0 }
 0x225   :  { %3659 = vmatpush1.msra.mxu0 %v7408_v41  ;;  %3582 = vmatpush1.msra.mxu1 %v7386_v22  ;;  %v7512_v43 = vadd.f32 %v2884_v9, %v2556_v23  ;;  %v7545_v30 = vmax.f32 %v2969_v33, 0.0 }
 0x226   :  { %3615 = vmatprep.mubr.f32.mxu1 %v8026_v0  ;;  %3692 = vmatprep.mubr.f32.mxu0 %v8026_v0  ;;  %v2978_v12 = vadd.f32 %v2958_v44, %v2557_v31  ;;  %v7521_v24 = vadd.f32 %v2878_v47, %v2547_v38  ;;  %v7593_v38 = vpop.permute.xlu0 %4199 }
 0x227   :  { %6623 = vmatprep.subr.mxu1 %v7414_v8  ;;  %3817 = vmatprep.subr.mxu0 %v7375_v19  ;;  %8041 = vst [vmem:[#allocation13_spill] sm:$0xff] %v7512_v43  ;;  %v8024_v1 = vmax.f32 %v7512_v43, 0.0  ;;  %8043 = vst [vmem:[#allocation15_spill] sm:$0xff] %v7545_v30 }
 0x228   :  { %6413 = vmatmul.mubr.msk.f32.vlgmr.msra.gmra.mxu1 %vm1321_vm1, %v2997_v49  ;;  %6415 = vmatmul.mubr.msk.f32.vlgmr.msra.gmra.mxu0 %vm1321_vm1, %v2997_v49  ;;  %8042 = vst [vmem:[#allocation14_spill] sm:$0xff] %v7521_v24  ;;  %v7529_v42 = vmax.f32 %v2978_v12, 0.0  ;;  %v8025_v27 = vmax.f32 %v7521_v24, 0.0 }
 0x229   :  { %6624 = vmatpush3.msra.mxu1 %v7414_v8  ;;  %3818 = vmatpush1.msra.mxu0 %v7379_v26 }
 0x22a   :  { %6625 = vmatprep.subr.mxu1 %v7426_v36  ;;  %3819 = vmatprep.subr.mxu0 %v7382_v28 }
 0x22b   :  { %6626 = vmatpush3.msra.mxu1 %v7426_v36  ;;  %3820 = vmatpush1.msra.mxu0 %v7386_v22 }
 0x22c   :  { %3621 = vmatprep.mubr.f32.mxu1 %v8026_v0  ;;  %3698 = vmatprep.mubr.f32.mxu0 %v8026_v0 }
 0x22d   :  { %3894 = vmatprep.subr.mxu1 %v7395_v53  ;;  %3971 = vmatprep.subr.mxu0 %v7410_v56 }
 0x22e   :  { %6414 = vmatmul.mubr.msk.f32.gmra.mxu1 %vm1321_vm1, %v2998_v59  ;;  %6416 = vmatmul.mubr.msk.f32.gmra.mxu0 %vm1321_vm1, %v2998_v59 }
 0x22f   :  { %6627 = vmatprep.mubr.msk.f32.mxu1 %vm1321_vm1, %v2997_v49  ;;  %3853 = vmatprep.mubr.f32.mxu0 %v8026_v0 }
 0x232   :  { %6628 = vmatmul.mubr.msk.f32.vlgmr.msra.gmra.mxu1 %vm1321_vm1, %v2998_v59  ;;  %6421 = vmatmul.mubr.msk.f32.vlgmr.msra.gmra.mxu0 %vm1321_vm1, %v6419_v63 }
 0x233   :  { %3895 = vmatpush1.msra.mxu1 %v7398_v45  ;;  %3972 = vmatpush1.msra.mxu0 %v7414_v8 }
 0x234   :  { %3896 = vmatprep.subr.mxu1 %v7403_v18  ;;  %3973 = vmatprep.subr.mxu0 %v7419_v58 }
 0x235   :  { %3897 = vmatpush1.msra.mxu1 %v7408_v41  ;;  %3974 = vmatpush1.msra.mxu0 %v7426_v36 }
 0x236   :  { %3859 = vmatprep.mubr.f32.mxu0 %v8026_v0  ;;  %3930 = vmatprep.mubr.f32.mxu1 %v8026_v0 }
 0x237   :  { %4048 = vmatprep.subr.mxu1 %v8024_v1  ;;  %6630 = vmatprep.subr.mxu0 %v7529_v42 }
 0x238   :  { %6422 = vmatmul.mubr.msk.f32.gmra.mxu0 %vm1321_vm1, %v6420_v10  ;;  %6423 = vmatmul.mubr.msk.f32.vlgmr.msra.gmra.mxu1 %vm1321_vm1, %v6419_v63 }
 0x239   :  { %4007 = vmatprep.mubr.f32.mxu0 %v8026_v0  ;;  %4049 = vmatpush1.msra.mxu1 %v7421_v35 }
 0x23a   :  { %3936 = vmatprep.mubr.f32.mxu1 %v8026_v0  ;;  %4050 = vmatprep.subr.mxu1 %v8025_v27 }
 0x23b   :  { %4051 = vmatpush1.msra.mxu1 %v7432_v13 }
 0x23c   :  { %6425 = vmatmul.mubr.msk.f32.vlgmr.msra.gmra.mxu0 %vm1321_vm1, %v6419_v63  ;;  %6424 = vmatmul.mubr.msk.f32.gmra.mxu1 %vm1321_vm1, %v6420_v10 }
 0x23d   :  { %6631 = vmatpush3.msra.mxu0 %v7529_v42  ;;  %4013 = vmatprep.mubr.f32.mxu0 %v8026_v0 }
 0x23e   :  { %6632 = vmatprep.subr.mxu0 %v7545_v30  ;;  %4084 = vmatprep.mubr.f32.mxu1 %v8026_v0 }
 0x23f   :  { %6633 = vmatpush3.msra.mxu0 %v7545_v30  ;;  %6637 = vmatprep.subr.mxu1 %v8026_v0 }
 0x240   :  { %6426 = vmatmul.mubr.msk.f32.gmra.mxu0 %vm1321_vm1, %v6420_v10  ;;  %6427 = vmatmul.mubr.msk.f32.vlgmr.msra.gmra.mxu1 %vm1321_vm1, %v6419_v63 }
 0x241   :  { %6634 = vmatprep.mubr.msk.f32.mxu0 %vm1321_vm1, %v6419_v63  ;;  %4090 = vmatprep.mubr.f32.mxu1 %v8026_v0 }
 0x242   :  { %6638 = vmatpush3.msra.mxu1 %v8026_v0 }
 0x244   :  { %6635 = vmatmul.mubr.msk.f32.vlgmr.msra.gmra.mxu0 %vm1321_vm1, %v6420_v10  ;;  %6428 = vmatmul.mubr.msk.f32.gmra.mxu1 %vm1321_vm1, %v6420_v10 }
 0x245   :  { %4390 = vmatprep.mubr.f32.mxu0 %v8026_v0  ;;  %6639 = vmatprep.mubr.msk.f32.mxu1 %vm1321_vm1, %v7564_v34 }
 0x248   :  { %6640 = vmatmul.mubr.msk.f32.vlgmr.msra.gmra.mxu1 %vm1321_vm1, %v7568_v29 }
 0x249   :  { %4467 = vmatprep.mubr.f32.mxu1 %v8026_v0 }
 0x2d0   :  { %v3151_v57 = vpop.f32.mrf.mxu0 }
 0x2d2   :  { %v3153_v16 = vpop.f32.mrf.mxu0 }
 0x2d4   :  { %v3157_v60 = vpop.f32.mrf.mxu0  ;;  %v3228_v4 = vpop.f32.mrf.mxu1 }
 0x2d6   :  { %v3159_v2 = vpop.f32.mrf.mxu0  ;;  %v3230_v17 = vpop.f32.mrf.mxu1 }
 0x2d9   :  { %v7573_v46 = vpop.f32.mrf.mxu0  ;;  %v3234_v11 = vpop.f32.mrf.mxu1 }
 0x2db   :  { %v7575_v7 = vpop.f32.mrf.mxu0  ;;  %v3236_v5 = vpop.f32.mrf.mxu1 }
 0x2de   :  { %v7577_v15 = vpop.f32.mrf.mxu0  ;;  %v7579_v39 = vpop.f32.mrf.mxu1 }
 0x2e0   :  { %v7581_v49 = vpop.f32.mrf.mxu0  ;;  %v7583_v59 = vpop.f32.mrf.mxu1 }
 0x2e2   :  { %v6622_v3 = vpop.f32.mrf.mxu0  ;;  %v6617_v6 = vpop.f32.mrf.mxu1 }
 0x2e3   :  { %v3470_v48 = vadd.f32 %v6617_v6, %v6605_v40  ;;  %v3547_v43 = vadd.f32 %v6622_v3, %v3157_v60 }
 0x2e4   :  { %v3463_v61 = vpop.f32.mrf.mxu1  ;;  %v3540_v51 = vpop.f32.mrf.mxu0 }
 0x2e5   :  { %v3464_v47 = vadd.f32 %v3463_v61, %v3074_v50  ;;  %v3541_v6 = vadd.f32 %v3540_v51, %v3151_v57 }
 0x2e8   :  { %v3617_v55 = vpop.f32.mrf.mxu1  ;;  %v3694_v21 = vpop.f32.mrf.mxu0 }
 0x2e9   :  { %v3618_v60 = vadd.f32 %v3617_v55, %v3228_v4 }
 0x2ea   :  { %v3619_v37 = vpop.f32.mrf.mxu1  ;;  %v7585_v62 = vpop.f32.mrf.mxu0 }
 0x2eb   :  { %v3620_v56 = vadd.f32 %v3619_v37, %v3230_v17 }
 0x2ee   :  { %v3623_v25 = vpop.f32.mrf.mxu1  ;;  %v3700_v9 = vpop.f32.mrf.mxu0 }
 0x2f0   :  { %v3625_v32 = vpop.f32.mrf.mxu1  ;;  %v7587_v44 = vpop.f32.mrf.mxu0 }
 0x2f2   :  { %v7589_v54 = vpop.f32.mrf.mxu1  ;;  %v3855_v23 = vpop.f32.mrf.mxu0 }
 0x2f3   :  { %v4172_v52 = vadd.f32 %v3855_v23, %v3464_v47 }
 0x2f4   :  { %v7591_v31 = vpop.f32.mrf.mxu1  ;;  %v3857_v63 = vpop.f32.mrf.mxu0 }
 0x2f5   :  { %v4203_v1 = vadd.f32 %v7595_v20, %v3857_v63  ;;  %v4202_v50 = vadd.f32 %v7595_v20, %v4172_v52  ;;  %v3624_v63 = vadd.f32 %v3623_v25, %v3234_v11  ;;  %v8044_v25 = vmov 0.0  }
 0x2f7   :  { %v7605_v13 = vmax.f32 %v4203_v1, 0.0  ;;  %v7608_v3 = vmax.f32 %v4202_v50, 0.0  ;;  %v3695_v1 = vadd.f32 %v3694_v21, %v7573_v46 }
 0x2f8   :  { %v3861_v12 = vpop.f32.mrf.mxu0  ;;  %v3932_v10 = vpop.f32.mrf.mxu1 }
 0x2f9   :  { %v4181_v14 = vadd.f32 %v3861_v12, %v3470_v48 }
 0x2fa   :  { %v3863_v33 = vpop.f32.mrf.mxu0  ;;  %v3934_v30 = vpop.f32.mrf.mxu1 }
 0x2fb   :  { %v4211_v27 = vadd.f32 %v7593_v38, %v4181_v14  ;;  %v4212_v0 = vadd.f32 %v7593_v38, %v3863_v33  ;;  %v4175_v48 = vadd.f32 %v3934_v30, %v3153_v16  ;;  %v4174_v14 = vadd.f32 %v3932_v10, %v3541_v6 }
 0x2fc   :  { %v4009_v40 = vpop.f32.mrf.mxu0  ;;  %v3938_v47 = vpop.f32.mrf.mxu1 }
 0x2fd   :  { %v7601_v61 = vmax.f32 %v4211_v27, 0.0  ;;  %v7603_v23 = vmax.f32 %v4212_v0, 0.0  ;;  %v4183_v12 = vadd.f32 %v3938_v47, %v3547_v43  ;;  %v3626_v0 = vadd.f32 %v3625_v32, %v3236_v5 }
 0x2fe   :  { %v4011_v24 = vpop.f32.mrf.mxu0  ;;  %v3940_v33 = vpop.f32.mrf.mxu1  ;;  %v4205_v11 = vadd.f32 %v7595_v20, %v4175_v48  ;;  %v4176_v51 = vadd.f32 %v4009_v40, %v3618_v60 }
 0x2ff   :  { %4354 = vmatprep.subr.mxu0 %v7603_v23  ;;  %v4184_v57 = vadd.f32 %v3940_v33, %v3159_v2  ;;  %v4213_v30 = vadd.f32 %v7593_v38, %v4183_v12  ;;  %v4177_v43 = vadd.f32 %v4011_v24, %v3620_v56  ;;  %v4204_v2 = vadd.f32 %v7595_v20, %v4174_v14 }
 0x300   :  { %v4015_v27 = vpop.f32.mrf.mxu0  ;;  %4355 = vmatpush1.msra.mxu0 %v7601_v61  ;;  %v4086_v17 = vpop.f32.mrf.mxu1  ;;  %v3701_v56 = vadd.f32 %v3700_v9, %v7577_v15  ;;  %v7635_v40 = vmax.f32 %v4205_v11, 0.0  ;;  %v4206_v15 = vadd.f32 %v7595_v20, %v4176_v51 }
 0x301   :  { %v4185_v16 = vadd.f32 %v4015_v27, %v3624_v63  ;;  %4356 = vmatprep.subr.mxu0 %v7605_v13  ;;  %v4214_v4 = vadd.f32 %v7593_v38, %v4184_v57  ;;  %v4178_v21 = vadd.f32 %v4086_v17, %v3695_v1  ;;  %v7627_v32 = vmax.f32 %v4213_v30, 0.0  ;;  %v4238_v27 = vld [vmem:[#allocation2] sm:$0xff] }
 0x302   :  { %v4017_v55 = vpop.f32.mrf.mxu0  ;;  %4357 = vmatpush1.msra.mxu0 %v7608_v3  ;;  %v7618_v37 = vpop.f32.mrf.mxu1  ;;  %v7630_v52 = vadd.f32 %v7595_v20, %v4177_v43  ;;  %v7639_v6 = vmax.f32 %v4204_v2, 0.0  ;;  %v7655_v33 = vmax.f32 %v4206_v15, 0.0 }
 0x303   :  { %v4186_v5 = vadd.f32 %v4017_v55, %v3626_v0  ;;  %6433 = vmatmul.mubr.msk.f32.vlgmr.msra.gmra.mxu0 %vm1321_vm1, %v7564_v34  ;;  %v7623_v24 = vmax.f32 %v4214_v4, 0.0  ;;  %v4215_v46 = vadd.f32 %v7593_v38, %v4185_v16  ;;  %v4208_v12 = vadd.f32 %v7595_v20, %v4178_v21  ;;  %v4239_v0 = vld [vmem:[#allocation2 + $0x8] sm:$0xff] }
 0x304   :  { %4396 = vmatprep.mubr.f32.mxu0 %v8044_v25  ;;  %v4092_v50 = vpop.f32.mrf.mxu1  ;;  %v4225_v14 = vmax.f32 %v7630_v52, 0.0  ;;  %v6636_v30 = vpop.f32.mrf.mxu0 }
 0x305   :  { %v7633_v10 = vadd.f32 %v7593_v38, %v4186_v5  ;;  %v4187_v9 = vadd.f32 %v4092_v50, %v3701_v56  ;;  %4431 = vmatprep.subr.mxu1 %v7623_v24  ;;  %v7645_v48 = vmax.f32 %v4215_v46, 0.0  ;;  %v7665_v57 = vmax.f32 %v4208_v12, 0.0 }
 0x306   :  { %4432 = vmatpush1.msra.mxu1 %v7627_v32 }
 0x307   :  { %v4234_v47 = vmax.f32 %v7633_v10, 0.0  ;;  %6434 = vmatmul.mubr.msk.f32.gmra.mxu0 %vm1321_vm1, %v7568_v29  ;;  %v4217_v63 = vadd.f32 %v7593_v38, %v4187_v9  ;;  %4433 = vmatprep.subr.mxu1 %v7635_v40 }
 0x308   :  { %4544 = vmatprep.mubr.f32.mxu0 %v8044_v25  ;;  %4434 = vmatpush1.msra.mxu1 %v7639_v6 }
 0x309   :  { %4508 = vmatprep.subr.mxu0 %v4234_v47  ;;  %v7657_v60 = vmax.f32 %v4217_v63, 0.0  ;;  %6435 = vmatmul.mubr.msk.f32.vlgmr.msra.gmra.mxu1 %vm1321_vm1, %v7564_v34 }
 0x30a   :  { %4509 = vmatpush1.msra.mxu0 %v7645_v48  ;;  %4473 = vmatprep.mubr.f32.mxu1 %v8044_v25 }
 0x30b   :  { %4510 = vmatprep.subr.mxu0 %v4225_v14  ;;  %6642 = vmatprep.subr.mxu1 %v7657_v60 }
 0x30c   :  { %4511 = vmatpush1.msra.mxu0 %v7655_v33  ;;  %6643 = vmatpush3.msra.mxu1 %v7657_v60 }
 0x30d   :  { %6437 = vmatmul.mubr.msk.f32.vlgmr.msra.gmra.mxu0 %vm1321_vm1, %v7564_v34  ;;  %6436 = vmatmul.mubr.msk.f32.gmra.mxu1 %vm1321_vm1, %v7568_v29 }
 0x30e   :  { %6644 = vmatprep.subr.mxu1 %v7665_v57  ;;  %6654 = vmatprep.subr.mxu0 %v8044_v25 }
 0x30f   :  { %6645 = vmatpush3.msra.mxu1 %v7665_v57  ;;  %6655 = vmatpush3.msra.mxu0 %v8044_v25 }
 0x310   :  { %4550 = vmatprep.mubr.f32.mxu0 %v8044_v25  ;;  %4897 = vmatprep.subr.mxu0 %v7623_v24 }
 0x311   :  { %6646 = vmatprep.mubr.msk.f32.mxu1 %vm1321_vm1, %v7564_v34  ;;  %6649 = vmatprep.subr.mxu1 %v8044_v25  ;;  %v4094_v34 = vpop.f32.mrf.mxu1 }
 0x312   :  { %6438 = vmatmul.mubr.msk.f32.gmra.mxu0 %vm1321_vm1, %v7568_v29  ;;  %6647 = vmatmul.mubr.msk.f32.vlgmr.msra.gmra.mxu1 %vm1321_vm1, %v7568_v29  ;;  %v3703_v29 = vadd.f32 %v7587_v44, %v7581_v49 }
 0x313   :  { %6656 = vmatprep.mubr.msk.f32.mxu0 %vm1321_vm1, %v4238_v27  ;;  %6650 = vmatpush3.msra.mxu1 %v8044_v25 }
 0x314   :  { %6651 = vmatprep.mubr.msk.f32.mxu1 %vm1321_vm1, %v4238_v27  ;;  %4820 = vmatprep.subr.mxu1 %v7603_v23  ;;  %v4188_v43 = vadd.f32 %v4094_v34, %v3703_v29 }
 0x316   :  { %6657 = vmatmul.mubr.msk.f32.vlgmr.msra.gmra.mxu0 %vm1321_vm1, %v4239_v0  ;;  %6652 = vmatmul.mubr.msk.f32.vlgmr.msra.gmra.mxu1 %vm1321_vm1, %v4239_v0  ;;  %v4218_v44 = vadd.f32 %v7593_v38, %v4188_v43 }
 0x317   :  { %4898 = vmatpush1.msra.mxu0 %v7627_v32  ;;  %4821 = vmatpush1.msra.mxu1 %v7601_v61 }
 0x318   :  { %4899 = vmatprep.subr.mxu0 %v7635_v40  ;;  %4822 = vmatprep.subr.mxu1 %v7605_v13  ;;  %v4236_v17 = vmax.f32 %v4218_v44, 0.0 }
 0x319   :  { %4900 = vmatpush1.msra.mxu0 %v7639_v6  ;;  %4823 = vmatpush1.msra.mxu1 %v7608_v3 }
 0x31a   :  { %4856 = vmatprep.mubr.f32.mxu1 %v8044_v25  ;;  %4933 = vmatprep.mubr.f32.mxu0 %v8044_v25 }
 0x31b   :  { %6659 = vmatprep.subr.mxu1 %v7645_v48  ;;  %5058 = vmatprep.subr.mxu0 %v7603_v23  ;;  %v3777_v23 = vadd.f32 %v7589_v54, %v7579_v39  ;;  %v5022_v39 = vld [vmem:[#allocation2 + $0x20] sm:$0xff]  ;;  %v4163_v54 = vpop.f32.mrf.mxu0 }
 0x31c   :  { %6445 = vmatmul.mubr.msk.f32.vlgmr.msra.gmra.mxu1 %vm1321_vm1, %v4238_v27  ;;  %6447 = vmatmul.mubr.msk.f32.vlgmr.msra.gmra.mxu0 %vm1321_vm1, %v4238_v27 }
 0x31d   :  { %6660 = vmatpush3.msra.mxu1 %v7645_v48  ;;  %5059 = vmatpush1.msra.mxu0 %v7601_v61  ;;  %v4189_v61 = vadd.f32 %v6636_v30, %v3777_v23 }
 0x31e   :  { %6661 = vmatprep.subr.mxu1 %v7655_v33  ;;  %5060 = vmatprep.subr.mxu0 %v7605_v13  ;;  %v3697_v13 = vadd.f32 %v7585_v62, %v7575_v7 }
 0x31f   :  { %6662 = vmatpush3.msra.mxu1 %v7655_v33  ;;  %5061 = vmatpush1.msra.mxu0 %v7608_v3  ;;  %v3772_v3 = vadd.f32 %v7591_v31, %v7583_v59  ;;  %v4219_v16 = vadd.f32 %v7593_v38, %v4189_v61  ;;  %v5023_v59 = vld [vmem:[#allocation2 + $0x28] sm:$0xff]  ;;  %v7768_v61 = vpop.permute.xlu0 %5435 }
 0x320   :  { %4862 = vmatprep.mubr.f32.mxu1 %v8044_v25  ;;  %4939 = vmatprep.mubr.f32.mxu0 %v8044_v25  ;;  %v4179_v49 = vadd.f32 %v7618_v37, %v3697_v13 }
 0x321   :  { %5135 = vmatprep.subr.mxu1 %v7623_v24  ;;  %5212 = vmatprep.subr.mxu0 %v4234_v47  ;;  %v4180_v7 = vadd.f32 %v4163_v54, %v3772_v3  ;;  %v4237_v31 = vmax.f32 %v4219_v16, 0.0  ;;  %v5515_v54 = vlaneseq }
 0x322   :  { %6446 = vmatmul.mubr.msk.f32.gmra.mxu1 %vm1321_vm1, %v4239_v0  ;;  %6448 = vmatmul.mubr.msk.f32.gmra.mxu0 %vm1321_vm1, %v4239_v0  ;;  %v4209_v62 = vadd.f32 %v7595_v20, %v4179_v49 }
 0x323   :  { %6663 = vmatprep.mubr.msk.f32.mxu1 %vm1321_vm1, %v4238_v27  ;;  %5094 = vmatprep.mubr.f32.mxu0 %v8044_v25  ;;  %v4210_v38 = vadd.f32 %v7595_v20, %v4180_v7  ;;  %v6641_v20 = vpop.f32.mrf.mxu1 }
 0x324   :  { %v4227_v1 = vmax.f32 %v4209_v62, 0.0  ;;  %v7772_v62 = vpop.permute.xlu1 %5440 }
 0x325   :  { %v4228_v11 = vmax.f32 %v4210_v38, 0.0  ;;  %v4315_v55 = vpop.f32.mrf.mxu1 }
 0x326   :  { %6664 = vmatmul.mubr.msk.f32.vlgmr.msra.gmra.mxu1 %vm1321_vm1, %v4239_v0  ;;  %6451 = vmatmul.mubr.msk.f32.vlgmr.msra.gmra.mxu0 %vm1321_vm1, %v5022_v39 }
 0x327   :  { %5136 = vmatpush1.msra.mxu1 %v7627_v32  ;;  %5213 = vmatpush1.msra.mxu0 %v7645_v48 }
 0x328   :  { %5137 = vmatprep.subr.mxu1 %v7635_v40  ;;  %5214 = vmatprep.subr.mxu0 %v4225_v14 }
 0x329   :  { %5138 = vmatpush1.msra.mxu1 %v7639_v6  ;;  %5215 = vmatpush1.msra.mxu0 %v7655_v33 }
 0x32a   :  { %5100 = vmatprep.mubr.f32.mxu0 %v8044_v25  ;;  %5171 = vmatprep.mubr.f32.mxu1 %v8044_v25 }
 0x32b   :  { %5289 = vmatprep.subr.mxu1 %v4236_v17  ;;  %6666 = vmatprep.subr.mxu0 %v4237_v31 }
 0x32c   :  { %6452 = vmatmul.mubr.msk.f32.gmra.mxu0 %vm1321_vm1, %v5023_v59  ;;  %6453 = vmatmul.mubr.msk.f32.vlgmr.msra.gmra.mxu1 %vm1321_vm1, %v5022_v39 }
 0x32d   :  { %5248 = vmatprep.mubr.f32.mxu0 %v8044_v25  ;;  %5290 = vmatpush1.msra.mxu1 %v7657_v60 }
 0x32e   :  { %5177 = vmatprep.mubr.f32.mxu1 %v8044_v25  ;;  %5291 = vmatprep.subr.mxu1 %v4227_v1 }
 0x32f   :  { %5292 = vmatpush1.msra.mxu1 %v7665_v57 }
 0x330   :  { %6455 = vmatmul.mubr.msk.f32.vlgmr.msra.gmra.mxu0 %vm1321_vm1, %v5022_v39  ;;  %6454 = vmatmul.mubr.msk.f32.gmra.mxu1 %vm1321_vm1, %v5023_v59 }
 0x331   :  { %6667 = vmatpush3.msra.mxu0 %v4237_v31  ;;  %5254 = vmatprep.mubr.f32.mxu0 %v8044_v25 }
 0x332   :  { %6668 = vmatprep.subr.mxu0 %v4228_v11  ;;  %5325 = vmatprep.mubr.f32.mxu1 %v8044_v25 }
 0x333   :  { %6669 = vmatpush3.msra.mxu0 %v4228_v11  ;;  %6673 = vmatprep.subr.mxu1 %v8044_v25 }
 0x334   :  { %6456 = vmatmul.mubr.msk.f32.gmra.mxu0 %vm1321_vm1, %v5023_v59  ;;  %6457 = vmatmul.mubr.msk.f32.vlgmr.msra.gmra.mxu1 %vm1321_vm1, %v5022_v39 }
 0x335   :  { %6670 = vmatprep.mubr.msk.f32.mxu0 %vm1321_vm1, %v5022_v39  ;;  %5331 = vmatprep.mubr.f32.mxu1 %v8044_v25 }
 0x336   :  { %6680 = vmatprep.subr.mxu0 %v8044_v25 }
 0x338   :  { %6671 = vmatmul.mubr.msk.f32.vlgmr.msra.gmra.mxu0 %vm1321_vm1, %v5023_v59  ;;  %6458 = vmatmul.mubr.msk.f32.gmra.mxu1 %vm1321_vm1, %v5023_v59 }
 0x3c3   :  { %v4392_v51 = vpop.f32.mrf.mxu0 }
 0x3c5   :  { %v4394_v4 = vpop.f32.mrf.mxu0 }
 0x3c7   :  { %v4398_v2 = vpop.f32.mrf.mxu0 }
 0x3c9   :  { %v4469_v5 = vpop.f32.mrf.mxu1  ;;  %v7762_v37 = vpop.f32.mrf.mxu0 }
 0x3cb   :  { %v4471_v56 = vpop.f32.mrf.mxu1 }
 0x3cd   :  { %v4546_v24 = vpop.f32.mrf.mxu0  ;;  %v4475_v46 = vpop.f32.mrf.mxu1 }
 0x3cf   :  { %v4548_v21 = vpop.f32.mrf.mxu0  ;;  %v4477_v32 = vpop.f32.mrf.mxu1 }
 0x3d2   :  { %v4552_v52 = vpop.f32.mrf.mxu0  ;;  %v7764_v10 = vpop.f32.mrf.mxu1 }
 0x3d4   :  { %v4554_v50 = vpop.f32.mrf.mxu0  ;;  %v7766_v40 = vpop.f32.mrf.mxu1 }
 0x3d6   :  { %v6658_v15 = vpop.f32.mrf.mxu0  ;;  %v6653_v9 = vpop.f32.mrf.mxu1 }
 0x3d7   :  { %v4711_v13 = vadd.f32 %v6653_v9, %v6641_v20  ;;  %v4788_v20 = vadd.f32 %v6658_v15, %v4398_v2 }
 0x3d8   :  { %v4704_v6 = vpop.f32.mrf.mxu1  ;;  %v4781_v47 = vpop.f32.mrf.mxu0 }
 0x3d9   :  { %v4705_v0 = vadd.f32 %v4704_v6, %v4315_v55  ;;  %v4782_v39 = vadd.f32 %v4781_v47, %v4392_v51  ;;  %v7775_v55 = vshrl.u32 %v5515_v54, 7 }
 0x3db   :  { %vm5526_vm2 = vcmp.eq.s32.totalorder %v7775_v55, 0  ;;  %vm5540_vm3 = vcmp.eq.s32.totalorder %v7775_v55, 1  ;;  %vm5554_vm4 = vcmp.eq.s32.totalorder %v7775_v55, 2  ;;  %vm5568_vm5 = vcmp.eq.s32.totalorder %v7775_v55, 3 }
 0x3dc   :  { %v4858_v48 = vpop.f32.mrf.mxu1  ;;  %v4935_v12 = vpop.f32.mrf.mxu0  ;;  %vm5582_vm6 = vcmp.eq.s32.totalorder %v7775_v55, 4  ;;  %vm5596_vm7 = vcmp.eq.s32.totalorder %v7775_v55, 5  ;;  %vm5610_vm8 = vcmp.eq.s32.totalorder %v7775_v55, 6  ;;  %vm5624_vm9 = vcmp.eq.s32.totalorder %v7775_v55, 7 }
 0x3dd   :  { %v4859_v51 = vadd.f32 %v4858_v48, %v4469_v5 }
 0x3de   :  { %v4860_v63 = vpop.f32.mrf.mxu1  ;;  %v4937_v14 = vpop.f32.mrf.mxu0 }
 0x3e2   :  { %v4864_v33 = vpop.f32.mrf.mxu1  ;;  %v4941_v60 = vpop.f32.mrf.mxu0 }
 0x3e4   :  { %v4866_v57 = vpop.f32.mrf.mxu1  ;;  %v4943_v27 = vpop.f32.mrf.mxu0 }
 0x3e5   :  { %v4867_v25 = vadd.f32 %v4866_v57, %v4477_v32 }
 0x3e6   :  { %v6665_v34 = vpop.f32.mrf.mxu1  ;;  %v5096_v29 = vpop.f32.mrf.mxu0 }
 0x3e7   :  { %v5413_v30 = vadd.f32 %v5096_v29, %v4705_v0  ;;  %v4936_v0 = vadd.f32 %v4935_v12, %v4546_v24  ;;  %v4861_v29 = vadd.f32 %v4860_v63, %v4471_v56 }
 0x3e8   :  { %v5012_v23 = vpop.f32.mrf.mxu1  ;;  %v5098_v43 = vpop.f32.mrf.mxu0 }
 0x3e9   :  { %v5443_v49 = vadd.f32 %v7768_v61, %v5413_v30  ;;  %v5444_v3 = vadd.f32 %v7768_v61, %v5098_v43  ;;  %v4938_v30 = vadd.f32 %v4937_v14, %v4548_v21 }
 0x3eb   :  { %v5461_v1 = vmax.f32 %v5443_v49, 0.0  ;;  %v5462_v9 = vmax.f32 %v5444_v3, 0.0 }
 0x3ec   :  { %v5102_v44 = vpop.f32.mrf.mxu0  ;;  %v5173_v7 = vpop.f32.mrf.mxu1 }
 0x3ed   :  { %v5422_v16 = vadd.f32 %v5102_v44, %v4711_v13  ;;  %v5415_v17 = vadd.f32 %v5173_v7, %v4782_v39  ;;  %v4865_v39 = vadd.f32 %v4864_v33, %v4475_v46  ;;  %v4942_v44 = vadd.f32 %v4941_v60, %v4552_v52 }
 0x3ee   :  { %v5104_v59 = vpop.f32.mrf.mxu0  ;;  %v5175_v38 = vpop.f32.mrf.mxu1  ;;  %v7780_v54 = vadd.f32 %v5461_v1, %v7386_v22  ;;  %v7783_v48 = vadd.f32 %v5462_v9, %v7382_v28  ;;  %v4944_v46 = vadd.f32 %v4943_v27, %v4554_v50  ;;  %v5018_v52 = vadd.f32 %v6665_v34, %v7764_v10 }
 0x3ef   :  { %v5452_v31 = vadd.f32 %v7772_v62, %v5422_v16  ;;  %v5453_v6 = vadd.f32 %v7772_v62, %v5104_v59  ;;  %v5445_v43 = vadd.f32 %v7768_v61, %v5415_v17  ;;  %v5416_v7 = vadd.f32 %v5175_v38, %v4394_v4 }
 0x3f0   :  { %v5250_v11 = vpop.f32.mrf.mxu0  ;;  %v5179_v47 = vpop.f32.mrf.mxu1  ;;  %v5013_v4 = vadd.f32 %v5012_v23, %v7766_v40  ;;  %v5497_v57 = vmax.f32 %v7780_v54, 0.0  ;;  %v5498_v40 = vmax.f32 %v7783_v48, 0.0 }
 0x3f1   :  { %v5470_v16 = vmax.f32 %v5452_v31, 0.0  ;;  %v5424_v2 = vadd.f32 %v5179_v47, %v4788_v20  ;;  %v5417_v5 = vadd.f32 %v5250_v11, %v4859_v51  ;;  %v5471_v56 = vmax.f32 %v5453_v6, 0.0 }
 0x3f2   :  { %v5252_v13 = vpop.f32.mrf.mxu0  ;;  %v5181_v49 = vpop.f32.mrf.mxu1  ;;  %v5463_v32 = vmax.f32 %v5445_v43, 0.0  ;;  %v5446_v14 = vadd.f32 %v7768_v61, %v5416_v7 }
 0x3f3   :  { %v5425_v24 = vadd.f32 %v5181_v49, %v7762_v37  ;;  %v5418_v21 = vadd.f32 %v5252_v13, %v4861_v29  ;;  %v7789_v22 = vadd.f32 %v5470_v16, %v7379_v26  ;;  %v5454_v37 = vadd.f32 %v7772_v62, %v5424_v2 }
 0x3f4   :  { %v5256_v15 = vpop.f32.mrf.mxu0  ;;  %v5327_v12 = vpop.f32.mrf.mxu1  ;;  %v5447_v50 = vadd.f32 %v7768_v61, %v5417_v5  ;;  %v7797_v34 = vadd.f32 %v5471_v56, %v7375_v19  ;;  %v7802_v17 = vadd.f32 %v5463_v32, %v7408_v41  ;;  %v5464_v1 = vmax.f32 %v5446_v14, 0.0 }
 0x3f5   :  { %v5426_v33 = vadd.f32 %v5256_v15, %v4865_v39  ;;  %v5419_v28 = vadd.f32 %v5327_v12, %v4936_v0  ;;  %v5455_v26 = vadd.f32 %v7772_v62, %v5425_v24  ;;  %v5448_v23 = vadd.f32 %v7768_v61, %v5418_v21 }
 0x3f6   :  { %v5258_v63 = vpop.f32.mrf.mxu0  ;;  %v5329_v60 = vpop.f32.mrf.mxu1  ;;  %v5472_v9 = vmax.f32 %v5454_v37, 0.0  ;;  %v5465_v6 = vmax.f32 %v5447_v50, 0.0  ;;  %v7813_v15 = vadd.f32 %v5464_v1, %v7403_v18  ;;  %v5507_v37 = vmax.f32 %v7797_v34, 0.0  ;;  %v8051_v50 = vld [vmem:[#allocation15_spill] sm:$0xff] }
 0x3f7   :  { %v5427_v27 = vadd.f32 %v5258_v63, %v4867_v25  ;;  %v5456_v59 = vadd.f32 %v7772_v62, %v5426_v33  ;;  %v5449_v31 = vadd.f32 %v7768_v61, %v5419_v28  ;;  %v5420_v38 = vadd.f32 %v5329_v60, %v4938_v30  ;;  %v8049_v28 = vld [vmem:[#allocation13_spill] sm:$0xff] }
 0x3f8   :  { %v6672_v10 = vpop.f32.mrf.mxu0  ;;  %v5333_v3 = vpop.f32.mrf.mxu1  ;;  %v5506_v25 = vmax.f32 %v7789_v22, 0.0  ;;  %v5473_v41 = vmax.f32 %v5455_v26, 0.0  ;;  %v5466_v29 = vmax.f32 %v5448_v23, 0.0  ;;  %v7816_v56 = vadd.f32 %v5465_v6, %v7426_v36 }
 0x3f9   :  { %v5457_v11 = vadd.f32 %v7772_v62, %v5427_v27  ;;  %v5428_v19 = vadd.f32 %v5333_v3, %v4942_v44  ;;  %v5450_v47 = vadd.f32 %v7768_v61, %v5420_v38  ;;  %v5430_v0 = vadd.f32 %v6672_v10, %v5018_v52 }
 0x3fa   :  { %v5335_v20 = vpop.f32.mrf.mxu1  ;;  %v5404_v51 = vpop.f32.mrf.mxu0  ;;  %v5474_v39 = vmax.f32 %v5456_v59, 0.0  ;;  %v5467_v30 = vmax.f32 %v5449_v31, 0.0  ;;  %v7820_v12 = vadd.f32 %v5472_v9, %v7398_v45  ;;  %v8046_v45 = vld [vmem:[#allocation11_spill] sm:$0xff]  ;;  %v8050_v60 = vmax.f32 %v8049_v28, 0.0 }
 0x3fb   :  { %v5458_v43 = vadd.f32 %v7772_v62, %v5428_v19  ;;  %v5429_v13 = vadd.f32 %v5335_v20, %v4944_v46  ;;  %v5460_v16 = vadd.f32 %v7772_v62, %v5430_v0  ;;  %v5421_v7 = vadd.f32 %v5404_v51, %v5013_v4 }
 0x3fc   :  { %v5475_v49 = vmax.f32 %v5457_v11, 0.0  ;;  %v5468_v2 = vmax.f32 %v5450_v47, 0.0  ;;  %v7823_v46 = vadd.f32 %v5466_v29, %v7419_v58  ;;  %v7832_v18 = vadd.f32 %v5474_v39, %v7414_v8  ;;  %v8047_v58 = vld [vmem:[#allocation14_spill] sm:$0xff] }
 0x3fd   :  { %v5476_v44 = vmax.f32 %v5458_v43, 0.0  ;;  %v5459_v5 = vadd.f32 %v7772_v62, %v5429_v13  ;;  %v5478_v24 = vmax.f32 %v5460_v16, 0.0  ;;  %v5451_v21 = vadd.f32 %v7768_v61, %v5421_v7  ;;  %v8045_v61 = vld [vmem:[#allocation12_spill] sm:$0xff] }
 0x3fe   :  { %v7829_v62 = vadd.f32 %v5473_v41, %v7395_v53  ;;  %v7836_v63 = vadd.f32 %v5467_v30, %v8045_v61  ;;  %v7839_v14 = vadd.f32 %v5475_v49, %v8046_v45  ;;  %v8048_v33 = vmax.f32 %v8047_v58, 0.0 }
 0x3ff   :  { %v7826_v52 = vadd.f32 %v5476_v44, %v7421_v35  ;;  %v5477_v4 = vmax.f32 %v5459_v5, 0.0  ;;  %v5496_v36 = vadd.f32 %v5478_v24, %v7529_v42  ;;  %v5469_v32 = vmax.f32 %v5451_v21, 0.0 }
 0x400   :  { %v7843_v35 = vadd.f32 %v5468_v2, %v8048_v33  ;;  %v5499_v8 = vmax.f32 %v7802_v17, 0.0  ;;  %v5500_v10 = vmax.f32 %v7813_v15, 0.0  ;;  %v5501_v26 = vmax.f32 %v7816_v56, 0.0 }
 0x401   :  { %v7847_v53 = vadd.f32 %v5477_v4, %v8050_v60  ;;  %v5514_v42 = vmax.f32 %v5496_v36, 0.0  ;;  %v5487_v27 = vadd.f32 %v5469_v32, %v8051_v50  ;;  %v8037_v23 = vmax.f32 %v7826_v52, 0.0 }
 0x402   :  { %v5508_v59 = vmax.f32 %v7820_v12, 0.0  ;;  %v5509_v31 = vmax.f32 %v7829_v62, 0.0  ;;  %v8036_v38 = vmax.f32 %v7823_v46, 0.0  ;;  %v5510_v1 = vmax.f32 %v7832_v18, 0.0 }
 0x403   :  { %v8034_v3 = vmax.f32 %v7847_v53, 0.0  ;;  %6674 = vmatpush3.msra.mxu1 %v5514_v42  ;;  %v8035_v11 = vmax.f32 %v7836_v63, 0.0  ;;  %v5511_v19 = vmax.f32 %v7839_v14, 0.0  ;;  %v8038_v20 = vmax.f32 %v7843_v35, 0.0 }
 0x404   :  { %v5518_v51 = vmul.f32 %v5514_v42, %v5506_v25  ;;  %v8052_v9 = vmov 0.0   ;;  %v5532_v6 = vmul.f32 %v5514_v42, %v5507_v37  ;;  %v5546_v47 = vmul.f32 %v5514_v42, %v5508_v59 }
 0x405   :  { %6675 = vmatprep.subr.mxu1 %v8052_v9  ;;  %v5560_v0 = vmul.f32 %v5514_v42, %v5509_v31  ;;  %v5505_v41 = vmax.f32 %v5487_v27, 0.0  ;;  %v5574_v29 = vmul.f32 %v5514_v42, %v5510_v1  ;;  %v5588_v43 = vmul.f32 %v5514_v42, %v5511_v19 }
 0x406   :  { %v5602_v13 = vmul.f32 %v5514_v42, %v8037_v23  ;;  %v5616_v39 = vmul.f32 %v5514_v42, %v8034_v3  ;;  %v6118_v22 = vsub.s32 7, %v7775_v55  ;;  %v8054_v18 = vmax.f32 %v7823_v46, 0.0  ;;  %v6124_v46 = vld [vmem:[%s8019_s11] sm:$0x3]  ;;  %s6727_s11 = scalar_lea.vmem %s6297_s25, 32 }
 0x407   :  { %v5517_v30 = vmul.f32 %v5505_v41, %v5497_v57  ;;  %v5531_v16 = vmul.f32 %v5505_v41, %v5498_v40  ;;  %v5545_v7 = vmul.f32 %v5505_v41, %v5499_v8  ;;  %v5559_v49 = vmul.f32 %v5505_v41, %v5500_v10  ;;  %6676 = vmatpush3.msra.mxu1 %v5505_v41  ;;  %p6729_p7 = scmp.lt.s32.totalorder %s6727_s11, %s6723_s26 }
 0x408   :  { %v5573_v2 = vmul.f32 %v5505_v41, %v5501_v26  ;;  %v5587_v44 = vmul.f32 %v5505_v41, %v8036_v38  ;;  %v5601_v5 = vmul.f32 %v5505_v41, %v8035_v11  ;;  %v5615_v24 = vmul.f32 %v5505_v41, %v8038_v20 }
 0x409   :  { %v5519_v21 = vadd.f32 %v5518_v51, %v5517_v30  ;;  %v5533_v4 = vadd.f32 %v5532_v6, %v5531_v16  ;;  %v5547_v36 = vadd.f32 %v5546_v47, %v5545_v7  ;;  %v5561_v32 = vadd.f32 %v5560_v0, %v5559_v49  ;;  %p6730_p8 = por %p6729_p7, %p6728_p6 }
 0x40a   :  { %v5575_v61 = vadd.f32 %v5574_v29, %v5573_v2  ;;  %v5589_v45 = vadd.f32 %v5588_v43, %v5587_v44  ;;  %v5603_v58 = vadd.f32 %v5602_v13, %v5601_v5  ;;  %v5617_v33 = vadd.f32 %v5616_v39, %v5615_v24 }
 0x40b   :  { %v5520_v28 = vrot.slane %v5519_v21, 4  ;;  %v5534_v60 = vrot.slane %v5533_v4, 4  ;;  %v5548_v42 = vrot.slane %v5547_v36, 4  ;;  %v5562_v50 = vrot.slane %v5561_v32, 4  ;;  %p6731_p9 = pnand %p6730_p8, %p6724_p5 }
 0x40c   :  { %v5576_v27 = vrot.slane %v5575_v61, 4  ;;  %v5590_v3 = vrot.slane %v5589_v45, 4  ;;  %v5604_v11 = vrot.slane %v5603_v58, 4  ;;  %v5618_v38 = vrot.slane %v5617_v33, 4 }
 0x40d   :  { %v5521_v23 = vadd.f32 %v5520_v28, %v5519_v21  ;;  %v5535_v41 = vadd.f32 %v5534_v60, %v5533_v4  ;;  %v5549_v51 = vadd.f32 %v5548_v42, %v5547_v36  ;;  %v5563_v30 = vadd.f32 %v5562_v50, %v5561_v32 }
 0x40e   :  { %v5577_v20 = vadd.f32 %v5576_v27, %v5575_v61  ;;  %v5591_v6 = vadd.f32 %v5590_v3, %v5589_v45  ;;  %v5605_v47 = vadd.f32 %v5604_v11, %v5603_v58  ;;  %v5619_v0 = vadd.f32 %v5618_v38, %v5617_v33 }
 0x40f   :  { %v5522_v29 = vrot.slane %v5521_v23, 2  ;;  %v5536_v43 = vrot.slane %v5535_v41, 2  ;;  %v5550_v13 = vrot.slane %v5549_v51, 2  ;;  %v5564_v39 = vrot.slane %v5563_v30, 2 }
 0x410   :  { %v5578_v16 = vrot.slane %v5577_v20, 2  ;;  %v5592_v7 = vrot.slane %v5591_v6, 2  ;;  %v5606_v49 = vrot.slane %v5605_v47, 2  ;;  %v5620_v3 = vrot.slane %v5619_v0, 2 }
 0x411   :  { %v5523_v2 = vadd.f32 %v5522_v29, %v5521_v23  ;;  %v5537_v44 = vadd.f32 %v5536_v43, %v5535_v41  ;;  %v5551_v5 = vadd.f32 %v5550_v13, %v5549_v51  ;;  %v5565_v24 = vadd.f32 %v5564_v39, %v5563_v30 }
 0x412   :  { %v5579_v21 = vadd.f32 %v5578_v16, %v5577_v20  ;;  %v5593_v4 = vadd.f32 %v5592_v7, %v5591_v6  ;;  %v6461_v61 = vsel %vm5526_vm2, 1.0, %v8052_v9  ;;  %v6462_v23 = vsel %vm5540_vm3, 1.0, %v8052_v9 }
 0x413   :  { %v5524_v11 = vrot.slane %v5523_v2, 1  ;;  %v5538_v38 = vrot.slane %v5537_v44, 1  ;;  %v5552_v36 = vrot.slane %v5551_v5, 1  ;;  %v5566_v32 = vrot.slane %v5565_v24, 1 }
 0x414   :  { %v5607_v45 = vadd.f32 %v5606_v49, %v5605_v47  ;;  %v5580_v28 = vrot.slane %v5579_v21, 1  ;;  %v6463_v60 = vsel %vm5554_vm4, 1.0, %v8052_v9  ;;  %v5621_v42 = vadd.f32 %v5620_v3, %v5619_v0 }
 0x415   :  { %v5525_v58 = vadd.f32 %v5524_v11, %v5523_v2  ;;  %v5539_v33 = vadd.f32 %v5538_v38, %v5537_v44  ;;  %v5553_v20 = vadd.f32 %v5552_v36, %v5551_v5  ;;  %v5567_v41 = vadd.f32 %v5566_v32, %v5565_v24 }
 0x416   :  { %v5594_v51 = vrot.slane %v5593_v4, 1  ;;  %v6464_v30 = vsel %vm5568_vm5, 1.0, %v8052_v9  ;;  %v5581_v29 = vadd.f32 %v5580_v28, %v5579_v21  ;;  %v5608_v43 = vrot.slane %v5607_v45, 1 }
 0x417   :  { %v5529_v50 = vmul.f32 %v6461_v61, %v5525_v58  ;;  %v5543_v27 = vmul.f32 %v6462_v23, %v5539_v33  ;;  %v5557_v47 = vmul.f32 %v6463_v60, %v5553_v20  ;;  %v6465_v13 = vsel %vm5582_vm6, 1.0, %v8052_v9 }
 0x418   :  { %v5571_v16 = vmul.f32 %v6464_v30, %v5567_v41  ;;  %v5595_v7 = vadd.f32 %v5594_v51, %v5593_v4  ;;  %v5622_v0 = vrot.slane %v5621_v42, 1  ;;  %v6466_v49 = vsel %vm5596_vm7, 1.0, %v8052_v9 }
 0x419   :  { %v5544_v6 = vadd.f32 %v5543_v27, %v5529_v50  ;;  %v5585_v44 = vmul.f32 %v6465_v13, %v5581_v29  ;;  %v5609_v5 = vadd.f32 %v5608_v43, %v5607_v45  ;;  %v6467_v24 = vsel %vm5610_vm8, 1.0, %v8052_v9 }
 0x41a   :  { %v5599_v21 = vmul.f32 %v6466_v49, %v5595_v7  ;;  %v5623_v11 = vadd.f32 %v5622_v0, %v5621_v42  ;;  %v6468_v38 = vsel %vm5624_vm9, 1.0, %v8052_v9  ;;  %v6775_v7 = vmov -0.5  }
 0x41b   :  { %v5558_v39 = vadd.f32 %v5557_v47, %v5544_v6  ;;  %v5613_v32 = vmul.f32 %v6467_v24, %v5609_v5  ;;  %v8055_v15 = vmax.f32 %v7847_v53, 0.0  ;;  %v8056_v14 = vmax.f32 %v7836_v63, 0.0 }
 0x41c   :  { %v5627_v23 = vmul.f32 %v6468_v38, %v5623_v11  ;;  %v8057_v56 = vmax.f32 %v7843_v35, 0.0 }
 0x41d   :  { %v5572_v2 = vadd.f32 %v5571_v16, %v5558_v39  ;;  %v6774_v39 = vmov -1.0  }
 0x41f   :  { %v5586_v3 = vadd.f32 %v5585_v44, %v5572_v2 }
 0x421   :  { %v5600_v36 = vadd.f32 %v5599_v21, %v5586_v3 }
 0x423   :  { %v5614_v61 = vadd.f32 %v5613_v32, %v5600_v36 }
 0x425   :  { %v5628_v4 = vadd.f32 %v5627_v23, %v5614_v61 }
 0x427   :  { %v5629_v58 = vrot.slane %v5628_v4, 4 }
 0x429   :  { %v5630_v33 = vmax.f32 %v5628_v4, %v5629_v58 }
 0x42b   :  { %v5631_v20 = vrot.slane %v5630_v33, 2 }
 0x42d   :  { %v5632_v28 = vmax.f32 %v5630_v33, %v5631_v20 }
 0x42f   :  { %v5633_v60 = vrot.slane %v5632_v28, 1 }
 0x431   :  { %v5634_v45 = vmax.f32 %v5632_v28, %v5633_v60 }
 0x433   :  { %v5635_v50 = vsub.f32 %v5628_v4, %v5634_v45 }
 0x435   :  { %v7918_v27 = vmul.f32 0.5, %v5635_v50 }
 0x437   :  { %v6469_v41 = vadd.f32 0.5, %v7918_v27 }
 0x439   :  { %v5638_v51 = vmax.f32 %v6469_v41, 0.0 }
 0x43b   :  { %v5639_v42 = vmul.f32 %v5638_v51, %v5638_v51 }
 0x43d   :  { %v5640_v30 = vrot.slane %v5639_v42, 4 }
 0x43f   :  { %v5641_v6 = vadd.f32 %v5640_v30, %v5639_v42 }
 0x441   :  { %v5642_v47 = vrot.slane %v5641_v6, 2 }
 0x443   :  { %v5643_v29 = vadd.f32 %v5642_v47, %v5641_v6 }
 0x445   :  { %v5644_v43 = vrot.slane %v5643_v29, 1 }
 0x447   :  { %v5645_v13 = vadd.f32 %v5644_v43, %v5643_v29 }
 0x449   :  { %vm5646_vm10 = vcmp.ge.f32.partialorder %v5645_v13, 1.0 }
 0x44a   :  { %v5647_v16 = vsel %vm5646_vm10, -0.5, %v6774_v39  ;;  %v5648_v0 = vsel %vm5646_vm10, 0.0, %v6775_v7 }
 0x44b   :  { %v5649_v49 = vadd.f32 %v5648_v0, %v5647_v16 }
 0x44d   :  { %v5650_v2 = vmul.f32 0.5, %v5649_v49 }
 0x44f   :  { %v5651_v44 = vsub.f32 %v7918_v27, %v5650_v2 }
 0x451   :  { %v5652_v5 = vmax.f32 %v5651_v44, 0.0 }
 0x453   :  { %v5653_v24 = vmul.f32 %v5652_v5, %v5652_v5 }
 0x455   :  { %v5654_v3 = vrot.slane %v5653_v24, 4 }
 0x457   :  { %v5655_v21 = vadd.f32 %v5654_v3, %v5653_v24 }
 0x459   :  { %v5656_v11 = vrot.slane %v5655_v21, 2 }
 0x45b   :  { %v5657_v38 = vadd.f32 %v5656_v11, %v5655_v21 }
 0x45d   :  { %v5658_v36 = vrot.slane %v5657_v38, 1 }
 0x45f   :  { %v5659_v32 = vadd.f32 %v5658_v36, %v5657_v38 }
 0x461   :  { %vm5660_vm11 = vcmp.ge.f32.partialorder %v5659_v32, 1.0 }
 0x462   :  { %v5661_v61 = vsel %vm5660_vm11, %v5650_v2, %v5647_v16  ;;  %v5662_v23 = vsel %vm5660_vm11, %v5648_v0, %v5650_v2 }
 0x463   :  { %v5663_v4 = vadd.f32 %v5662_v23, %v5661_v61 }
 0x465   :  { %v5664_v58 = vmul.f32 0.5, %v5663_v4 }
 0x467   :  { %v5665_v33 = vsub.f32 %v7918_v27, %v5664_v58 }
 0x469   :  { %v5666_v20 = vmax.f32 %v5665_v33, 0.0 }
 0x46b   :  { %v5667_v28 = vmul.f32 %v5666_v20, %v5666_v20 }
 0x46d   :  { %v5668_v60 = vrot.slane %v5667_v28, 4 }
 0x46f   :  { %v5669_v45 = vadd.f32 %v5668_v60, %v5667_v28 }
 0x471   :  { %v5670_v50 = vrot.slane %v5669_v45, 2 }
 0x473   :  { %v5671_v41 = vadd.f32 %v5670_v50, %v5669_v45 }
 0x475   :  { %v5672_v51 = vrot.slane %v5671_v41, 1 }
 0x477   :  { %v5673_v42 = vadd.f32 %v5672_v51, %v5671_v41 }
 0x479   :  { %vm5674_vm12 = vcmp.ge.f32.partialorder %v5673_v42, 1.0 }
 0x47a   :  { %v5675_v30 = vsel %vm5674_vm12, %v5664_v58, %v5661_v61  ;;  %v5676_v6 = vsel %vm5674_vm12, %v5662_v23, %v5664_v58 }
 0x47b   :  { %v5677_v47 = vadd.f32 %v5676_v6, %v5675_v30 }
 0x47d   :  { %v5678_v29 = vmul.f32 0.5, %v5677_v47 }
 0x47f   :  { %v5679_v43 = vsub.f32 %v7918_v27, %v5678_v29 }
 0x481   :  { %v5680_v13 = vmax.f32 %v5679_v43, 0.0 }
 0x483   :  { %v5681_v39 = vmul.f32 %v5680_v13, %v5680_v13 }
 0x485   :  { %v5682_v16 = vrot.slane %v5681_v39, 4 }
 0x487   :  { %v5683_v7 = vadd.f32 %v5682_v16, %v5681_v39 }
 0x489   :  { %v5684_v0 = vrot.slane %v5683_v7, 2 }
 0x48b   :  { %v5685_v49 = vadd.f32 %v5684_v0, %v5683_v7 }
 0x48d   :  { %v5686_v2 = vrot.slane %v5685_v49, 1 }
 0x48f   :  { %v5687_v44 = vadd.f32 %v5686_v2, %v5685_v49 }
 0x491   :  { %vm5688_vm13 = vcmp.ge.f32.partialorder %v5687_v44, 1.0 }
 0x492   :  { %v5689_v5 = vsel %vm5688_vm13, %v5678_v29, %v5675_v30  ;;  %v5690_v24 = vsel %vm5688_vm13, %v5676_v6, %v5678_v29 }
 0x493   :  { %v5691_v3 = vadd.f32 %v5690_v24, %v5689_v5 }
 0x495   :  { %v5692_v21 = vmul.f32 0.5, %v5691_v3 }
 0x497   :  { %v5693_v11 = vsub.f32 %v7918_v27, %v5692_v21 }
 0x499   :  { %v5694_v38 = vmax.f32 %v5693_v11, 0.0 }
 0x49b   :  { %v5695_v36 = vmul.f32 %v5694_v38, %v5694_v38 }
 0x49d   :  { %v5696_v32 = vrot.slane %v5695_v36, 4 }
 0x49f   :  { %v5697_v61 = vadd.f32 %v5696_v32, %v5695_v36 }
 0x4a1   :  { %v5698_v23 = vrot.slane %v5697_v61, 2 }
 0x4a3   :  { %v5699_v4 = vadd.f32 %v5698_v23, %v5697_v61 }
 0x4a5   :  { %v5700_v58 = vrot.slane %v5699_v4, 1 }
 0x4a7   :  { %v5701_v33 = vadd.f32 %v5700_v58, %v5699_v4 }
 0x4a9   :  { %vm5702_vm14 = vcmp.ge.f32.partialorder %v5701_v33, 1.0 }
 0x4aa   :  { %v5703_v20 = vsel %vm5702_vm14, %v5692_v21, %v5689_v5  ;;  %v5704_v28 = vsel %vm5702_vm14, %v5690_v24, %v5692_v21 }
 0x4ab   :  { %v5705_v60 = vadd.f32 %v5704_v28, %v5703_v20 }
 0x4ad   :  { %v5706_v45 = vmul.f32 0.5, %v5705_v60 }
 0x4af   :  { %v5707_v50 = vsub.f32 %v7918_v27, %v5706_v45 }
 0x4b1   :  { %v5708_v41 = vmax.f32 %v5707_v50, 0.0 }
 0x4b3   :  { %v5709_v51 = vmul.f32 %v5708_v41, %v5708_v41 }
 0x4b5   :  { %v5710_v42 = vrot.slane %v5709_v51, 4 }
 0x4b7   :  { %v5711_v30 = vadd.f32 %v5710_v42, %v5709_v51 }
 0x4b9   :  { %v5712_v6 = vrot.slane %v5711_v30, 2 }
 0x4bb   :  { %v5713_v47 = vadd.f32 %v5712_v6, %v5711_v30 }
 0x4bd   :  { %v5714_v29 = vrot.slane %v5713_v47, 1 }
 0x4bf   :  { %v5715_v43 = vadd.f32 %v5714_v29, %v5713_v47 }
 0x4c1   :  { %vm5716_vm15 = vcmp.ge.f32.partialorder %v5715_v43, 1.0 }
 0x4c2   :  { %v5717_v13 = vsel %vm5716_vm15, %v5706_v45, %v5703_v20  ;;  %v5718_v39 = vsel %vm5716_vm15, %v5704_v28, %v5706_v45 }
 0x4c3   :  { %v5719_v16 = vadd.f32 %v5718_v39, %v5717_v13 }
 0x4c5   :  { %v5720_v7 = vmul.f32 0.5, %v5719_v16 }
 0x4c7   :  { %v5721_v0 = vsub.f32 %v7918_v27, %v5720_v7 }
 0x4c9   :  { %v5722_v49 = vmax.f32 %v5721_v0, 0.0 }
 0x4cb   :  { %v5723_v2 = vmul.f32 %v5722_v49, %v5722_v49 }
 0x4cd   :  { %v5724_v44 = vrot.slane %v5723_v2, 4 }
 0x4cf   :  { %v5725_v5 = vadd.f32 %v5724_v44, %v5723_v2 }
 0x4d1   :  { %v5726_v24 = vrot.slane %v5725_v5, 2 }
 0x4d3   :  { %v5727_v3 = vadd.f32 %v5726_v24, %v5725_v5 }
 0x4d5   :  { %v5728_v21 = vrot.slane %v5727_v3, 1 }
 0x4d7   :  { %v5729_v11 = vadd.f32 %v5728_v21, %v5727_v3 }
 0x4d9   :  { %vm5730_vm0 = vcmp.ge.f32.partialorder %v5729_v11, 1.0 }
 0x4da   :  { %v5731_v38 = vsel %vm5730_vm0, %v5720_v7, %v5717_v13  ;;  %v5732_v36 = vsel %vm5730_vm0, %v5718_v39, %v5720_v7 }
 0x4db   :  { %v5733_v32 = vadd.f32 %v5732_v36, %v5731_v38 }
 0x4dd   :  { %v5734_v61 = vmul.f32 0.5, %v5733_v32 }
 0x4df   :  { %v5735_v23 = vsub.f32 %v7918_v27, %v5734_v61 }
 0x4e1   :  { %v5736_v4 = vmax.f32 %v5735_v23, 0.0 }
 0x4e3   :  { %v5737_v58 = vmul.f32 %v5736_v4, %v5736_v4 }
 0x4e5   :  { %v5738_v33 = vrot.slane %v5737_v58, 4 }
 0x4e7   :  { %v5739_v20 = vadd.f32 %v5738_v33, %v5737_v58 }
 0x4e9   :  { %v5740_v28 = vrot.slane %v5739_v20, 2 }
 0x4eb   :  { %v5741_v60 = vadd.f32 %v5740_v28, %v5739_v20 }
 0x4ed   :  { %v5742_v45 = vrot.slane %v5741_v60, 1 }
 0x4ef   :  { %v5743_v50 = vadd.f32 %v5742_v45, %v5741_v60 }
 0x4f1   :  { %vm5744_vm2 = vcmp.ge.f32.partialorder %v5743_v50, 1.0 }
 0x4f2   :  { %v5745_v41 = vsel %vm5744_vm2, %v5734_v61, %v5731_v38  ;;  %v5746_v51 = vsel %vm5744_vm2, %v5732_v36, %v5734_v61 }
 0x4f3   :  { %v5747_v42 = vadd.f32 %v5746_v51, %v5745_v41 }
 0x4f5   :  { %v5748_v30 = vmul.f32 0.5, %v5747_v42 }
 0x4f7   :  { %v5749_v6 = vsub.f32 %v7918_v27, %v5748_v30 }
 0x4f9   :  { %v5750_v47 = vmax.f32 %v5749_v6, 0.0 }
 0x4fb   :  { %v5751_v29 = vmul.f32 %v5750_v47, %v5750_v47 }
 0x4fd   :  { %v5752_v43 = vrot.slane %v5751_v29, 4 }
 0x4ff   :  { %v5753_v13 = vadd.f32 %v5752_v43, %v5751_v29 }
 0x501   :  { %v5754_v39 = vrot.slane %v5753_v13, 2 }
 0x503   :  { %v5755_v16 = vadd.f32 %v5754_v39, %v5753_v13 }
 0x505   :  { %v5756_v7 = vrot.slane %v5755_v16, 1 }
 0x507   :  { %v5757_v0 = vadd.f32 %v5756_v7, %v5755_v16 }
 0x509   :  { %vm5758_vm3 = vcmp.ge.f32.partialorder %v5757_v0, 1.0 }
 0x50a   :  { %v5759_v49 = vsel %vm5758_vm3, %v5748_v30, %v5745_v41  ;;  %v5760_v2 = vsel %vm5758_vm3, %v5746_v51, %v5748_v30 }
 0x50b   :  { %v5761_v44 = vadd.f32 %v5760_v2, %v5759_v49 }
 0x50d   :  { %v5762_v5 = vmul.f32 0.5, %v5761_v44 }
 0x50f   :  { %v5763_v24 = vsub.f32 %v7918_v27, %v5762_v5 }
 0x511   :  { %v5764_v3 = vmax.f32 %v5763_v24, 0.0 }
 0x513   :  { %v5765_v21 = vmul.f32 %v5764_v3, %v5764_v3 }
 0x515   :  { %v5766_v11 = vrot.slane %v5765_v21, 4 }
 0x517   :  { %v5767_v38 = vadd.f32 %v5766_v11, %v5765_v21 }
 0x519   :  { %v5768_v36 = vrot.slane %v5767_v38, 2 }
 0x51b   :  { %v5769_v32 = vadd.f32 %v5768_v36, %v5767_v38 }
 0x51d   :  { %v5770_v61 = vrot.slane %v5769_v32, 1 }
 0x51f   :  { %v5771_v23 = vadd.f32 %v5770_v61, %v5769_v32 }
 0x521   :  { %vm5772_vm4 = vcmp.ge.f32.partialorder %v5771_v23, 1.0 }
 0x522   :  { %v5773_v4 = vsel %vm5772_vm4, %v5762_v5, %v5759_v49  ;;  %v5774_v58 = vsel %vm5772_vm4, %v5760_v2, %v5762_v5 }
 0x523   :  { %v5775_v33 = vadd.f32 %v5774_v58, %v5773_v4 }
 0x525   :  { %v5776_v20 = vmul.f32 0.5, %v5775_v33 }
 0x527   :  { %v5777_v28 = vsub.f32 %v7918_v27, %v5776_v20 }
 0x529   :  { %v5778_v60 = vmax.f32 %v5777_v28, 0.0 }
 0x52b   :  { %v5779_v45 = vmul.f32 %v5778_v60, %v5778_v60 }
 0x52d   :  { %v5780_v50 = vrot.slane %v5779_v45, 4 }
 0x52f   :  { %v5781_v41 = vadd.f32 %v5780_v50, %v5779_v45 }
 0x531   :  { %v5782_v51 = vrot.slane %v5781_v41, 2 }
 0x533   :  { %v5783_v42 = vadd.f32 %v5782_v51, %v5781_v41 }
 0x535   :  { %v5784_v30 = vrot.slane %v5783_v42, 1 }
 0x537   :  { %v5785_v6 = vadd.f32 %v5784_v30, %v5783_v42 }
 0x539   :  { %vm5786_vm5 = vcmp.ge.f32.partialorder %v5785_v6, 1.0 }
 0x53a   :  { %v5787_v47 = vsel %vm5786_vm5, %v5776_v20, %v5773_v4  ;;  %v5788_v29 = vsel %vm5786_vm5, %v5774_v58, %v5776_v20  ;;  %vm6776_vm5 = vmmov 0  }
 0x53b   :  { %v5789_v43 = vadd.f32 %v5788_v29, %v5787_v47  ;;  %6677 = vmatprep.mubr.msk.f32.mxu1 %vm6776_vm5, %v8052_v9  ;;  %6684 = vmatprep.mubr.msk.f32.mxu0 %vm6776_vm5, %v8052_v9 }
 0x53d   :  { %v5790_v13 = vmul.f32 0.5, %v5789_v43 }
 0x53f   :  { %v5791_v39 = vsub.f32 %v7918_v27, %v5790_v13 }
 0x541   :  { %v5792_v16 = vmax.f32 %v5791_v39, 0.0 }
 0x543   :  { %v5793_v7 = vmul.f32 %v5792_v16, %v5792_v16 }
 0x545   :  { %v5794_v0 = vrot.slane %v5793_v7, 4 }
 0x547   :  { %v5795_v49 = vadd.f32 %v5794_v0, %v5793_v7 }
 0x549   :  { %v5796_v2 = vrot.slane %v5795_v49, 2 }
 0x54b   :  { %v5797_v44 = vadd.f32 %v5796_v2, %v5795_v49 }
 0x54d   :  { %v5798_v5 = vrot.slane %v5797_v44, 1 }
 0x54f   :  { %v5799_v24 = vadd.f32 %v5798_v5, %v5797_v44 }
 0x551   :  { %vm5800_vm6 = vcmp.ge.f32.partialorder %v5799_v24, 1.0 }
 0x552   :  { %v5801_v3 = vsel %vm5800_vm6, %v5790_v13, %v5787_v47  ;;  %v5802_v21 = vsel %vm5800_vm6, %v5788_v29, %v5790_v13 }
 0x553   :  { %v5803_v11 = vadd.f32 %v5802_v21, %v5801_v3 }
 0x555   :  { %v5804_v38 = vmul.f32 0.5, %v5803_v11 }
 0x557   :  { %v5805_v36 = vsub.f32 %v7918_v27, %v5804_v38 }
 0x559   :  { %v5806_v32 = vmax.f32 %v5805_v36, 0.0 }
 0x55b   :  { %v5807_v61 = vmul.f32 %v5806_v32, %v5806_v32 }
 0x55d   :  { %v5808_v23 = vrot.slane %v5807_v61, 4 }
 0x55f   :  { %v5809_v4 = vadd.f32 %v5808_v23, %v5807_v61 }
 0x561   :  { %v5810_v58 = vrot.slane %v5809_v4, 2 }
 0x563   :  { %v5811_v33 = vadd.f32 %v5810_v58, %v5809_v4 }
 0x565   :  { %v5812_v20 = vrot.slane %v5811_v33, 1 }
 0x567   :  { %v5813_v28 = vadd.f32 %v5812_v20, %v5811_v33 }
 0x569   :  { %vm5814_vm7 = vcmp.ge.f32.partialorder %v5813_v28, 1.0 }
 0x56a   :  { %v5815_v60 = vsel %vm5814_vm7, %v5804_v38, %v5801_v3  ;;  %v5816_v45 = vsel %vm5814_vm7, %v5802_v21, %v5804_v38 }
 0x56b   :  { %v5817_v50 = vadd.f32 %v5816_v45, %v5815_v60 }
 0x56d   :  { %v5818_v41 = vmul.f32 0.5, %v5817_v50 }
 0x56f   :  { %v5819_v51 = vsub.f32 %v7918_v27, %v5818_v41 }
 0x571   :  { %v5820_v42 = vmax.f32 %v5819_v51, 0.0 }
 0x573   :  { %v5821_v30 = vmul.f32 %v5820_v42, %v5820_v42 }
 0x575   :  { %v5822_v6 = vrot.slane %v5821_v30, 4 }
 0x577   :  { %v5823_v47 = vadd.f32 %v5822_v6, %v5821_v30 }
 0x579   :  { %v5824_v29 = vrot.slane %v5823_v47, 2 }
 0x57b   :  { %v5825_v43 = vadd.f32 %v5824_v29, %v5823_v47 }
 0x57d   :  { %v5826_v13 = vrot.slane %v5825_v43, 1 }
 0x57f   :  { %v5827_v39 = vadd.f32 %v5826_v13, %v5825_v43 }
 0x581   :  { %vm5828_vm8 = vcmp.ge.f32.partialorder %v5827_v39, 1.0 }
 0x582   :  { %v5829_v16 = vsel %vm5828_vm8, %v5818_v41, %v5815_v60  ;;  %v5830_v7 = vsel %vm5828_vm8, %v5816_v45, %v5818_v41 }
 0x583   :  { %v5831_v0 = vadd.f32 %v5830_v7, %v5829_v16 }
 0x585   :  { %v5832_v49 = vmul.f32 0.5, %v5831_v0 }
 0x587   :  { %v5833_v2 = vsub.f32 %v7918_v27, %v5832_v49 }
 0x589   :  { %v5834_v44 = vmax.f32 %v5833_v2, 0.0 }
 0x58b   :  { %v5835_v5 = vmul.f32 %v5834_v44, %v5834_v44 }
 0x58d   :  { %v5836_v24 = vrot.slane %v5835_v5, 4 }
 0x58f   :  { %v5837_v3 = vadd.f32 %v5836_v24, %v5835_v5 }
 0x591   :  { %v5838_v21 = vrot.slane %v5837_v3, 2 }
 0x593   :  { %v5839_v11 = vadd.f32 %v5838_v21, %v5837_v3 }
 0x595   :  { %v5840_v38 = vrot.slane %v5839_v11, 1 }
 0x597   :  { %v5841_v36 = vadd.f32 %v5840_v38, %v5839_v11 }
 0x599   :  { %vm5842_vm9 = vcmp.ge.f32.partialorder %v5841_v36, 1.0 }
 0x59a   :  { %v5843_v32 = vsel %vm5842_vm9, %v5832_v49, %v5829_v16  ;;  %v5844_v61 = vsel %vm5842_vm9, %v5830_v7, %v5832_v49 }
 0x59b   :  { %v5845_v23 = vadd.f32 %v5844_v61, %v5843_v32 }
 0x59d   :  { %v5846_v4 = vmul.f32 0.5, %v5845_v23 }
 0x59f   :  { %v5847_v58 = vsub.f32 %v7918_v27, %v5846_v4 }
 0x5a1   :  { %v5848_v33 = vmax.f32 %v5847_v58, 0.0 }
 0x5a3   :  { %v5849_v20 = vmul.f32 %v5848_v33, %v5848_v33 }
 0x5a5   :  { %v5850_v28 = vrot.slane %v5849_v20, 4 }
 0x5a7   :  { %v5851_v60 = vadd.f32 %v5850_v28, %v5849_v20 }
 0x5a9   :  { %v5852_v45 = vrot.slane %v5851_v60, 2 }
 0x5ab   :  { %v5853_v50 = vadd.f32 %v5852_v45, %v5851_v60 }
 0x5ad   :  { %v5854_v41 = vrot.slane %v5853_v50, 1 }
 0x5af   :  { %v5855_v51 = vadd.f32 %v5854_v41, %v5853_v50 }
 0x5b1   :  { %vm5856_vm10 = vcmp.ge.f32.partialorder %v5855_v51, 1.0 }
 0x5b2   :  { %v5857_v42 = vsel %vm5856_vm10, %v5846_v4, %v5843_v32  ;;  %v5858_v30 = vsel %vm5856_vm10, %v5844_v61, %v5846_v4 }
 0x5b3   :  { %v5859_v6 = vadd.f32 %v5858_v30, %v5857_v42 }
 0x5b5   :  { %v5860_v47 = vmul.f32 0.5, %v5859_v6 }
 0x5b7   :  { %v5861_v29 = vsub.f32 %v7918_v27, %v5860_v47 }
 0x5b9   :  { %v5862_v43 = vmax.f32 %v5861_v29, 0.0 }
 0x5bb   :  { %v5863_v13 = vmul.f32 %v5862_v43, %v5862_v43 }
 0x5bd   :  { %v5864_v39 = vrot.slane %v5863_v13, 4 }
 0x5bf   :  { %v5865_v16 = vadd.f32 %v5864_v39, %v5863_v13 }
 0x5c1   :  { %v5866_v7 = vrot.slane %v5865_v16, 2 }
 0x5c3   :  { %v5867_v0 = vadd.f32 %v5866_v7, %v5865_v16 }
 0x5c5   :  { %v5868_v49 = vrot.slane %v5867_v0, 1 }
 0x5c7   :  { %v5869_v2 = vadd.f32 %v5868_v49, %v5867_v0 }
 0x5c9   :  { %vm5870_vm11 = vcmp.ge.f32.partialorder %v5869_v2, 1.0 }
 0x5ca   :  { %v5871_v44 = vsel %vm5870_vm11, %v5860_v47, %v5857_v42  ;;  %v5872_v5 = vsel %vm5870_vm11, %v5858_v30, %v5860_v47 }
 0x5cb   :  { %v5873_v24 = vadd.f32 %v5872_v5, %v5871_v44 }
 0x5cd   :  { %v5874_v3 = vmul.f32 0.5, %v5873_v24 }
 0x5cf   :  { %v5875_v21 = vsub.f32 %v7918_v27, %v5874_v3 }
 0x5d1   :  { %v5876_v11 = vmax.f32 %v5875_v21, 0.0 }
 0x5d3   :  { %v5877_v38 = vmul.f32 %v5876_v11, %v5876_v11 }
 0x5d5   :  { %v5878_v36 = vrot.slane %v5877_v38, 4 }
 0x5d7   :  { %v5879_v32 = vadd.f32 %v5878_v36, %v5877_v38 }
 0x5d9   :  { %v5880_v61 = vrot.slane %v5879_v32, 2 }
 0x5db   :  { %v5881_v23 = vadd.f32 %v5880_v61, %v5879_v32 }
 0x5dd   :  { %v5882_v4 = vrot.slane %v5881_v23, 1 }
 0x5df   :  { %v5883_v58 = vadd.f32 %v5882_v4, %v5881_v23 }
 0x5e1   :  { %vm5884_vm12 = vcmp.ge.f32.partialorder %v5883_v58, 1.0 }
 0x5e2   :  { %v5885_v33 = vsel %vm5884_vm12, %v5874_v3, %v5871_v44  ;;  %v5886_v20 = vsel %vm5884_vm12, %v5872_v5, %v5874_v3 }
 0x5e3   :  { %v5887_v28 = vadd.f32 %v5886_v20, %v5885_v33 }
 0x5e5   :  { %v5888_v60 = vmul.f32 0.5, %v5887_v28 }
 0x5e7   :  { %v5889_v45 = vsub.f32 %v7918_v27, %v5888_v60 }
 0x5e9   :  { %v5890_v50 = vmax.f32 %v5889_v45, 0.0 }
 0x5eb   :  { %v5891_v41 = vmul.f32 %v5890_v50, %v5890_v50 }
 0x5ed   :  { %v5892_v51 = vrot.slane %v5891_v41, 4 }
 0x5ef   :  { %v5893_v42 = vadd.f32 %v5892_v51, %v5891_v41 }
 0x5f1   :  { %v5894_v30 = vrot.slane %v5893_v42, 2 }
 0x5f3   :  { %v5895_v6 = vadd.f32 %v5894_v30, %v5893_v42 }
 0x5f5   :  { %v5896_v47 = vrot.slane %v5895_v6, 1 }
 0x5f7   :  { %v5897_v29 = vadd.f32 %v5896_v47, %v5895_v6 }
 0x5f9   :  { %vm5898_vm13 = vcmp.ge.f32.partialorder %v5897_v29, 1.0 }
 0x5fa   :  { %v5899_v43 = vsel %vm5898_vm13, %v5888_v60, %v5885_v33  ;;  %v5900_v13 = vsel %vm5898_vm13, %v5886_v20, %v5888_v60 }
 0x5fb   :  { %v5901_v39 = vadd.f32 %v5900_v13, %v5899_v43 }
 0x5fd   :  { %v5902_v16 = vmul.f32 0.5, %v5901_v39 }
 0x5ff   :  { %v5903_v7 = vsub.f32 %v7918_v27, %v5902_v16 }
 0x601   :  { %v5904_v0 = vmax.f32 %v5903_v7, 0.0 }
 0x603   :  { %v5905_v49 = vmul.f32 %v5904_v0, %v5904_v0 }
 0x605   :  { %v5906_v2 = vrot.slane %v5905_v49, 4 }
 0x607   :  { %v5907_v44 = vadd.f32 %v5906_v2, %v5905_v49 }
 0x609   :  { %v5908_v5 = vrot.slane %v5907_v44, 2 }
 0x60b   :  { %v5909_v24 = vadd.f32 %v5908_v5, %v5907_v44 }
 0x60d   :  { %v5910_v3 = vrot.slane %v5909_v24, 1 }
 0x60f   :  { %v5911_v21 = vadd.f32 %v5910_v3, %v5909_v24 }
 0x611   :  { %vm5912_vm14 = vcmp.ge.f32.partialorder %v5911_v21, 1.0 }
 0x612   :  { %v5913_v11 = vsel %vm5912_vm14, %v5902_v16, %v5899_v43  ;;  %v5914_v38 = vsel %vm5912_vm14, %v5900_v13, %v5902_v16 }
 0x613   :  { %v5915_v36 = vadd.f32 %v5914_v38, %v5913_v11 }
 0x615   :  { %v5916_v32 = vmul.f32 0.5, %v5915_v36 }
 0x617   :  { %v5917_v61 = vsub.f32 %v7918_v27, %v5916_v32 }
 0x619   :  { %v5918_v23 = vmax.f32 %v5917_v61, 0.0 }
 0x61b   :  { %v5919_v4 = vmul.f32 %v5918_v23, %v5918_v23 }
 0x61d   :  { %v5920_v58 = vrot.slane %v5919_v4, 4 }
 0x61f   :  { %v5921_v33 = vadd.f32 %v5920_v58, %v5919_v4 }
 0x621   :  { %v5922_v20 = vrot.slane %v5921_v33, 2 }
 0x623   :  { %v5923_v28 = vadd.f32 %v5922_v20, %v5921_v33 }
 0x625   :  { %v5924_v60 = vrot.slane %v5923_v28, 1 }
 0x627   :  { %v5925_v45 = vadd.f32 %v5924_v60, %v5923_v28 }
 0x629   :  { %vm5926_vm15 = vcmp.ge.f32.partialorder %v5925_v45, 1.0 }
 0x62a   :  { %v5927_v50 = vsel %vm5926_vm15, %v5916_v32, %v5913_v11  ;;  %v5928_v41 = vsel %vm5926_vm15, %v5914_v38, %v5916_v32 }
 0x62b   :  { %v5929_v51 = vadd.f32 %v5928_v41, %v5927_v50 }
 0x62d   :  { %v5930_v42 = vmul.f32 0.5, %v5929_v51 }
 0x62f   :  { %v5931_v30 = vsub.f32 %v7918_v27, %v5930_v42 }
 0x631   :  { %v5932_v6 = vmax.f32 %v5931_v30, 0.0 }
 0x633   :  { %v5933_v47 = vmul.f32 %v5932_v6, %v5932_v6 }
 0x635   :  { %v5934_v29 = vrot.slane %v5933_v47, 4 }
 0x637   :  { %v5935_v43 = vadd.f32 %v5934_v29, %v5933_v47 }
 0x639   :  { %v5936_v13 = vrot.slane %v5935_v43, 2 }
 0x63b   :  { %v5937_v39 = vadd.f32 %v5936_v13, %v5935_v43 }
 0x63d   :  { %v5938_v16 = vrot.slane %v5937_v39, 1 }
 0x63f   :  { %v5939_v7 = vadd.f32 %v5938_v16, %v5937_v39 }
 0x641   :  { %vm5940_vm0 = vcmp.ge.f32.partialorder %v5939_v7, 1.0 }
 0x642   :  { %v5941_v0 = vsel %vm5940_vm0, %v5930_v42, %v5927_v50  ;;  %v5942_v49 = vsel %vm5940_vm0, %v5928_v41, %v5930_v42 }
 0x643   :  { %v5943_v2 = vadd.f32 %v5942_v49, %v5941_v0 }
 0x645   :  { %v5944_v44 = vmul.f32 0.5, %v5943_v2 }
 0x647   :  { %v5945_v5 = vsub.f32 %v7918_v27, %v5944_v44 }
 0x649   :  { %v5946_v24 = vmax.f32 %v5945_v5, 0.0 }
 0x64b   :  { %v5947_v3 = vmul.f32 %v5946_v24, %v5946_v24 }
 0x64d   :  { %v5948_v21 = vrot.slane %v5947_v3, 4 }
 0x64f   :  { %v5949_v11 = vadd.f32 %v5948_v21, %v5947_v3 }
 0x651   :  { %v5950_v38 = vrot.slane %v5949_v11, 2 }
 0x653   :  { %v5951_v36 = vadd.f32 %v5950_v38, %v5949_v11 }
 0x655   :  { %v5952_v32 = vrot.slane %v5951_v36, 1 }
 0x657   :  { %v5953_v61 = vadd.f32 %v5952_v32, %v5951_v36 }
 0x659   :  { %vm5954_vm2 = vcmp.ge.f32.partialorder %v5953_v61, 1.0 }
 0x65a   :  { %v5955_v23 = vsel %vm5954_vm2, %v5944_v44, %v5941_v0  ;;  %v5956_v4 = vsel %vm5954_vm2, %v5942_v49, %v5944_v44 }
 0x65b   :  { %v5957_v58 = vadd.f32 %v5956_v4, %v5955_v23 }
 0x65d   :  { %v5958_v33 = vmul.f32 0.5, %v5957_v58 }
 0x65f   :  { %v5959_v20 = vsub.f32 %v7918_v27, %v5958_v33 }
 0x661   :  { %v5960_v28 = vmax.f32 %v5959_v20, 0.0 }
 0x663   :  { %v5961_v60 = vmul.f32 %v5960_v28, %v5960_v28  ;;  %v6125_v28 = vld [vmem:[%s8020_s12] sm:$0x3] }
 0x664   :  { %6678 = vmatmul.mubr.msk.f32.vlgmr.msra.gmra.mxu1 %vm1321_vm1, %v6125_v28 }
 0x665   :  { %v5962_v45 = vrot.slane %v5961_v60, 4 }
 0x667   :  { %v5963_v50 = vadd.f32 %v5962_v45, %v5961_v60 }
 0x669   :  { %v5964_v41 = vrot.slane %v5963_v50, 2 }
 0x66b   :  { %v5965_v51 = vadd.f32 %v5964_v41, %v5963_v50 }
 0x66d   :  { %v5966_v42 = vrot.slane %v5965_v51, 1 }
 0x66f   :  { %v5967_v30 = vadd.f32 %v5966_v42, %v5965_v51 }
 0x671   :  { %vm5968_vm3 = vcmp.ge.f32.partialorder %v5967_v30, 1.0 }
 0x672   :  { %v5969_v6 = vsel %vm5968_vm3, %v5958_v33, %v5955_v23  ;;  %v5970_v47 = vsel %vm5968_vm3, %v5956_v4, %v5958_v33 }
 0x673   :  { %v5971_v29 = vadd.f32 %v5970_v47, %v5969_v6 }
 0x675   :  { %v5972_v43 = vmul.f32 0.5, %v5971_v29 }
 0x677   :  { %v5973_v13 = vsub.f32 %v7918_v27, %v5972_v43 }
 0x679   :  { %v5974_v39 = vmax.f32 %v5973_v13, 0.0 }
 0x67b   :  { %v5975_v16 = vmul.f32 %v5974_v39, %v5974_v39 }
 0x67d   :  { %v5976_v7 = vrot.slane %v5975_v16, 4 }
 0x67f   :  { %v5977_v0 = vadd.f32 %v5976_v7, %v5975_v16 }
 0x681   :  { %v5978_v49 = vrot.slane %v5977_v0, 2 }
 0x683   :  { %v5979_v2 = vadd.f32 %v5978_v49, %v5977_v0 }
 0x685   :  { %v5980_v44 = vrot.slane %v5979_v2, 1 }
 0x687   :  { %v5981_v5 = vadd.f32 %v5980_v44, %v5979_v2 }
 0x689   :  { %vm5982_vm4 = vcmp.ge.f32.partialorder %v5981_v5, 1.0 }
 0x68a   :  { %v5983_v24 = vsel %vm5982_vm4, %v5972_v43, %v5969_v6  ;;  %v5984_v3 = vsel %vm5982_vm4, %v5970_v47, %v5972_v43 }
 0x68b   :  { %v5985_v21 = vadd.f32 %v5984_v3, %v5983_v24 }
 0x68d   :  { %v5986_v11 = vmul.f32 0.5, %v5985_v21 }
 0x68f   :  { %v5987_v38 = vsub.f32 %v7918_v27, %v5986_v11 }
 0x691   :  { %v5988_v36 = vmax.f32 %v5987_v38, 0.0 }
 0x693   :  { %v5989_v32 = vmul.f32 %v5988_v36, %v5988_v36 }
 0x695   :  { %v5990_v61 = vrot.slane %v5989_v32, 4 }
 0x697   :  { %v5991_v23 = vadd.f32 %v5990_v61, %v5989_v32 }
 0x699   :  { %v5992_v4 = vrot.slane %v5991_v23, 2 }
 0x69b   :  { %v5993_v58 = vadd.f32 %v5992_v4, %v5991_v23 }
 0x69d   :  { %v5994_v33 = vrot.slane %v5993_v58, 1 }
 0x69f   :  { %v5995_v20 = vadd.f32 %v5994_v33, %v5993_v58 }
 0x6a1   :  { %vm5996_vm6 = vcmp.ge.f32.partialorder %v5995_v20, 1.0 }
 0x6a2   :  { %v5997_v60 = vsel %vm5996_vm6, %v5986_v11, %v5983_v24  ;;  %v5998_v45 = vsel %vm5996_vm6, %v5984_v3, %v5986_v11 }
 0x6a3   :  { %v5999_v50 = vadd.f32 %v5998_v45, %v5997_v60 }
 0x6a5   :  { %v6000_v41 = vmul.f32 0.5, %v5999_v50 }
 0x6a7   :  { %v6001_v51 = vsub.f32 %v7918_v27, %v6000_v41 }
 0x6a9   :  { %v6002_v42 = vmax.f32 %v6001_v51, 0.0 }
 0x6ab   :  { %v6003_v30 = vmul.f32 %v6002_v42, %v6002_v42 }
 0x6ad   :  { %v6004_v6 = vrot.slane %v6003_v30, 4 }
 0x6af   :  { %v6005_v47 = vadd.f32 %v6004_v6, %v6003_v30 }
 0x6b1   :  { %v6006_v29 = vrot.slane %v6005_v47, 2 }
 0x6b3   :  { %v6007_v43 = vadd.f32 %v6006_v29, %v6005_v47 }
 0x6b5   :  { %v6008_v13 = vrot.slane %v6007_v43, 1 }
 0x6b7   :  { %v6009_v39 = vadd.f32 %v6008_v13, %v6007_v43 }
 0x6b9   :  { %vm6010_vm7 = vcmp.ge.f32.partialorder %v6009_v39, 1.0 }
 0x6ba   :  { %v6011_v16 = vsel %vm6010_vm7, %v6000_v41, %v5997_v60  ;;  %v6012_v7 = vsel %vm6010_vm7, %v5998_v45, %v6000_v41 }
 0x6bb   :  { %v6013_v0 = vadd.f32 %v6012_v7, %v6011_v16 }
 0x6bd   :  { %v6014_v49 = vmul.f32 0.5, %v6013_v0 }
 0x6bf   :  { %v6015_v2 = vsub.f32 %v7918_v27, %v6014_v49 }
 0x6c1   :  { %v6016_v44 = vmax.f32 %v6015_v2, 0.0 }
 0x6c3   :  { %v6017_v5 = vmul.f32 %v6016_v44, %v6016_v44 }
 0x6c5   :  { %v6018_v24 = vrot.slane %v6017_v5, 4 }
 0x6c7   :  { %v6019_v3 = vadd.f32 %v6018_v24, %v6017_v5 }
 0x6c9   :  { %v6020_v21 = vrot.slane %v6019_v3, 2 }
 0x6cb   :  { %v6021_v11 = vadd.f32 %v6020_v21, %v6019_v3 }
 0x6cd   :  { %v6022_v38 = vrot.slane %v6021_v11, 1 }
 0x6cf   :  { %v6023_v36 = vadd.f32 %v6022_v38, %v6021_v11  ;;  %v6062_v38 = vsub.s32 0, %v7775_v55 }
 0x6d1   :  { %vm6024_vm8 = vcmp.ge.f32.partialorder %v6023_v36, 1.0  ;;  %v6070_v36 = vsub.s32 1, %v7775_v55 }
 0x6d2   :  { %v6025_v32 = vsel %vm6024_vm8, %v6014_v49, %v6011_v16  ;;  %v6026_v61 = vsel %vm6024_vm8, %v6012_v7, %v6014_v49 }
 0x6d3   :  { %v6027_v23 = vadd.f32 %v6026_v61, %v6025_v32 }
 0x6d5   :  { %v6028_v4 = vmul.f32 0.5, %v6027_v23  ;;  %v6086_v23 = vsub.s32 3, %v7775_v55 }
 0x6d7   :  { %v6029_v58 = vsub.f32 %v7918_v27, %v6028_v4 }
 0x6d9   :  { %v6030_v33 = vmax.f32 %v6029_v58, 0.0 }
 0x6db   :  { %v6031_v20 = vmul.f32 %v6030_v33, %v6030_v33 }
 0x6dd   :  { %v6032_v28 = vrot.slane %v6031_v20, 4 }
 0x6df   :  { %v6033_v60 = vadd.f32 %v6032_v28, %v6031_v20  ;;  %v6102_v28 = vsub.s32 5, %v7775_v55 }
 0x6e1   :  { %v6034_v45 = vrot.slane %v6033_v60, 2 }
 0x6e3   :  { %v6035_v50 = vadd.f32 %v6034_v45, %v6033_v60 }
 0x6e5   :  { %v6036_v41 = vrot.slane %v6035_v50, 1 }
 0x6e7   :  { %v6037_v51 = vadd.f32 %v6036_v41, %v6035_v50  ;;  %v6110_v41 = vsub.s32 6, %v7775_v55 }
 0x6e9   :  { %vm6038_vm9 = vcmp.ge.f32.partialorder %v6037_v51, 1.0 }
 0x6ea   :  { %v6039_v42 = vsel %vm6038_vm9, %v6028_v4, %v6025_v32  ;;  %v6040_v30 = vsel %vm6038_vm9, %v6026_v61, %v6028_v4  ;;  %v6078_v32 = vsub.s32 2, %v7775_v55  ;;  %v6094_v4 = vsub.s32 4, %v7775_v55 }
 0x6eb   :  { %v6041_v6 = vadd.f32 %v6040_v30, %v6039_v42 }
 0x6ed   :  { %v6042_v47 = vmul.f32 0.5, %v6041_v6 }
 0x6ef   :  { %v6043_v29 = vsub.f32 %v7918_v27, %v6042_v47 }
 0x6f1   :  { %v6044_v43 = vmax.f32 %v6043_v29, 0.0 }
 0x6f3   :  { %v6045_v13 = vmul.f32 %v6044_v43, %v6044_v43 }
 0x6f5   :  { %v6046_v39 = vrot.slane %v6045_v13, 4 }
 0x6f7   :  { %v6047_v16 = vadd.f32 %v6046_v39, %v6045_v13 }
 0x6f9   :  { %v6048_v7 = vrot.slane %v6047_v16, 2 }
 0x6fb   :  { %v6049_v0 = vadd.f32 %v6048_v7, %v6047_v16 }
 0x6fd   :  { %v6050_v49 = vrot.slane %v6049_v0, 1 }
 0x6ff   :  { %v6051_v2 = vadd.f32 %v6050_v49, %v6049_v0 }
 0x701   :  { %vm6052_vm10 = vcmp.ge.f32.partialorder %v6051_v2, 1.0 }
 0x702   :  { %v6053_v44 = vsel %vm6052_vm10, %v6042_v47, %v6039_v42  ;;  %v6054_v5 = vsel %vm6052_vm10, %v6040_v30, %v6042_v47 }
 0x703   :  { %v6055_v24 = vadd.f32 %v6054_v5, %v6053_v44  ;;  %v6276_v5 = vpop.permute.xlu0 %6275 }
 0x705   :  { %v6056_v3 = vmul.f32 0.5, %v6055_v24 }
 0x707   :  { %v6057_v21 = vsub.f32 %v7918_v27, %v6056_v3 }
 0x709   :  { %v6058_v11 = vmax.f32 %v6057_v21, 0.0 }
 0x70b   :  { %v6059_v61 = vmul.f32 %v6058_v11, %v6058_v11 }
 0x70d   :  { %v6063_v58 = vrot.slane %v6059_v61, %v6062_v38  ;;  %v6071_v33 = vrot.slane %v6059_v61, %v6070_v36  ;;  %v6079_v20 = vrot.slane %v6059_v61, %v6078_v32  ;;  %v6087_v45 = vrot.slane %v6059_v61, %v6086_v23 }
 0x70e   :  { %v6095_v50 = vrot.slane %v6059_v61, %v6094_v4  ;;  %v6103_v47 = vrot.slane %v6059_v61, %v6102_v28  ;;  %v6111_v43 = vrot.slane %v6059_v61, %v6110_v41 }
 0x70f   :  { %v6065_v27 = vmul.f32 %v6063_v58, %v5506_v25  ;;  %v6073_v60 = vmul.f32 %v6071_v33, %v5507_v37  ;;  %v6081_v42 = vmul.f32 %v6079_v20, %v5508_v59  ;;  %v6064_v30 = vmul.f32 %v6063_v58, %v5497_v57 }
 0x710   :  { %v6072_v6 = vmul.f32 %v6071_v33, %v5498_v40  ;;  %v6089_v34 = vmul.f32 %v6087_v45, %v5509_v31  ;;  %v6080_v29 = vmul.f32 %v6079_v20, %v5499_v8  ;;  %v6097_v54 = vmul.f32 %v6095_v50, %v5510_v1 }
 0x711   :  { %v6075_v51 = vadd.f32 %v6073_v60, %v6065_v27  ;;  %v6088_v48 = vmul.f32 %v6087_v45, %v5500_v10  ;;  %v6119_v40 = vrot.slane %v6059_v61, %v6118_v22  ;;  %v6105_v55 = vmul.f32 %v6103_v47, %v5511_v19 }
 0x712   :  { %v6074_v37 = vadd.f32 %v6072_v6, %v6064_v30  ;;  %v6096_v31 = vmul.f32 %v6095_v50, %v5501_v26  ;;  %v8053_v8 = vmax.f32 %v7826_v52, 0.0  ;;  %v6104_v1 = vmul.f32 %v6103_v47, %v8054_v18 }
 0x713   :  { %v6083_v25 = vadd.f32 %v6081_v42, %v6075_v51  ;;  %v6121_v10 = vmul.f32 %v6119_v40, %v8055_v15  ;;  %v6112_v19 = vmul.f32 %v6111_v43, %v8056_v14  ;;  %v6120_v26 = vmul.f32 %v6119_v40, %v8057_v56 }
 0x714   :  { %v6082_v57 = vadd.f32 %v6080_v29, %v6074_v37  ;;  %v6113_v13 = vmul.f32 %v6111_v43, %v8053_v8 }
 0x715   :  { %v6091_v12 = vadd.f32 %v6089_v34, %v6083_v25 }
 0x716   :  { %v6090_v62 = vadd.f32 %v6088_v48, %v6082_v57 }
 0x717   :  { %v6099_v59 = vadd.f32 %v6097_v54, %v6091_v12 }
 0x718   :  { %v6098_v39 = vadd.f32 %v6096_v31, %v6090_v62 }
 0x719   :  { %v6107_v17 = vadd.f32 %v6105_v55, %v6099_v59 }
 0x71a   :  { %v6106_v7 = vadd.f32 %v6104_v1, %v6098_v39 }
 0x71b   :  { %v6115_v16 = vadd.f32 %v6113_v13, %v6107_v17 }
 0x71c   :  { %v6114_v49 = vadd.f32 %v6112_v19, %v6106_v7 }
 0x71d   :  { %v6123_v0 = vadd.f32 %v6121_v10, %v6115_v16 }
 0x71e   :  { %v6122_v52 = vadd.f32 %v6120_v26, %v6114_v49 }
 0x71f   :  { %6681 = vmatpush3.msra.mxu0 %v6123_v0 }
 0x720   :  { %6682 = vmatprep.subr.mxu0 %v8052_v9 }
 0x721   :  { %6683 = vmatpush3.msra.mxu0 %v6122_v52 }
 0x722   :  { %6685 = vmatmul.mubr.msk.f32.vlgmr.msra.gmra.mxu0 %vm1321_vm1, %v6124_v46 }
 0x724   :  { %v6195_v53 = vpop.f32.mrf.mxu1 }
 0x726   :  { %v6679_v2 = vpop.f32.mrf.mxu1 }
 0x7e2   :  { %v6268_v63 = vpop.f32.mrf.mxu0 }
 0x7e3   :  { %v6269_v44 = vadd.f32 %v6268_v63, %v6195_v53 }
 0x7e4   :  { %v6686_v35 = vpop.f32.mrf.mxu0 }
 0x7e5   :  { %v6278_v24 = vadd.f32 %v6276_v5, %v6269_v44 }
 0x7e7   :  { %v6280_v3 = vand.u32 2147483647, %v6278_v24  ;;  %6279 = vst [vmem:[#allocation5] sm:$0x1] %v6278_v24 }
 0x7e8   :  { %6734 = shalt.err (!%p6731_p9)
}
 0x7e9   :  { %6299 = dma.vmem_to_hbm [thread:$0]  %s6297_s25, 16, %s8022_s14, [#allocation4]   ;;  %v6281_v9 = vsub.f32 0.0, %v6280_v3  ;;  %v6287_v61 = vmax.f32 %v6278_v24, 0.0 }
 0x7ea   :  { %s6778_s9 = smov [#allocation6]  }
 0x7eb   :  { %v6282_v21 = vmul.f32 1.442695, %v6281_v9  ;;  %s6306_s29 = sshll.u32 %s6778_s9, 4  ;;  %s6307_s29 = int_to_ptr.vmem [resolvable:$true] %s6306_s29 }
 0x7ec   :  { %s6743_s30 = scalar_lea.vmem %s6307_s29, 16  ;;  %s6747_s3 = scalar_lea.vmem %s6307_s29, 32 }
 0x7ed   :  { %6699 = vpow2.f32 %v6282_v21  ;;  %p6744_p10 = scmp.ne.s32.totalorder %s6307_s29, %s6743_s30  ;;  %p6748_p11 = scmp.lt.s32.totalorder %s6307_s29, %s6307_s29 }
 0x7ee   :  { %p6749_p12 = scmp.lt.s32.totalorder %s6747_s3, %s6743_s30 }
 0x7f0   :  { %p6750_p13 = por %p6749_p12, %p6748_p11 }
 0x7f2   :  { %p6751_p0 = pnand %p6750_p13, %p6744_p10 }
 0x7fa   :  { %v6700_v11 = vpop.eup %6699 }
 0x7fb   :  { %v6284_v38 = vadd.f32 1.0, %v6700_v11 }
 0x7fd   :  { %6701 = vlog2.f32 %v6284_v38 }
 0x80a   :  { %v6702_v36 = vpop.eup %6701 }
 0x80b   :  { %v6286_v32 = vmul.f32 0.6931472, %v6702_v36 }
 0x80d   :  { %v6288_v23 = vadd.f32 %v6287_v61, %v6286_v32 }
 0x80f   :  { %6289 = vst [vmem:[#allocation6 - $0x1] sm:$0x2] %v6288_v23 }
 0x810   :  { %6754 = shalt.err (!%p6751_p0)
}
 0x811   :  { %6309 = dma.vmem_to_hbm [thread:$0]  %s6307_s29, 16, %s8023_s15, [#allocation7]  }
 0x812   :  { %6765 = dma.done.wait [#allocation4], 16  }
 0x813   :  { %6766 = vsyncadd [#allocation4], 4294967280 }
 0x814   :  { %6767 = dma.done.wait [#allocation7], 16  }
 0x815   :  { %6768 = vsyncadd [#allocation7], 4294967280 }
 0x816   :  { %6316 = vsyncpa [#allocation3], 1 }
 0x817   :  { %6317 = vsyncpa [#allocation4], 1 }
 0x818   :  { %6318 = vsyncpa [#allocation7], 1 }

</bundles_post_ra>
